<compile_context>
chip_gen: v6e
topology: v6e:2x2x1
jax: 0.10.0
libtpu: 0.0.40
codegen_flags: <defaults>
</compile_context>

<pallas_src>
import jax
import jax.numpy as jnp
from jax.experimental import pallas as pl
from jax.experimental.pallas import tpu as pltpu

NEG_INF = -jnp.inf


# ----------------------------------------------------------------------------
# Fused SPPF kernel (one batch element per grid step)
# ----------------------------------------------------------------------------
def _sppf_fused_kernel(x_ref, w1_ref, s1_ref, w2_ref, s2_ref, o_ref,
                       pw_ref, ph_ref):
    # x_ref : (Cin, H, W)      VMEM   (batch dim squeezed by BlockSpec)
    # w1_ref: (Ch, Cin)        SMEM   BN-scale-folded conv1 weights
    # s1_ref: (Ch,)            SMEM   conv1 BN shift
    # w2_ref: (Cout, 4*Ch)     SMEM   BN-scale-folded conv2 weights
    # s2_ref: (Cout,)          SMEM   conv2 BN shift
    # o_ref : (Cout, H, W)     VMEM
    # pw_ref: (Ch, H, W + 4)   VMEM scratch (-inf padded along W)
    # ph_ref: (Ch, H + 4, W)   VMEM scratch (-inf padded along H)
    Cin, H, W = x_ref.shape
    Ch = w1_ref.shape[0]
    Cout = w2_ref.shape[0]
    dt = o_ref.dtype

    # Initialize scratch once; pool writes always overwrite the center region,
    # so the -inf borders persist across the three pools.
    pw_ref[...] = jnp.full(pw_ref.shape, NEG_INF, dt)
    ph_ref[...] = jnp.full(ph_ref.shape, NEG_INF, dt)

    # ---- conv1 (1x1) + folded BN + ReLU : per-channel scalar MAC on the VPU
    xs = [x_ref[ci] for ci in range(Cin)]          # Cin planes of (H, W)
    h1 = []
    for co in range(Ch):
        acc = xs[0] * w1_ref[co, 0]
        for ci in range(1, Cin):
            acc = acc + xs[ci] * w1_ref[co, ci]
        h1.append(jnp.maximum(acc + s1_ref[co], 0.0).astype(dt))

    # ---- conv2 accumulators: the 4*Ch channel concat is never materialized
    out_acc = [jnp.zeros((H, W), dt) for _ in range(Cout)]

    def add_branch(planes, branch):
        off = branch * Ch
        for co in range(Cout):
            a = out_acc[co]
            for ci in range(Ch):
                a = a + planes[ci] * w2_ref[co, off + ci]
            out_acc[co] = a

    def pool5(planes):
        # Separable 5x5 / stride-1 / pad-2 max pool on Ch planes of (H, W),
        # border handled by the -inf padded VMEM scratch.
        for c in range(Ch):
            pw_ref[c, :, 2:2 + W] = planes[c]
        for c in range(Ch):
            t = pw_ref[c, :, 0:W]
            for dw in range(1, 5):
                t = jnp.maximum(t, pw_ref[c, :, dw:dw + W])
            ph_ref[c, 2:2 + H, :] = t
        pooled = []
        for c in range(Ch):
            r = ph_ref[c, 0:H, :]
            for dh in range(1, 5):
                r = jnp.maximum(r, ph_ref[c, dh:dh + H, :])
            pooled.append(r)
        return pooled

    add_branch(h1, 0)
    h2 = pool5(h1)
    add_branch(h2, 1)
    h3 = pool5(h2)
    add_branch(h3, 2)
    h4 = pool5(h3)
    add_branch(h4, 3)

    # ---- conv2 epilogue: BN shift + ReLU, write NCHW output directly
    for co in range(Cout):
        o_ref[co, :, :] = jnp.maximum(out_acc[co] + s2_ref[co], 0.0).astype(dt)


def sppf_forward(x, w1f, shift1, w2f, shift2):
    """x: (N, Cin, H, W) NCHW; w1f: (Ch, Cin); w2f: (Cout, 4*Ch); shifts 1-D."""
    N, Cin, H, W = x.shape
    Ch = w1f.shape[0]
    Cout = w2f.shape[0]

    return pl.pallas_call(
        _sppf_fused_kernel,
        out_shape=jax.ShapeDtypeStruct((N, Cout, H, W), x.dtype),
        grid=(N,),
        in_specs=[
            pl.BlockSpec((None, Cin, H, W), lambda b: (b, 0, 0, 0)),
            pl.BlockSpec(memory_space=pltpu.MemorySpace.SMEM),   # w1f
            pl.BlockSpec(memory_space=pltpu.MemorySpace.SMEM),   # shift1
            pl.BlockSpec(memory_space=pltpu.MemorySpace.SMEM),   # w2f
            pl.BlockSpec(memory_space=pltpu.MemorySpace.SMEM),   # shift2
        ],
        out_specs=pl.BlockSpec((None, Cout, H, W), lambda b: (b, 0, 0, 0)),
        scratch_shapes=[
            pltpu.VMEM((Ch, H, W + 4), x.dtype),   # W-pass -inf padded buffer
            pltpu.VMEM((Ch, H + 4, W), x.dtype),   # H-pass -inf padded buffer
        ],
        compiler_params=pltpu.CompilerParams(
            dimension_semantics=("parallel",),       # batch -> 2 TCs on v7x
            vmem_limit_bytes=32 * 1024 * 1024,       # fits v7x 64 MiB VMEM
        ),
    )(x, w1f, shift1, w2f, shift2)


# ----------------------------------------------------------------------------
# BN folding (inference semantics) into conv weights + shift
# ----------------------------------------------------------------------------
def fold_bn_into_weights(w, gamma, beta, running_mean, running_var, eps=1e-5):
    scale = gamma / jnp.sqrt(running_var + eps)      # (Cout,)
    w_folded = w * scale[:, None]                    # (Cout, Cin)
    shift = beta - running_mean * scale              # (Cout,)
    return w_folded, shift


# ----------------------------------------------------------------------------
# Pure-JAX reference (original, unfolded semantics) for correctness check
# ----------------------------------------------------------------------------
def sppf_reference(x, w1, w2, scale1, shift1, scale2, shift2):
    def conv_bn_relu(a, w, s, b):
        y = jnp.einsum("nchw,oc->nohw", a, w)
        y = y * s[None, :, None, None] + b[None, :, None, None]
        return jnp.maximum(y, 0.0)

    def pool(a):
        ap = jnp.pad(a, ((0, 0), (0, 0), (2, 2), (2, 2)),
                     constant_values=-jnp.inf)
        return jax.lax.reduce_window(ap, -jnp.inf, jax.lax.max,
                                     (1, 1, 5, 5), (1, 1, 1, 1), "VALID")

    h1 = conv_bn_relu(x, w1, scale1, shift1)
    h2 = pool(h1)
    h3 = pool(h2)
    h4 = pool(h3)
    h5 = jnp.concatenate([h1, h2, h3, h4], axis=1)
    return conv_bn_relu(h5, w2, scale2, shift2)


# ----------------------------------------------------------------------------
# Main
# ----------------------------------------------------------------------------
if __name__ == "__main__":
    key = jax.random.PRNGKey(0)
    k_x, k_w1, k_w2 = jax.random.split(key, 3)

    N, Cin, H, W = 2, 4, 16, 16
    Cout = 8
    Ch = Cout // 2  # hidden channels

    x = jax.random.normal(k_x, (N, Cin, H, W), dtype=jnp.float32)

    # Conv weights in PyTorch (Cout, Cin, 1, 1) orientation, squeezed to 2-D.
    w1 = jax.random.normal(k_w1, (Ch, Cin), dtype=jnp.float32) * 0.1
    w2 = jax.random.normal(k_w2, (Cout, 4 * Ch), dtype=jnp.float32) * 0.1

    # BatchNorm params at PyTorch defaults (eval semantics).
    eps = 1e-5
    g1, b1, m1, v1 = jnp.ones(Ch), jnp.zeros(Ch), jnp.zeros(Ch), jnp.ones(Ch)
    g2, b2, m2, v2 = (jnp.ones(Cout), jnp.zeros(Cout),
                      jnp.zeros(Cout), jnp.ones(Cout))

    w1f, s1 = fold_bn_into_weights(w1, g1, b1, m1, v1, eps)
    w2f, s2 = fold_bn_into_weights(w2, g2, b2, m2, v2, eps)

    out = jax.jit(sppf_forward)(x, w1f, s1, w2f, s2)
    out = jax.block_until_ready(out)

    scale1 = g1 / jnp.sqrt(v1 + eps)
    shift1 = b1 - m1 * scale1
    scale2 = g2 / jnp.sqrt(v2 + eps)
    shift2 = b2 - m2 * scale2
    ref = sppf_reference(x, w1, w2, scale1, shift1, scale2, shift2)

    assert out.shape == (N, Cout, H, W), out.shape
    assert jnp.allclose(out, ref, atol=1e-5, rtol=1e-5), "mismatch vs reference"

    print("KERNEL_OK")
</pallas_src>

<mosaic_0001>
module attributes {stable_mosaic.version = 11 : i64} {
  func.func @_sppf_fused_kernel(%arg0: i32, %arg1: memref<1x4x16x16xf32, #tpu.memory_space<vmem>>, %arg2: memref<4x4xf32, #tpu.memory_space<smem>>, %arg3: memref<4xf32, #tpu.memory_space<smem>>, %arg4: memref<8x16xf32, #tpu.memory_space<smem>>, %arg5: memref<8xf32, #tpu.memory_space<smem>>, %arg6: memref<1x8x16x16xf32, #tpu.memory_space<vmem>>, %arg7: memref<4x16x20xf32, #tpu.memory_space<vmem>>, %arg8: memref<4x20x16xf32, #tpu.memory_space<vmem>>) attributes {dimension_semantics = [#tpu.dimension_semantics<parallel>], iteration_bounds = array<i64: 2>, scalar_prefetch = 0 : i64, scratch_operands = 2 : i64, tpu.core_type = #tpu.core_type<tc>, window_params = [{transform_indices = @transform_0, window_bounds = array<i64: 1, 4, 16, 16>}, {transform_indices = @transform_1, window_bounds = array<i64: 4, 4>}, {transform_indices = @transform_2, window_bounds = array<i64: 4>}, {transform_indices = @transform_3, window_bounds = array<i64: 8, 16>}, {transform_indices = @transform_4, window_bounds = array<i64: 8>}, {transform_indices = @transform_5, window_bounds = array<i64: 1, 8, 16, 16>}]} {
    %cst = arith.constant 0xFF800000 : f32
    %0 = vector.broadcast %cst : f32 to vector<4x16x20xf32>
    %c0 = arith.constant 0 : index
    %c0_0 = arith.constant 0 : index
    %c0_1 = arith.constant 0 : index
    %1 = vector.load %arg7[%c0, %c0_0, %c0_1] : memref<4x16x20xf32, #tpu.memory_space<vmem>>, vector<4x16x20xf32>
    tpu.vector_store %arg7[%c0, %c0_0, %c0_1], %0 {strides = array<i32>} : memref<4x16x20xf32, #tpu.memory_space<vmem>>, vector<4x16x20xf32>,
    %cst_2 = arith.constant 0xFF800000 : f32
    %2 = vector.broadcast %cst_2 : f32 to vector<4x20x16xf32>
    %c0_3 = arith.constant 0 : index
    %c0_4 = arith.constant 0 : index
    %c0_5 = arith.constant 0 : index
    %3 = vector.load %arg8[%c0_3, %c0_4, %c0_5] : memref<4x20x16xf32, #tpu.memory_space<vmem>>, vector<4x20x16xf32>
    tpu.vector_store %arg8[%c0_3, %c0_4, %c0_5], %2 {strides = array<i32>} : memref<4x20x16xf32, #tpu.memory_space<vmem>>, vector<4x20x16xf32>,
    %c0_6 = arith.constant 0 : index
    %c0_7 = arith.constant 0 : index
    %c0_8 = arith.constant 0 : index
    %c0_9 = arith.constant 0 : index
    %4 = vector.load %arg1[%c0_6, %c0_7, %c0_8, %c0_9] : memref<1x4x16x16xf32, #tpu.memory_space<vmem>>, vector<1x1x16x16xf32>
    %5 = vector.shape_cast %4 : vector<1x1x16x16xf32> to vector<16x16xf32>
    %c0_10 = arith.constant 0 : index
    %c1 = arith.constant 1 : index
    %c0_11 = arith.constant 0 : index
    %c0_12 = arith.constant 0 : index
    %6 = vector.load %arg1[%c0_10, %c1, %c0_11, %c0_12] : memref<1x4x16x16xf32, #tpu.memory_space<vmem>>, vector<1x1x16x16xf32>
    %7 = vector.shape_cast %6 : vector<1x1x16x16xf32> to vector<16x16xf32>
    %c0_13 = arith.constant 0 : index
    %c2 = arith.constant 2 : index
    %c0_14 = arith.constant 0 : index
    %c0_15 = arith.constant 0 : index
    %8 = vector.load %arg1[%c0_13, %c2, %c0_14, %c0_15] : memref<1x4x16x16xf32, #tpu.memory_space<vmem>>, vector<1x1x16x16xf32>
    %9 = vector.shape_cast %8 : vector<1x1x16x16xf32> to vector<16x16xf32>
    %c0_16 = arith.constant 0 : index
    %c3 = arith.constant 3 : index
    %c0_17 = arith.constant 0 : index
    %c0_18 = arith.constant 0 : index
    %10 = vector.load %arg1[%c0_16, %c3, %c0_17, %c0_18] : memref<1x4x16x16xf32, #tpu.memory_space<vmem>>, vector<1x1x16x16xf32>
    %11 = vector.shape_cast %10 : vector<1x1x16x16xf32> to vector<16x16xf32>
    %c0_19 = arith.constant 0 : index
    %c0_20 = arith.constant 0 : index
    %12 = memref.load %arg2[%c0_19, %c0_20] : memref<4x4xf32, #tpu.memory_space<smem>>
    %13 = vector.broadcast %12 : f32 to vector<16x16xf32>
    %14 = arith.mulf %5, %13 : vector<16x16xf32>
    %c0_21 = arith.constant 0 : index
    %c1_22 = arith.constant 1 : index
    %15 = memref.load %arg2[%c0_21, %c1_22] : memref<4x4xf32, #tpu.memory_space<smem>>
    %16 = vector.broadcast %15 : f32 to vector<16x16xf32>
    %17 = arith.mulf %7, %16 : vector<16x16xf32>
    %18 = arith.addf %14, %17 : vector<16x16xf32>
    %c0_23 = arith.constant 0 : index
    %c2_24 = arith.constant 2 : index
    %19 = memref.load %arg2[%c0_23, %c2_24] : memref<4x4xf32, #tpu.memory_space<smem>>
    %20 = vector.broadcast %19 : f32 to vector<16x16xf32>
    %21 = arith.mulf %9, %20 : vector<16x16xf32>
    %22 = arith.addf %18, %21 : vector<16x16xf32>
    %c0_25 = arith.constant 0 : index
    %c3_26 = arith.constant 3 : index
    %23 = memref.load %arg2[%c0_25, %c3_26] : memref<4x4xf32, #tpu.memory_space<smem>>
    %24 = vector.broadcast %23 : f32 to vector<16x16xf32>
    %25 = arith.mulf %11, %24 : vector<16x16xf32>
    %26 = arith.addf %22, %25 : vector<16x16xf32>
    %c0_27 = arith.constant 0 : index
    %27 = memref.load %arg3[%c0_27] : memref<4xf32, #tpu.memory_space<smem>>
    %28 = vector.broadcast %27 : f32 to vector<16x16xf32>
    %29 = arith.addf %26, %28 : vector<16x16xf32>
    %cst_28 = arith.constant 0.000000e+00 : f32
    %30 = vector.broadcast %cst_28 : f32 to vector<16x16xf32>
    %31 = arith.maximumf %29, %30 : vector<16x16xf32>
    %c1_29 = arith.constant 1 : index
    %c0_30 = arith.constant 0 : index
    %32 = memref.load %arg2[%c1_29, %c0_30] : memref<4x4xf32, #tpu.memory_space<smem>>
    %33 = vector.broadcast %32 : f32 to vector<16x16xf32>
    %34 = arith.mulf %5, %33 : vector<16x16xf32>
    %c1_31 = arith.constant 1 : index
    %c1_32 = arith.constant 1 : index
    %35 = memref.load %arg2[%c1_31, %c1_32] : memref<4x4xf32, #tpu.memory_space<smem>>
    %36 = vector.broadcast %35 : f32 to vector<16x16xf32>
    %37 = arith.mulf %7, %36 : vector<16x16xf32>
    %38 = arith.addf %34, %37 : vector<16x16xf32>
    %c1_33 = arith.constant 1 : index
    %c2_34 = arith.constant 2 : index
    %39 = memref.load %arg2[%c1_33, %c2_34] : memref<4x4xf32, #tpu.memory_space<smem>>
    %40 = vector.broadcast %39 : f32 to vector<16x16xf32>
    %41 = arith.mulf %9, %40 : vector<16x16xf32>
    %42 = arith.addf %38, %41 : vector<16x16xf32>
    %c1_35 = arith.constant 1 : index
    %c3_36 = arith.constant 3 : index
    %43 = memref.load %arg2[%c1_35, %c3_36] : memref<4x4xf32, #tpu.memory_space<smem>>
    %44 = vector.broadcast %43 : f32 to vector<16x16xf32>
    %45 = arith.mulf %11, %44 : vector<16x16xf32>
    %46 = arith.addf %42, %45 : vector<16x16xf32>
    %c1_37 = arith.constant 1 : index
    %47 = memref.load %arg3[%c1_37] : memref<4xf32, #tpu.memory_space<smem>>
    %48 = vector.broadcast %47 : f32 to vector<16x16xf32>
    %49 = arith.addf %46, %48 : vector<16x16xf32>
    %cst_38 = arith.constant 0.000000e+00 : f32
    %50 = vector.broadcast %cst_38 : f32 to vector<16x16xf32>
    %51 = arith.maximumf %49, %50 : vector<16x16xf32>
    %c2_39 = arith.constant 2 : index
    %c0_40 = arith.constant 0 : index
    %52 = memref.load %arg2[%c2_39, %c0_40] : memref<4x4xf32, #tpu.memory_space<smem>>
    %53 = vector.broadcast %52 : f32 to vector<16x16xf32>
    %54 = arith.mulf %5, %53 : vector<16x16xf32>
    %c2_41 = arith.constant 2 : index
    %c1_42 = arith.constant 1 : index
    %55 = memref.load %arg2[%c2_41, %c1_42] : memref<4x4xf32, #tpu.memory_space<smem>>
    %56 = vector.broadcast %55 : f32 to vector<16x16xf32>
    %57 = arith.mulf %7, %56 : vector<16x16xf32>
    %58 = arith.addf %54, %57 : vector<16x16xf32>
    %c2_43 = arith.constant 2 : index
    %c2_44 = arith.constant 2 : index
    %59 = memref.load %arg2[%c2_43, %c2_44] : memref<4x4xf32, #tpu.memory_space<smem>>
    %60 = vector.broadcast %59 : f32 to vector<16x16xf32>
    %61 = arith.mulf %9, %60 : vector<16x16xf32>
    %62 = arith.addf %58, %61 : vector<16x16xf32>
    %c2_45 = arith.constant 2 : index
    %c3_46 = arith.constant 3 : index
    %63 = memref.load %arg2[%c2_45, %c3_46] : memref<4x4xf32, #tpu.memory_space<smem>>
    %64 = vector.broadcast %63 : f32 to vector<16x16xf32>
    %65 = arith.mulf %11, %64 : vector<16x16xf32>
    %66 = arith.addf %62, %65 : vector<16x16xf32>
    %c2_47 = arith.constant 2 : index
    %67 = memref.load %arg3[%c2_47] : memref<4xf32, #tpu.memory_space<smem>>
    %68 = vector.broadcast %67 : f32 to vector<16x16xf32>
    %69 = arith.addf %66, %68 : vector<16x16xf32>
    %cst_48 = arith.constant 0.000000e+00 : f32
    %70 = vector.broadcast %cst_48 : f32 to vector<16x16xf32>
    %71 = arith.maximumf %69, %70 : vector<16x16xf32>
    %c3_49 = arith.constant 3 : index
    %c0_50 = arith.constant 0 : index
    %72 = memref.load %arg2[%c3_49, %c0_50] : memref<4x4xf32, #tpu.memory_space<smem>>
    %73 = vector.broadcast %72 : f32 to vector<16x16xf32>
    %74 = arith.mulf %5, %73 : vector<16x16xf32>
    %c3_51 = arith.constant 3 : index
    %c1_52 = arith.constant 1 : index
    %75 = memref.load %arg2[%c3_51, %c1_52] : memref<4x4xf32, #tpu.memory_space<smem>>
    %76 = vector.broadcast %75 : f32 to vector<16x16xf32>
    %77 = arith.mulf %7, %76 : vector<16x16xf32>
    %78 = arith.addf %74, %77 : vector<16x16xf32>
    %c3_53 = arith.constant 3 : index
    %c2_54 = arith.constant 2 : index
    %79 = memref.load %arg2[%c3_53, %c2_54] : memref<4x4xf32, #tpu.memory_space<smem>>
    %80 = vector.broadcast %79 : f32 to vector<16x16xf32>
    %81 = arith.mulf %9, %80 : vector<16x16xf32>
    %82 = arith.addf %78, %81 : vector<16x16xf32>
    %c3_55 = arith.constant 3 : index
    %c3_56 = arith.constant 3 : index
    %83 = memref.load %arg2[%c3_55, %c3_56] : memref<4x4xf32, #tpu.memory_space<smem>>
    %84 = vector.broadcast %83 : f32 to vector<16x16xf32>
    %85 = arith.mulf %11, %84 : vector<16x16xf32>
    %86 = arith.addf %82, %85 : vector<16x16xf32>
    %c3_57 = arith.constant 3 : index
    %87 = memref.load %arg3[%c3_57] : memref<4xf32, #tpu.memory_space<smem>>
    %88 = vector.broadcast %87 : f32 to vector<16x16xf32>
    %89 = arith.addf %86, %88 : vector<16x16xf32>
    %cst_58 = arith.constant 0.000000e+00 : f32
    %90 = vector.broadcast %cst_58 : f32 to vector<16x16xf32>
    %91 = arith.maximumf %89, %90 : vector<16x16xf32>
    %cst_59 = arith.constant 0.000000e+00 : f32
    %92 = vector.broadcast %cst_59 : f32 to vector<16x16xf32>
    %cst_60 = arith.constant 0.000000e+00 : f32
    %93 = vector.broadcast %cst_60 : f32 to vector<16x16xf32>
    %cst_61 = arith.constant 0.000000e+00 : f32
    %94 = vector.broadcast %cst_61 : f32 to vector<16x16xf32>
    %cst_62 = arith.constant 0.000000e+00 : f32
    %95 = vector.broadcast %cst_62 : f32 to vector<16x16xf32>
    %cst_63 = arith.constant 0.000000e+00 : f32
    %96 = vector.broadcast %cst_63 : f32 to vector<16x16xf32>
    %cst_64 = arith.constant 0.000000e+00 : f32
    %97 = vector.broadcast %cst_64 : f32 to vector<16x16xf32>
    %cst_65 = arith.constant 0.000000e+00 : f32
    %98 = vector.broadcast %cst_65 : f32 to vector<16x16xf32>
    %cst_66 = arith.constant 0.000000e+00 : f32
    %99 = vector.broadcast %cst_66 : f32 to vector<16x16xf32>
    %c0_67 = arith.constant 0 : index
    %c0_68 = arith.constant 0 : index
    %100 = memref.load %arg4[%c0_67, %c0_68] : memref<8x16xf32, #tpu.memory_space<smem>>
    %101 = vector.broadcast %100 : f32 to vector<16x16xf32>
    %102 = arith.mulf %31, %101 : vector<16x16xf32>
    %103 = arith.addf %92, %102 : vector<16x16xf32>
    %c0_69 = arith.constant 0 : index
    %c1_70 = arith.constant 1 : index
    %104 = memref.load %arg4[%c0_69, %c1_70] : memref<8x16xf32, #tpu.memory_space<smem>>
    %105 = vector.broadcast %104 : f32 to vector<16x16xf32>
    %106 = arith.mulf %51, %105 : vector<16x16xf32>
    %107 = arith.addf %103, %106 : vector<16x16xf32>
    %c0_71 = arith.constant 0 : index
    %c2_72 = arith.constant 2 : index
    %108 = memref.load %arg4[%c0_71, %c2_72] : memref<8x16xf32, #tpu.memory_space<smem>>
    %109 = vector.broadcast %108 : f32 to vector<16x16xf32>
    %110 = arith.mulf %71, %109 : vector<16x16xf32>
    %111 = arith.addf %107, %110 : vector<16x16xf32>
    %c0_73 = arith.constant 0 : index
    %c3_74 = arith.constant 3 : index
    %112 = memref.load %arg4[%c0_73, %c3_74] : memref<8x16xf32, #tpu.memory_space<smem>>
    %113 = vector.broadcast %112 : f32 to vector<16x16xf32>
    %114 = arith.mulf %91, %113 : vector<16x16xf32>
    %115 = arith.addf %111, %114 : vector<16x16xf32>
    %c1_75 = arith.constant 1 : index
    %c0_76 = arith.constant 0 : index
    %116 = memref.load %arg4[%c1_75, %c0_76] : memref<8x16xf32, #tpu.memory_space<smem>>
    %117 = vector.broadcast %116 : f32 to vector<16x16xf32>
    %118 = arith.mulf %31, %117 : vector<16x16xf32>
    %119 = arith.addf %93, %118 : vector<16x16xf32>
    %c1_77 = arith.constant 1 : index
    %c1_78 = arith.constant 1 : index
    %120 = memref.load %arg4[%c1_77, %c1_78] : memref<8x16xf32, #tpu.memory_space<smem>>
    %121 = vector.broadcast %120 : f32 to vector<16x16xf32>
    %122 = arith.mulf %51, %121 : vector<16x16xf32>
    %123 = arith.addf %119, %122 : vector<16x16xf32>
    %c1_79 = arith.constant 1 : index
    %c2_80 = arith.constant 2 : index
    %124 = memref.load %arg4[%c1_79, %c2_80] : memref<8x16xf32, #tpu.memory_space<smem>>
    %125 = vector.broadcast %124 : f32 to vector<16x16xf32>
    %126 = arith.mulf %71, %125 : vector<16x16xf32>
    %127 = arith.addf %123, %126 : vector<16x16xf32>
    %c1_81 = arith.constant 1 : index
    %c3_82 = arith.constant 3 : index
    %128 = memref.load %arg4[%c1_81, %c3_82] : memref<8x16xf32, #tpu.memory_space<smem>>
    %129 = vector.broadcast %128 : f32 to vector<16x16xf32>
    %130 = arith.mulf %91, %129 : vector<16x16xf32>
    %131 = arith.addf %127, %130 : vector<16x16xf32>
    %c2_83 = arith.constant 2 : index
    %c0_84 = arith.constant 0 : index
    %132 = memref.load %arg4[%c2_83, %c0_84] : memref<8x16xf32, #tpu.memory_space<smem>>
    %133 = vector.broadcast %132 : f32 to vector<16x16xf32>
    %134 = arith.mulf %31, %133 : vector<16x16xf32>
    %135 = arith.addf %94, %134 : vector<16x16xf32>
    %c2_85 = arith.constant 2 : index
    %c1_86 = arith.constant 1 : index
    %136 = memref.load %arg4[%c2_85, %c1_86] : memref<8x16xf32, #tpu.memory_space<smem>>
    %137 = vector.broadcast %136 : f32 to vector<16x16xf32>
    %138 = arith.mulf %51, %137 : vector<16x16xf32>
    %139 = arith.addf %135, %138 : vector<16x16xf32>
    %c2_87 = arith.constant 2 : index
    %c2_88 = arith.constant 2 : index
    %140 = memref.load %arg4[%c2_87, %c2_88] : memref<8x16xf32, #tpu.memory_space<smem>>
    %141 = vector.broadcast %140 : f32 to vector<16x16xf32>
    %142 = arith.mulf %71, %141 : vector<16x16xf32>
    %143 = arith.addf %139, %142 : vector<16x16xf32>
    %c2_89 = arith.constant 2 : index
    %c3_90 = arith.constant 3 : index
    %144 = memref.load %arg4[%c2_89, %c3_90] : memref<8x16xf32, #tpu.memory_space<smem>>
    %145 = vector.broadcast %144 : f32 to vector<16x16xf32>
    %146 = arith.mulf %91, %145 : vector<16x16xf32>
    %147 = arith.addf %143, %146 : vector<16x16xf32>
    %c3_91 = arith.constant 3 : index
    %c0_92 = arith.constant 0 : index
    %148 = memref.load %arg4[%c3_91, %c0_92] : memref<8x16xf32, #tpu.memory_space<smem>>
    %149 = vector.broadcast %148 : f32 to vector<16x16xf32>
    %150 = arith.mulf %31, %149 : vector<16x16xf32>
    %151 = arith.addf %95, %150 : vector<16x16xf32>
    %c3_93 = arith.constant 3 : index
    %c1_94 = arith.constant 1 : index
    %152 = memref.load %arg4[%c3_93, %c1_94] : memref<8x16xf32, #tpu.memory_space<smem>>
    %153 = vector.broadcast %152 : f32 to vector<16x16xf32>
    %154 = arith.mulf %51, %153 : vector<16x16xf32>
    %155 = arith.addf %151, %154 : vector<16x16xf32>
    %c3_95 = arith.constant 3 : index
    %c2_96 = arith.constant 2 : index
    %156 = memref.load %arg4[%c3_95, %c2_96] : memref<8x16xf32, #tpu.memory_space<smem>>
    %157 = vector.broadcast %156 : f32 to vector<16x16xf32>
    %158 = arith.mulf %71, %157 : vector<16x16xf32>
    %159 = arith.addf %155, %158 : vector<16x16xf32>
    %c3_97 = arith.constant 3 : index
    %c3_98 = arith.constant 3 : index
    %160 = memref.load %arg4[%c3_97, %c3_98] : memref<8x16xf32, #tpu.memory_space<smem>>
    %161 = vector.broadcast %160 : f32 to vector<16x16xf32>
    %162 = arith.mulf %91, %161 : vector<16x16xf32>
    %163 = arith.addf %159, %162 : vector<16x16xf32>
    %c4 = arith.constant 4 : index
    %c0_99 = arith.constant 0 : index
    %164 = memref.load %arg4[%c4, %c0_99] : memref<8x16xf32, #tpu.memory_space<smem>>
    %165 = vector.broadcast %164 : f32 to vector<16x16xf32>
    %166 = arith.mulf %31, %165 : vector<16x16xf32>
    %167 = arith.addf %96, %166 : vector<16x16xf32>
    %c4_100 = arith.constant 4 : index
    %c1_101 = arith.constant 1 : index
    %168 = memref.load %arg4[%c4_100, %c1_101] : memref<8x16xf32, #tpu.memory_space<smem>>
    %169 = vector.broadcast %168 : f32 to vector<16x16xf32>
    %170 = arith.mulf %51, %169 : vector<16x16xf32>
    %171 = arith.addf %167, %170 : vector<16x16xf32>
    %c4_102 = arith.constant 4 : index
    %c2_103 = arith.constant 2 : index
    %172 = memref.load %arg4[%c4_102, %c2_103] : memref<8x16xf32, #tpu.memory_space<smem>>
    %173 = vector.broadcast %172 : f32 to vector<16x16xf32>
    %174 = arith.mulf %71, %173 : vector<16x16xf32>
    %175 = arith.addf %171, %174 : vector<16x16xf32>
    %c4_104 = arith.constant 4 : index
    %c3_105 = arith.constant 3 : index
    %176 = memref.load %arg4[%c4_104, %c3_105] : memref<8x16xf32, #tpu.memory_space<smem>>
    %177 = vector.broadcast %176 : f32 to vector<16x16xf32>
    %178 = arith.mulf %91, %177 : vector<16x16xf32>
    %179 = arith.addf %175, %178 : vector<16x16xf32>
    %c5 = arith.constant 5 : index
    %c0_106 = arith.constant 0 : index
    %180 = memref.load %arg4[%c5, %c0_106] : memref<8x16xf32, #tpu.memory_space<smem>>
    %181 = vector.broadcast %180 : f32 to vector<16x16xf32>
    %182 = arith.mulf %31, %181 : vector<16x16xf32>
    %183 = arith.addf %97, %182 : vector<16x16xf32>
    %c5_107 = arith.constant 5 : index
    %c1_108 = arith.constant 1 : index
    %184 = memref.load %arg4[%c5_107, %c1_108] : memref<8x16xf32, #tpu.memory_space<smem>>
    %185 = vector.broadcast %184 : f32 to vector<16x16xf32>
    %186 = arith.mulf %51, %185 : vector<16x16xf32>
    %187 = arith.addf %183, %186 : vector<16x16xf32>
    %c5_109 = arith.constant 5 : index
    %c2_110 = arith.constant 2 : index
    %188 = memref.load %arg4[%c5_109, %c2_110] : memref<8x16xf32, #tpu.memory_space<smem>>
    %189 = vector.broadcast %188 : f32 to vector<16x16xf32>
    %190 = arith.mulf %71, %189 : vector<16x16xf32>
    %191 = arith.addf %187, %190 : vector<16x16xf32>
    %c5_111 = arith.constant 5 : index
    %c3_112 = arith.constant 3 : index
    %192 = memref.load %arg4[%c5_111, %c3_112] : memref<8x16xf32, #tpu.memory_space<smem>>
    %193 = vector.broadcast %192 : f32 to vector<16x16xf32>
    %194 = arith.mulf %91, %193 : vector<16x16xf32>
    %195 = arith.addf %191, %194 : vector<16x16xf32>
    %c6 = arith.constant 6 : index
    %c0_113 = arith.constant 0 : index
    %196 = memref.load %arg4[%c6, %c0_113] : memref<8x16xf32, #tpu.memory_space<smem>>
    %197 = vector.broadcast %196 : f32 to vector<16x16xf32>
    %198 = arith.mulf %31, %197 : vector<16x16xf32>
    %199 = arith.addf %98, %198 : vector<16x16xf32>
    %c6_114 = arith.constant 6 : index
    %c1_115 = arith.constant 1 : index
    %200 = memref.load %arg4[%c6_114, %c1_115] : memref<8x16xf32, #tpu.memory_space<smem>>
    %201 = vector.broadcast %200 : f32 to vector<16x16xf32>
    %202 = arith.mulf %51, %201 : vector<16x16xf32>
    %203 = arith.addf %199, %202 : vector<16x16xf32>
    %c6_116 = arith.constant 6 : index
    %c2_117 = arith.constant 2 : index
    %204 = memref.load %arg4[%c6_116, %c2_117] : memref<8x16xf32, #tpu.memory_space<smem>>
    %205 = vector.broadcast %204 : f32 to vector<16x16xf32>
    %206 = arith.mulf %71, %205 : vector<16x16xf32>
    %207 = arith.addf %203, %206 : vector<16x16xf32>
    %c6_118 = arith.constant 6 : index
    %c3_119 = arith.constant 3 : index
    %208 = memref.load %arg4[%c6_118, %c3_119] : memref<8x16xf32, #tpu.memory_space<smem>>
    %209 = vector.broadcast %208 : f32 to vector<16x16xf32>
    %210 = arith.mulf %91, %209 : vector<16x16xf32>
    %211 = arith.addf %207, %210 : vector<16x16xf32>
    %c7 = arith.constant 7 : index
    %c0_120 = arith.constant 0 : index
    %212 = memref.load %arg4[%c7, %c0_120] : memref<8x16xf32, #tpu.memory_space<smem>>
    %213 = vector.broadcast %212 : f32 to vector<16x16xf32>
    %214 = arith.mulf %31, %213 : vector<16x16xf32>
    %215 = arith.addf %99, %214 : vector<16x16xf32>
    %c7_121 = arith.constant 7 : index
    %c1_122 = arith.constant 1 : index
    %216 = memref.load %arg4[%c7_121, %c1_122] : memref<8x16xf32, #tpu.memory_space<smem>>
    %217 = vector.broadcast %216 : f32 to vector<16x16xf32>
    %218 = arith.mulf %51, %217 : vector<16x16xf32>
    %219 = arith.addf %215, %218 : vector<16x16xf32>
    %c7_123 = arith.constant 7 : index
    %c2_124 = arith.constant 2 : index
    %220 = memref.load %arg4[%c7_123, %c2_124] : memref<8x16xf32, #tpu.memory_space<smem>>
    %221 = vector.broadcast %220 : f32 to vector<16x16xf32>
    %222 = arith.mulf %71, %221 : vector<16x16xf32>
    %223 = arith.addf %219, %222 : vector<16x16xf32>
    %c7_125 = arith.constant 7 : index
    %c3_126 = arith.constant 3 : index
    %224 = memref.load %arg4[%c7_125, %c3_126] : memref<8x16xf32, #tpu.memory_space<smem>>
    %225 = vector.broadcast %224 : f32 to vector<16x16xf32>
    %226 = arith.mulf %91, %225 : vector<16x16xf32>
    %227 = arith.addf %223, %226 : vector<16x16xf32>
    %c0_127 = arith.constant 0 : index
    %c0_128 = arith.constant 0 : index
    %c2_129 = arith.constant 2 : index
    %228 = vector.load %arg7[%c0_127, %c0_128, %c2_129] : memref<4x16x20xf32, #tpu.memory_space<vmem>>, vector<1x16x16xf32>
    %229 = vector.shape_cast %228 : vector<1x16x16xf32> to vector<16x16xf32>
    %230 = vector.shape_cast %31 : vector<16x16xf32> to vector<1x16x16xf32>
    tpu.vector_store %arg7[%c0_127, %c0_128, %c2_129], %230 {strides = array<i32>} : memref<4x16x20xf32, #tpu.memory_space<vmem>>, vector<1x16x16xf32>,
    %c1_130 = arith.constant 1 : index
    %c0_131 = arith.constant 0 : index
    %c2_132 = arith.constant 2 : index
    %231 = vector.load %arg7[%c1_130, %c0_131, %c2_132] : memref<4x16x20xf32, #tpu.memory_space<vmem>>, vector<1x16x16xf32>
    %232 = vector.shape_cast %231 : vector<1x16x16xf32> to vector<16x16xf32>
    %233 = vector.shape_cast %51 : vector<16x16xf32> to vector<1x16x16xf32>
    tpu.vector_store %arg7[%c1_130, %c0_131, %c2_132], %233 {strides = array<i32>} : memref<4x16x20xf32, #tpu.memory_space<vmem>>, vector<1x16x16xf32>,
    %c2_133 = arith.constant 2 : index
    %c0_134 = arith.constant 0 : index
    %c2_135 = arith.constant 2 : index
    %234 = vector.load %arg7[%c2_133, %c0_134, %c2_135] : memref<4x16x20xf32, #tpu.memory_space<vmem>>, vector<1x16x16xf32>
    %235 = vector.shape_cast %234 : vector<1x16x16xf32> to vector<16x16xf32>
    %236 = vector.shape_cast %71 : vector<16x16xf32> to vector<1x16x16xf32>
    tpu.vector_store %arg7[%c2_133, %c0_134, %c2_135], %236 {strides = array<i32>} : memref<4x16x20xf32, #tpu.memory_space<vmem>>, vector<1x16x16xf32>,
    %c3_136 = arith.constant 3 : index
    %c0_137 = arith.constant 0 : index
    %c2_138 = arith.constant 2 : index
    %237 = vector.load %arg7[%c3_136, %c0_137, %c2_138] : memref<4x16x20xf32, #tpu.memory_space<vmem>>, vector<1x16x16xf32>
    %238 = vector.shape_cast %237 : vector<1x16x16xf32> to vector<16x16xf32>
    %239 = vector.shape_cast %91 : vector<16x16xf32> to vector<1x16x16xf32>
    tpu.vector_store %arg7[%c3_136, %c0_137, %c2_138], %239 {strides = array<i32>} : memref<4x16x20xf32, #tpu.memory_space<vmem>>, vector<1x16x16xf32>,
    %c0_139 = arith.constant 0 : index
    %c0_140 = arith.constant 0 : index
    %c0_141 = arith.constant 0 : index
    %240 = vector.load %arg7[%c0_139, %c0_140, %c0_141] : memref<4x16x20xf32, #tpu.memory_space<vmem>>, vector<1x16x16xf32>
    %241 = vector.shape_cast %240 : vector<1x16x16xf32> to vector<16x16xf32>
    %c0_142 = arith.constant 0 : index
    %c0_143 = arith.constant 0 : index
    %c1_144 = arith.constant 1 : index
    %242 = vector.load %arg7[%c0_142, %c0_143, %c1_144] : memref<4x16x20xf32, #tpu.memory_space<vmem>>, vector<1x16x16xf32>
    %243 = vector.shape_cast %242 : vector<1x16x16xf32> to vector<16x16xf32>
    %244 = arith.maximumf %241, %243 : vector<16x16xf32>
    %c0_145 = arith.constant 0 : index
    %c0_146 = arith.constant 0 : index
    %c2_147 = arith.constant 2 : index
    %245 = vector.load %arg7[%c0_145, %c0_146, %c2_147] : memref<4x16x20xf32, #tpu.memory_space<vmem>>, vector<1x16x16xf32>
    %246 = vector.shape_cast %245 : vector<1x16x16xf32> to vector<16x16xf32>
    %247 = arith.maximumf %244, %246 : vector<16x16xf32>
    %c0_148 = arith.constant 0 : index
    %c0_149 = arith.constant 0 : index
    %c3_150 = arith.constant 3 : index
    %248 = vector.load %arg7[%c0_148, %c0_149, %c3_150] : memref<4x16x20xf32, #tpu.memory_space<vmem>>, vector<1x16x16xf32>
    %249 = vector.shape_cast %248 : vector<1x16x16xf32> to vector<16x16xf32>
    %250 = arith.maximumf %247, %249 : vector<16x16xf32>
    %c0_151 = arith.constant 0 : index
    %c0_152 = arith.constant 0 : index
    %c4_153 = arith.constant 4 : index
    %251 = vector.load %arg7[%c0_151, %c0_152, %c4_153] : memref<4x16x20xf32, #tpu.memory_space<vmem>>, vector<1x16x16xf32>
    %252 = vector.shape_cast %251 : vector<1x16x16xf32> to vector<16x16xf32>
    %253 = arith.maximumf %250, %252 : vector<16x16xf32>
    %c0_154 = arith.constant 0 : index
    %c2_155 = arith.constant 2 : index
    %c0_156 = arith.constant 0 : index
    %254 = vector.load %arg8[%c0_154, %c2_155, %c0_156] : memref<4x20x16xf32, #tpu.memory_space<vmem>>, vector<1x16x16xf32>
    %255 = vector.shape_cast %254 : vector<1x16x16xf32> to vector<16x16xf32>
    %256 = vector.shape_cast %253 : vector<16x16xf32> to vector<1x16x16xf32>
    tpu.vector_store %arg8[%c0_154, %c2_155, %c0_156], %256 {strides = array<i32>} : memref<4x20x16xf32, #tpu.memory_space<vmem>>, vector<1x16x16xf32>,
    %c1_157 = arith.constant 1 : index
    %c0_158 = arith.constant 0 : index
    %c0_159 = arith.constant 0 : index
    %257 = vector.load %arg7[%c1_157, %c0_158, %c0_159] : memref<4x16x20xf32, #tpu.memory_space<vmem>>, vector<1x16x16xf32>
    %258 = vector.shape_cast %257 : vector<1x16x16xf32> to vector<16x16xf32>
    %c1_160 = arith.constant 1 : index
    %c0_161 = arith.constant 0 : index
    %c1_162 = arith.constant 1 : index
    %259 = vector.load %arg7[%c1_160, %c0_161, %c1_162] : memref<4x16x20xf32, #tpu.memory_space<vmem>>, vector<1x16x16xf32>
    %260 = vector.shape_cast %259 : vector<1x16x16xf32> to vector<16x16xf32>
    %261 = arith.maximumf %258, %260 : vector<16x16xf32>
    %c1_163 = arith.constant 1 : index
    %c0_164 = arith.constant 0 : index
    %c2_165 = arith.constant 2 : index
    %262 = vector.load %arg7[%c1_163, %c0_164, %c2_165] : memref<4x16x20xf32, #tpu.memory_space<vmem>>, vector<1x16x16xf32>
    %263 = vector.shape_cast %262 : vector<1x16x16xf32> to vector<16x16xf32>
    %264 = arith.maximumf %261, %263 : vector<16x16xf32>
    %c1_166 = arith.constant 1 : index
    %c0_167 = arith.constant 0 : index
    %c3_168 = arith.constant 3 : index
    %265 = vector.load %arg7[%c1_166, %c0_167, %c3_168] : memref<4x16x20xf32, #tpu.memory_space<vmem>>, vector<1x16x16xf32>
    %266 = vector.shape_cast %265 : vector<1x16x16xf32> to vector<16x16xf32>
    %267 = arith.maximumf %264, %266 : vector<16x16xf32>
    %c1_169 = arith.constant 1 : index
    %c0_170 = arith.constant 0 : index
    %c4_171 = arith.constant 4 : index
    %268 = vector.load %arg7[%c1_169, %c0_170, %c4_171] : memref<4x16x20xf32, #tpu.memory_space<vmem>>, vector<1x16x16xf32>
    %269 = vector.shape_cast %268 : vector<1x16x16xf32> to vector<16x16xf32>
    %270 = arith.maximumf %267, %269 : vector<16x16xf32>
    %c1_172 = arith.constant 1 : index
    %c2_173 = arith.constant 2 : index
    %c0_174 = arith.constant 0 : index
    %271 = vector.load %arg8[%c1_172, %c2_173, %c0_174] : memref<4x20x16xf32, #tpu.memory_space<vmem>>, vector<1x16x16xf32>
    %272 = vector.shape_cast %271 : vector<1x16x16xf32> to vector<16x16xf32>
    %273 = vector.shape_cast %270 : vector<16x16xf32> to vector<1x16x16xf32>
    tpu.vector_store %arg8[%c1_172, %c2_173, %c0_174], %273 {strides = array<i32>} : memref<4x20x16xf32, #tpu.memory_space<vmem>>, vector<1x16x16xf32>,
    %c2_175 = arith.constant 2 : index
    %c0_176 = arith.constant 0 : index
    %c0_177 = arith.constant 0 : index
    %274 = vector.load %arg7[%c2_175, %c0_176, %c0_177] : memref<4x16x20xf32, #tpu.memory_space<vmem>>, vector<1x16x16xf32>
    %275 = vector.shape_cast %274 : vector<1x16x16xf32> to vector<16x16xf32>
    %c2_178 = arith.constant 2 : index
    %c0_179 = arith.constant 0 : index
    %c1_180 = arith.constant 1 : index
    %276 = vector.load %arg7[%c2_178, %c0_179, %c1_180] : memref<4x16x20xf32, #tpu.memory_space<vmem>>, vector<1x16x16xf32>
    %277 = vector.shape_cast %276 : vector<1x16x16xf32> to vector<16x16xf32>
    %278 = arith.maximumf %275, %277 : vector<16x16xf32>
    %c2_181 = arith.constant 2 : index
    %c0_182 = arith.constant 0 : index
    %c2_183 = arith.constant 2 : index
    %279 = vector.load %arg7[%c2_181, %c0_182, %c2_183] : memref<4x16x20xf32, #tpu.memory_space<vmem>>, vector<1x16x16xf32>
    %280 = vector.shape_cast %279 : vector<1x16x16xf32> to vector<16x16xf32>
    %281 = arith.maximumf %278, %280 : vector<16x16xf32>
    %c2_184 = arith.constant 2 : index
    %c0_185 = arith.constant 0 : index
    %c3_186 = arith.constant 3 : index
    %282 = vector.load %arg7[%c2_184, %c0_185, %c3_186] : memref<4x16x20xf32, #tpu.memory_space<vmem>>, vector<1x16x16xf32>
    %283 = vector.shape_cast %282 : vector<1x16x16xf32> to vector<16x16xf32>
    %284 = arith.maximumf %281, %283 : vector<16x16xf32>
    %c2_187 = arith.constant 2 : index
    %c0_188 = arith.constant 0 : index
    %c4_189 = arith.constant 4 : index
    %285 = vector.load %arg7[%c2_187, %c0_188, %c4_189] : memref<4x16x20xf32, #tpu.memory_space<vmem>>, vector<1x16x16xf32>
    %286 = vector.shape_cast %285 : vector<1x16x16xf32> to vector<16x16xf32>
    %287 = arith.maximumf %284, %286 : vector<16x16xf32>
    %c2_190 = arith.constant 2 : index
    %c2_191 = arith.constant 2 : index
    %c0_192 = arith.constant 0 : index
    %288 = vector.load %arg8[%c2_190, %c2_191, %c0_192] : memref<4x20x16xf32, #tpu.memory_space<vmem>>, vector<1x16x16xf32>
    %289 = vector.shape_cast %288 : vector<1x16x16xf32> to vector<16x16xf32>
    %290 = vector.shape_cast %287 : vector<16x16xf32> to vector<1x16x16xf32>
    tpu.vector_store %arg8[%c2_190, %c2_191, %c0_192], %290 {strides = array<i32>} : memref<4x20x16xf32, #tpu.memory_space<vmem>>, vector<1x16x16xf32>,
    %c3_193 = arith.constant 3 : index
    %c0_194 = arith.constant 0 : index
    %c0_195 = arith.constant 0 : index
    %291 = vector.load %arg7[%c3_193, %c0_194, %c0_195] : memref<4x16x20xf32, #tpu.memory_space<vmem>>, vector<1x16x16xf32>
    %292 = vector.shape_cast %291 : vector<1x16x16xf32> to vector<16x16xf32>
    %c3_196 = arith.constant 3 : index
    %c0_197 = arith.constant 0 : index
    %c1_198 = arith.constant 1 : index
    %293 = vector.load %arg7[%c3_196, %c0_197, %c1_198] : memref<4x16x20xf32, #tpu.memory_space<vmem>>, vector<1x16x16xf32>
    %294 = vector.shape_cast %293 : vector<1x16x16xf32> to vector<16x16xf32>
    %295 = arith.maximumf %292, %294 : vector<16x16xf32>
    %c3_199 = arith.constant 3 : index
    %c0_200 = arith.constant 0 : index
    %c2_201 = arith.constant 2 : index
    %296 = vector.load %arg7[%c3_199, %c0_200, %c2_201] : memref<4x16x20xf32, #tpu.memory_space<vmem>>, vector<1x16x16xf32>
    %297 = vector.shape_cast %296 : vector<1x16x16xf32> to vector<16x16xf32>
    %298 = arith.maximumf %295, %297 : vector<16x16xf32>
    %c3_202 = arith.constant 3 : index
    %c0_203 = arith.constant 0 : index
    %c3_204 = arith.constant 3 : index
    %299 = vector.load %arg7[%c3_202, %c0_203, %c3_204] : memref<4x16x20xf32, #tpu.memory_space<vmem>>, vector<1x16x16xf32>
    %300 = vector.shape_cast %299 : vector<1x16x16xf32> to vector<16x16xf32>
    %301 = arith.maximumf %298, %300 : vector<16x16xf32>
    %c3_205 = arith.constant 3 : index
    %c0_206 = arith.constant 0 : index
    %c4_207 = arith.constant 4 : index
    %302 = vector.load %arg7[%c3_205, %c0_206, %c4_207] : memref<4x16x20xf32, #tpu.memory_space<vmem>>, vector<1x16x16xf32>
    %303 = vector.shape_cast %302 : vector<1x16x16xf32> to vector<16x16xf32>
    %304 = arith.maximumf %301, %303 : vector<16x16xf32>
    %c3_208 = arith.constant 3 : index
    %c2_209 = arith.constant 2 : index
    %c0_210 = arith.constant 0 : index
    %305 = vector.load %arg8[%c3_208, %c2_209, %c0_210] : memref<4x20x16xf32, #tpu.memory_space<vmem>>, vector<1x16x16xf32>
    %306 = vector.shape_cast %305 : vector<1x16x16xf32> to vector<16x16xf32>
    %307 = vector.shape_cast %304 : vector<16x16xf32> to vector<1x16x16xf32>
    tpu.vector_store %arg8[%c3_208, %c2_209, %c0_210], %307 {strides = array<i32>} : memref<4x20x16xf32, #tpu.memory_space<vmem>>, vector<1x16x16xf32>,
    %c0_211 = arith.constant 0 : index
    %c0_212 = arith.constant 0 : index
    %c0_213 = arith.constant 0 : index
    %308 = vector.load %arg8[%c0_211, %c0_212, %c0_213] : memref<4x20x16xf32, #tpu.memory_space<vmem>>, vector<1x16x16xf32>
    %309 = vector.shape_cast %308 : vector<1x16x16xf32> to vector<16x16xf32>
    %c0_214 = arith.constant 0 : index
    %c1_215 = arith.constant 1 : index
    %c0_216 = arith.constant 0 : index
    %310 = vector.load %arg8[%c0_214, %c1_215, %c0_216] : memref<4x20x16xf32, #tpu.memory_space<vmem>>, vector<1x16x16xf32>
    %311 = vector.shape_cast %310 : vector<1x16x16xf32> to vector<16x16xf32>
    %312 = arith.maximumf %309, %311 : vector<16x16xf32>
    %c0_217 = arith.constant 0 : index
    %c2_218 = arith.constant 2 : index
    %c0_219 = arith.constant 0 : index
    %313 = vector.load %arg8[%c0_217, %c2_218, %c0_219] : memref<4x20x16xf32, #tpu.memory_space<vmem>>, vector<1x16x16xf32>
    %314 = vector.shape_cast %313 : vector<1x16x16xf32> to vector<16x16xf32>
    %315 = arith.maximumf %312, %314 : vector<16x16xf32>
    %c0_220 = arith.constant 0 : index
    %c3_221 = arith.constant 3 : index
    %c0_222 = arith.constant 0 : index
    %316 = vector.load %arg8[%c0_220, %c3_221, %c0_222] : memref<4x20x16xf32, #tpu.memory_space<vmem>>, vector<1x16x16xf32>
    %317 = vector.shape_cast %316 : vector<1x16x16xf32> to vector<16x16xf32>
    %318 = arith.maximumf %315, %317 : vector<16x16xf32>
    %c0_223 = arith.constant 0 : index
    %c4_224 = arith.constant 4 : index
    %c0_225 = arith.constant 0 : index
    %319 = vector.load %arg8[%c0_223, %c4_224, %c0_225] : memref<4x20x16xf32, #tpu.memory_space<vmem>>, vector<1x16x16xf32>
    %320 = vector.shape_cast %319 : vector<1x16x16xf32> to vector<16x16xf32>
    %321 = arith.maximumf %318, %320 : vector<16x16xf32>
    %c1_226 = arith.constant 1 : index
    %c0_227 = arith.constant 0 : index
    %c0_228 = arith.constant 0 : index
    %322 = vector.load %arg8[%c1_226, %c0_227, %c0_228] : memref<4x20x16xf32, #tpu.memory_space<vmem>>, vector<1x16x16xf32>
    %323 = vector.shape_cast %322 : vector<1x16x16xf32> to vector<16x16xf32>
    %c1_229 = arith.constant 1 : index
    %c1_230 = arith.constant 1 : index
    %c0_231 = arith.constant 0 : index
    %324 = vector.load %arg8[%c1_229, %c1_230, %c0_231] : memref<4x20x16xf32, #tpu.memory_space<vmem>>, vector<1x16x16xf32>
    %325 = vector.shape_cast %324 : vector<1x16x16xf32> to vector<16x16xf32>
    %326 = arith.maximumf %323, %325 : vector<16x16xf32>
    %c1_232 = arith.constant 1 : index
    %c2_233 = arith.constant 2 : index
    %c0_234 = arith.constant 0 : index
    %327 = vector.load %arg8[%c1_232, %c2_233, %c0_234] : memref<4x20x16xf32, #tpu.memory_space<vmem>>, vector<1x16x16xf32>
    %328 = vector.shape_cast %327 : vector<1x16x16xf32> to vector<16x16xf32>
    %329 = arith.maximumf %326, %328 : vector<16x16xf32>
    %c1_235 = arith.constant 1 : index
    %c3_236 = arith.constant 3 : index
    %c0_237 = arith.constant 0 : index
    %330 = vector.load %arg8[%c1_235, %c3_236, %c0_237] : memref<4x20x16xf32, #tpu.memory_space<vmem>>, vector<1x16x16xf32>
    %331 = vector.shape_cast %330 : vector<1x16x16xf32> to vector<16x16xf32>
    %332 = arith.maximumf %329, %331 : vector<16x16xf32>
    %c1_238 = arith.constant 1 : index
    %c4_239 = arith.constant 4 : index
    %c0_240 = arith.constant 0 : index
    %333 = vector.load %arg8[%c1_238, %c4_239, %c0_240] : memref<4x20x16xf32, #tpu.memory_space<vmem>>, vector<1x16x16xf32>
    %334 = vector.shape_cast %333 : vector<1x16x16xf32> to vector<16x16xf32>
    %335 = arith.maximumf %332, %334 : vector<16x16xf32>
    %c2_241 = arith.constant 2 : index
    %c0_242 = arith.constant 0 : index
    %c0_243 = arith.constant 0 : index
    %336 = vector.load %arg8[%c2_241, %c0_242, %c0_243] : memref<4x20x16xf32, #tpu.memory_space<vmem>>, vector<1x16x16xf32>
    %337 = vector.shape_cast %336 : vector<1x16x16xf32> to vector<16x16xf32>
    %c2_244 = arith.constant 2 : index
    %c1_245 = arith.constant 1 : index
    %c0_246 = arith.constant 0 : index
    %338 = vector.load %arg8[%c2_244, %c1_245, %c0_246] : memref<4x20x16xf32, #tpu.memory_space<vmem>>, vector<1x16x16xf32>
    %339 = vector.shape_cast %338 : vector<1x16x16xf32> to vector<16x16xf32>
    %340 = arith.maximumf %337, %339 : vector<16x16xf32>
    %c2_247 = arith.constant 2 : index
    %c2_248 = arith.constant 2 : index
    %c0_249 = arith.constant 0 : index
    %341 = vector.load %arg8[%c2_247, %c2_248, %c0_249] : memref<4x20x16xf32, #tpu.memory_space<vmem>>, vector<1x16x16xf32>
    %342 = vector.shape_cast %341 : vector<1x16x16xf32> to vector<16x16xf32>
    %343 = arith.maximumf %340, %342 : vector<16x16xf32>
    %c2_250 = arith.constant 2 : index
    %c3_251 = arith.constant 3 : index
    %c0_252 = arith.constant 0 : index
    %344 = vector.load %arg8[%c2_250, %c3_251, %c0_252] : memref<4x20x16xf32, #tpu.memory_space<vmem>>, vector<1x16x16xf32>
    %345 = vector.shape_cast %344 : vector<1x16x16xf32> to vector<16x16xf32>
    %346 = arith.maximumf %343, %345 : vector<16x16xf32>
    %c2_253 = arith.constant 2 : index
    %c4_254 = arith.constant 4 : index
    %c0_255 = arith.constant 0 : index
    %347 = vector.load %arg8[%c2_253, %c4_254, %c0_255] : memref<4x20x16xf32, #tpu.memory_space<vmem>>, vector<1x16x16xf32>
    %348 = vector.shape_cast %347 : vector<1x16x16xf32> to vector<16x16xf32>
    %349 = arith.maximumf %346, %348 : vector<16x16xf32>
    %c3_256 = arith.constant 3 : index
    %c0_257 = arith.constant 0 : index
    %c0_258 = arith.constant 0 : index
    %350 = vector.load %arg8[%c3_256, %c0_257, %c0_258] : memref<4x20x16xf32, #tpu.memory_space<vmem>>, vector<1x16x16xf32>
    %351 = vector.shape_cast %350 : vector<1x16x16xf32> to vector<16x16xf32>
    %c3_259 = arith.constant 3 : index
    %c1_260 = arith.constant 1 : index
    %c0_261 = arith.constant 0 : index
    %352 = vector.load %arg8[%c3_259, %c1_260, %c0_261] : memref<4x20x16xf32, #tpu.memory_space<vmem>>, vector<1x16x16xf32>
    %353 = vector.shape_cast %352 : vector<1x16x16xf32> to vector<16x16xf32>
    %354 = arith.maximumf %351, %353 : vector<16x16xf32>
    %c3_262 = arith.constant 3 : index
    %c2_263 = arith.constant 2 : index
    %c0_264 = arith.constant 0 : index
    %355 = vector.load %arg8[%c3_262, %c2_263, %c0_264] : memref<4x20x16xf32, #tpu.memory_space<vmem>>, vector<1x16x16xf32>
    %356 = vector.shape_cast %355 : vector<1x16x16xf32> to vector<16x16xf32>
    %357 = arith.maximumf %354, %356 : vector<16x16xf32>
    %c3_265 = arith.constant 3 : index
    %c3_266 = arith.constant 3 : index
    %c0_267 = arith.constant 0 : index
    %358 = vector.load %arg8[%c3_265, %c3_266, %c0_267] : memref<4x20x16xf32, #tpu.memory_space<vmem>>, vector<1x16x16xf32>
    %359 = vector.shape_cast %358 : vector<1x16x16xf32> to vector<16x16xf32>
    %360 = arith.maximumf %357, %359 : vector<16x16xf32>
    %c3_268 = arith.constant 3 : index
    %c4_269 = arith.constant 4 : index
    %c0_270 = arith.constant 0 : index
    %361 = vector.load %arg8[%c3_268, %c4_269, %c0_270] : memref<4x20x16xf32, #tpu.memory_space<vmem>>, vector<1x16x16xf32>
    %362 = vector.shape_cast %361 : vector<1x16x16xf32> to vector<16x16xf32>
    %363 = arith.maximumf %360, %362 : vector<16x16xf32>
    %c0_271 = arith.constant 0 : index
    %c4_272 = arith.constant 4 : index
    %364 = memref.load %arg4[%c0_271, %c4_272] : memref<8x16xf32, #tpu.memory_space<smem>>
    %365 = vector.broadcast %364 : f32 to vector<16x16xf32>
    %366 = arith.mulf %321, %365 : vector<16x16xf32>
    %367 = arith.addf %115, %366 : vector<16x16xf32>
    %c0_273 = arith.constant 0 : index
    %c5_274 = arith.constant 5 : index
    %368 = memref.load %arg4[%c0_273, %c5_274] : memref<8x16xf32, #tpu.memory_space<smem>>
    %369 = vector.broadcast %368 : f32 to vector<16x16xf32>
    %370 = arith.mulf %335, %369 : vector<16x16xf32>
    %371 = arith.addf %367, %370 : vector<16x16xf32>
    %c0_275 = arith.constant 0 : index
    %c6_276 = arith.constant 6 : index
    %372 = memref.load %arg4[%c0_275, %c6_276] : memref<8x16xf32, #tpu.memory_space<smem>>
    %373 = vector.broadcast %372 : f32 to vector<16x16xf32>
    %374 = arith.mulf %349, %373 : vector<16x16xf32>
    %375 = arith.addf %371, %374 : vector<16x16xf32>
    %c0_277 = arith.constant 0 : index
    %c7_278 = arith.constant 7 : index
    %376 = memref.load %arg4[%c0_277, %c7_278] : memref<8x16xf32, #tpu.memory_space<smem>>
    %377 = vector.broadcast %376 : f32 to vector<16x16xf32>
    %378 = arith.mulf %363, %377 : vector<16x16xf32>
    %379 = arith.addf %375, %378 : vector<16x16xf32>
    %c1_279 = arith.constant 1 : index
    %c4_280 = arith.constant 4 : index
    %380 = memref.load %arg4[%c1_279, %c4_280] : memref<8x16xf32, #tpu.memory_space<smem>>
    %381 = vector.broadcast %380 : f32 to vector<16x16xf32>
    %382 = arith.mulf %321, %381 : vector<16x16xf32>
    %383 = arith.addf %131, %382 : vector<16x16xf32>
    %c1_281 = arith.constant 1 : index
    %c5_282 = arith.constant 5 : index
    %384 = memref.load %arg4[%c1_281, %c5_282] : memref<8x16xf32, #tpu.memory_space<smem>>
    %385 = vector.broadcast %384 : f32 to vector<16x16xf32>
    %386 = arith.mulf %335, %385 : vector<16x16xf32>
    %387 = arith.addf %383, %386 : vector<16x16xf32>
    %c1_283 = arith.constant 1 : index
    %c6_284 = arith.constant 6 : index
    %388 = memref.load %arg4[%c1_283, %c6_284] : memref<8x16xf32, #tpu.memory_space<smem>>
    %389 = vector.broadcast %388 : f32 to vector<16x16xf32>
    %390 = arith.mulf %349, %389 : vector<16x16xf32>
    %391 = arith.addf %387, %390 : vector<16x16xf32>
    %c1_285 = arith.constant 1 : index
    %c7_286 = arith.constant 7 : index
    %392 = memref.load %arg4[%c1_285, %c7_286] : memref<8x16xf32, #tpu.memory_space<smem>>
    %393 = vector.broadcast %392 : f32 to vector<16x16xf32>
    %394 = arith.mulf %363, %393 : vector<16x16xf32>
    %395 = arith.addf %391, %394 : vector<16x16xf32>
    %c2_287 = arith.constant 2 : index
    %c4_288 = arith.constant 4 : index
    %396 = memref.load %arg4[%c2_287, %c4_288] : memref<8x16xf32, #tpu.memory_space<smem>>
    %397 = vector.broadcast %396 : f32 to vector<16x16xf32>
    %398 = arith.mulf %321, %397 : vector<16x16xf32>
    %399 = arith.addf %147, %398 : vector<16x16xf32>
    %c2_289 = arith.constant 2 : index
    %c5_290 = arith.constant 5 : index
    %400 = memref.load %arg4[%c2_289, %c5_290] : memref<8x16xf32, #tpu.memory_space<smem>>
    %401 = vector.broadcast %400 : f32 to vector<16x16xf32>
    %402 = arith.mulf %335, %401 : vector<16x16xf32>
    %403 = arith.addf %399, %402 : vector<16x16xf32>
    %c2_291 = arith.constant 2 : index
    %c6_292 = arith.constant 6 : index
    %404 = memref.load %arg4[%c2_291, %c6_292] : memref<8x16xf32, #tpu.memory_space<smem>>
    %405 = vector.broadcast %404 : f32 to vector<16x16xf32>
    %406 = arith.mulf %349, %405 : vector<16x16xf32>
    %407 = arith.addf %403, %406 : vector<16x16xf32>
    %c2_293 = arith.constant 2 : index
    %c7_294 = arith.constant 7 : index
    %408 = memref.load %arg4[%c2_293, %c7_294] : memref<8x16xf32, #tpu.memory_space<smem>>
    %409 = vector.broadcast %408 : f32 to vector<16x16xf32>
    %410 = arith.mulf %363, %409 : vector<16x16xf32>
    %411 = arith.addf %407, %410 : vector<16x16xf32>
    %c3_295 = arith.constant 3 : index
    %c4_296 = arith.constant 4 : index
    %412 = memref.load %arg4[%c3_295, %c4_296] : memref<8x16xf32, #tpu.memory_space<smem>>
    %413 = vector.broadcast %412 : f32 to vector<16x16xf32>
    %414 = arith.mulf %321, %413 : vector<16x16xf32>
    %415 = arith.addf %163, %414 : vector<16x16xf32>
    %c3_297 = arith.constant 3 : index
    %c5_298 = arith.constant 5 : index
    %416 = memref.load %arg4[%c3_297, %c5_298] : memref<8x16xf32, #tpu.memory_space<smem>>
    %417 = vector.broadcast %416 : f32 to vector<16x16xf32>
    %418 = arith.mulf %335, %417 : vector<16x16xf32>
    %419 = arith.addf %415, %418 : vector<16x16xf32>
    %c3_299 = arith.constant 3 : index
    %c6_300 = arith.constant 6 : index
    %420 = memref.load %arg4[%c3_299, %c6_300] : memref<8x16xf32, #tpu.memory_space<smem>>
    %421 = vector.broadcast %420 : f32 to vector<16x16xf32>
    %422 = arith.mulf %349, %421 : vector<16x16xf32>
    %423 = arith.addf %419, %422 : vector<16x16xf32>
    %c3_301 = arith.constant 3 : index
    %c7_302 = arith.constant 7 : index
    %424 = memref.load %arg4[%c3_301, %c7_302] : memref<8x16xf32, #tpu.memory_space<smem>>
    %425 = vector.broadcast %424 : f32 to vector<16x16xf32>
    %426 = arith.mulf %363, %425 : vector<16x16xf32>
    %427 = arith.addf %423, %426 : vector<16x16xf32>
    %c4_303 = arith.constant 4 : index
    %c4_304 = arith.constant 4 : index
    %428 = memref.load %arg4[%c4_303, %c4_304] : memref<8x16xf32, #tpu.memory_space<smem>>
    %429 = vector.broadcast %428 : f32 to vector<16x16xf32>
    %430 = arith.mulf %321, %429 : vector<16x16xf32>
    %431 = arith.addf %179, %430 : vector<16x16xf32>
    %c4_305 = arith.constant 4 : index
    %c5_306 = arith.constant 5 : index
    %432 = memref.load %arg4[%c4_305, %c5_306] : memref<8x16xf32, #tpu.memory_space<smem>>
    %433 = vector.broadcast %432 : f32 to vector<16x16xf32>
    %434 = arith.mulf %335, %433 : vector<16x16xf32>
    %435 = arith.addf %431, %434 : vector<16x16xf32>
    %c4_307 = arith.constant 4 : index
    %c6_308 = arith.constant 6 : index
    %436 = memref.load %arg4[%c4_307, %c6_308] : memref<8x16xf32, #tpu.memory_space<smem>>
    %437 = vector.broadcast %436 : f32 to vector<16x16xf32>
    %438 = arith.mulf %349, %437 : vector<16x16xf32>
    %439 = arith.addf %435, %438 : vector<16x16xf32>
    %c4_309 = arith.constant 4 : index
    %c7_310 = arith.constant 7 : index
    %440 = memref.load %arg4[%c4_309, %c7_310] : memref<8x16xf32, #tpu.memory_space<smem>>
    %441 = vector.broadcast %440 : f32 to vector<16x16xf32>
    %442 = arith.mulf %363, %441 : vector<16x16xf32>
    %443 = arith.addf %439, %442 : vector<16x16xf32>
    %c5_311 = arith.constant 5 : index
    %c4_312 = arith.constant 4 : index
    %444 = memref.load %arg4[%c5_311, %c4_312] : memref<8x16xf32, #tpu.memory_space<smem>>
    %445 = vector.broadcast %444 : f32 to vector<16x16xf32>
    %446 = arith.mulf %321, %445 : vector<16x16xf32>
    %447 = arith.addf %195, %446 : vector<16x16xf32>
    %c5_313 = arith.constant 5 : index
    %c5_314 = arith.constant 5 : index
    %448 = memref.load %arg4[%c5_313, %c5_314] : memref<8x16xf32, #tpu.memory_space<smem>>
    %449 = vector.broadcast %448 : f32 to vector<16x16xf32>
    %450 = arith.mulf %335, %449 : vector<16x16xf32>
    %451 = arith.addf %447, %450 : vector<16x16xf32>
    %c5_315 = arith.constant 5 : index
    %c6_316 = arith.constant 6 : index
    %452 = memref.load %arg4[%c5_315, %c6_316] : memref<8x16xf32, #tpu.memory_space<smem>>
    %453 = vector.broadcast %452 : f32 to vector<16x16xf32>
    %454 = arith.mulf %349, %453 : vector<16x16xf32>
    %455 = arith.addf %451, %454 : vector<16x16xf32>
    %c5_317 = arith.constant 5 : index
    %c7_318 = arith.constant 7 : index
    %456 = memref.load %arg4[%c5_317, %c7_318] : memref<8x16xf32, #tpu.memory_space<smem>>
    %457 = vector.broadcast %456 : f32 to vector<16x16xf32>
    %458 = arith.mulf %363, %457 : vector<16x16xf32>
    %459 = arith.addf %455, %458 : vector<16x16xf32>
    %c6_319 = arith.constant 6 : index
    %c4_320 = arith.constant 4 : index
    %460 = memref.load %arg4[%c6_319, %c4_320] : memref<8x16xf32, #tpu.memory_space<smem>>
    %461 = vector.broadcast %460 : f32 to vector<16x16xf32>
    %462 = arith.mulf %321, %461 : vector<16x16xf32>
    %463 = arith.addf %211, %462 : vector<16x16xf32>
    %c6_321 = arith.constant 6 : index
    %c5_322 = arith.constant 5 : index
    %464 = memref.load %arg4[%c6_321, %c5_322] : memref<8x16xf32, #tpu.memory_space<smem>>
    %465 = vector.broadcast %464 : f32 to vector<16x16xf32>
    %466 = arith.mulf %335, %465 : vector<16x16xf32>
    %467 = arith.addf %463, %466 : vector<16x16xf32>
    %c6_323 = arith.constant 6 : index
    %c6_324 = arith.constant 6 : index
    %468 = memref.load %arg4[%c6_323, %c6_324] : memref<8x16xf32, #tpu.memory_space<smem>>
    %469 = vector.broadcast %468 : f32 to vector<16x16xf32>
    %470 = arith.mulf %349, %469 : vector<16x16xf32>
    %471 = arith.addf %467, %470 : vector<16x16xf32>
    %c6_325 = arith.constant 6 : index
    %c7_326 = arith.constant 7 : index
    %472 = memref.load %arg4[%c6_325, %c7_326] : memref<8x16xf32, #tpu.memory_space<smem>>
    %473 = vector.broadcast %472 : f32 to vector<16x16xf32>
    %474 = arith.mulf %363, %473 : vector<16x16xf32>
    %475 = arith.addf %471, %474 : vector<16x16xf32>
    %c7_327 = arith.constant 7 : index
    %c4_328 = arith.constant 4 : index
    %476 = memref.load %arg4[%c7_327, %c4_328] : memref<8x16xf32, #tpu.memory_space<smem>>
    %477 = vector.broadcast %476 : f32 to vector<16x16xf32>
    %478 = arith.mulf %321, %477 : vector<16x16xf32>
    %479 = arith.addf %227, %478 : vector<16x16xf32>
    %c7_329 = arith.constant 7 : index
    %c5_330 = arith.constant 5 : index
    %480 = memref.load %arg4[%c7_329, %c5_330] : memref<8x16xf32, #tpu.memory_space<smem>>
    %481 = vector.broadcast %480 : f32 to vector<16x16xf32>
    %482 = arith.mulf %335, %481 : vector<16x16xf32>
    %483 = arith.addf %479, %482 : vector<16x16xf32>
    %c7_331 = arith.constant 7 : index
    %c6_332 = arith.constant 6 : index
    %484 = memref.load %arg4[%c7_331, %c6_332] : memref<8x16xf32, #tpu.memory_space<smem>>
    %485 = vector.broadcast %484 : f32 to vector<16x16xf32>
    %486 = arith.mulf %349, %485 : vector<16x16xf32>
    %487 = arith.addf %483, %486 : vector<16x16xf32>
    %c7_333 = arith.constant 7 : index
    %c7_334 = arith.constant 7 : index
    %488 = memref.load %arg4[%c7_333, %c7_334] : memref<8x16xf32, #tpu.memory_space<smem>>
    %489 = vector.broadcast %488 : f32 to vector<16x16xf32>
    %490 = arith.mulf %363, %489 : vector<16x16xf32>
    %491 = arith.addf %487, %490 : vector<16x16xf32>
    %c0_335 = arith.constant 0 : index
    %c0_336 = arith.constant 0 : index
    %c2_337 = arith.constant 2 : index
    %492 = vector.load %arg7[%c0_335, %c0_336, %c2_337] : memref<4x16x20xf32, #tpu.memory_space<vmem>>, vector<1x16x16xf32>
    %493 = vector.shape_cast %492 : vector<1x16x16xf32> to vector<16x16xf32>
    %494 = vector.shape_cast %321 : vector<16x16xf32> to vector<1x16x16xf32>
    tpu.vector_store %arg7[%c0_335, %c0_336, %c2_337], %494 {strides = array<i32>} : memref<4x16x20xf32, #tpu.memory_space<vmem>>, vector<1x16x16xf32>,
    %c1_338 = arith.constant 1 : index
    %c0_339 = arith.constant 0 : index
    %c2_340 = arith.constant 2 : index
    %495 = vector.load %arg7[%c1_338, %c0_339, %c2_340] : memref<4x16x20xf32, #tpu.memory_space<vmem>>, vector<1x16x16xf32>
    %496 = vector.shape_cast %495 : vector<1x16x16xf32> to vector<16x16xf32>
    %497 = vector.shape_cast %335 : vector<16x16xf32> to vector<1x16x16xf32>
    tpu.vector_store %arg7[%c1_338, %c0_339, %c2_340], %497 {strides = array<i32>} : memref<4x16x20xf32, #tpu.memory_space<vmem>>, vector<1x16x16xf32>,
    %c2_341 = arith.constant 2 : index
    %c0_342 = arith.constant 0 : index
    %c2_343 = arith.constant 2 : index
    %498 = vector.load %arg7[%c2_341, %c0_342, %c2_343] : memref<4x16x20xf32, #tpu.memory_space<vmem>>, vector<1x16x16xf32>
    %499 = vector.shape_cast %498 : vector<1x16x16xf32> to vector<16x16xf32>
    %500 = vector.shape_cast %349 : vector<16x16xf32> to vector<1x16x16xf32>
    tpu.vector_store %arg7[%c2_341, %c0_342, %c2_343], %500 {strides = array<i32>} : memref<4x16x20xf32, #tpu.memory_space<vmem>>, vector<1x16x16xf32>,
    %c3_344 = arith.constant 3 : index
    %c0_345 = arith.constant 0 : index
    %c2_346 = arith.constant 2 : index
    %501 = vector.load %arg7[%c3_344, %c0_345, %c2_346] : memref<4x16x20xf32, #tpu.memory_space<vmem>>, vector<1x16x16xf32>
    %502 = vector.shape_cast %501 : vector<1x16x16xf32> to vector<16x16xf32>
    %503 = vector.shape_cast %363 : vector<16x16xf32> to vector<1x16x16xf32>
    tpu.vector_store %arg7[%c3_344, %c0_345, %c2_346], %503 {strides = array<i32>} : memref<4x16x20xf32, #tpu.memory_space<vmem>>, vector<1x16x16xf32>,
    %c0_347 = arith.constant 0 : index
    %c0_348 = arith.constant 0 : index
    %c0_349 = arith.constant 0 : index
    %504 = vector.load %arg7[%c0_347, %c0_348, %c0_349] : memref<4x16x20xf32, #tpu.memory_space<vmem>>, vector<1x16x16xf32>
    %505 = vector.shape_cast %504 : vector<1x16x16xf32> to vector<16x16xf32>
    %c0_350 = arith.constant 0 : index
    %c0_351 = arith.constant 0 : index
    %c1_352 = arith.constant 1 : index
    %506 = vector.load %arg7[%c0_350, %c0_351, %c1_352] : memref<4x16x20xf32, #tpu.memory_space<vmem>>, vector<1x16x16xf32>
    %507 = vector.shape_cast %506 : vector<1x16x16xf32> to vector<16x16xf32>
    %508 = arith.maximumf %505, %507 : vector<16x16xf32>
    %c0_353 = arith.constant 0 : index
    %c0_354 = arith.constant 0 : index
    %c2_355 = arith.constant 2 : index
    %509 = vector.load %arg7[%c0_353, %c0_354, %c2_355] : memref<4x16x20xf32, #tpu.memory_space<vmem>>, vector<1x16x16xf32>
    %510 = vector.shape_cast %509 : vector<1x16x16xf32> to vector<16x16xf32>
    %511 = arith.maximumf %508, %510 : vector<16x16xf32>
    %c0_356 = arith.constant 0 : index
    %c0_357 = arith.constant 0 : index
    %c3_358 = arith.constant 3 : index
    %512 = vector.load %arg7[%c0_356, %c0_357, %c3_358] : memref<4x16x20xf32, #tpu.memory_space<vmem>>, vector<1x16x16xf32>
    %513 = vector.shape_cast %512 : vector<1x16x16xf32> to vector<16x16xf32>
    %514 = arith.maximumf %511, %513 : vector<16x16xf32>
    %c0_359 = arith.constant 0 : index
    %c0_360 = arith.constant 0 : index
    %c4_361 = arith.constant 4 : index
    %515 = vector.load %arg7[%c0_359, %c0_360, %c4_361] : memref<4x16x20xf32, #tpu.memory_space<vmem>>, vector<1x16x16xf32>
    %516 = vector.shape_cast %515 : vector<1x16x16xf32> to vector<16x16xf32>
    %517 = arith.maximumf %514, %516 : vector<16x16xf32>
    %c0_362 = arith.constant 0 : index
    %c2_363 = arith.constant 2 : index
    %c0_364 = arith.constant 0 : index
    %518 = vector.load %arg8[%c0_362, %c2_363, %c0_364] : memref<4x20x16xf32, #tpu.memory_space<vmem>>, vector<1x16x16xf32>
    %519 = vector.shape_cast %518 : vector<1x16x16xf32> to vector<16x16xf32>
    %520 = vector.shape_cast %517 : vector<16x16xf32> to vector<1x16x16xf32>
    tpu.vector_store %arg8[%c0_362, %c2_363, %c0_364], %520 {strides = array<i32>} : memref<4x20x16xf32, #tpu.memory_space<vmem>>, vector<1x16x16xf32>,
    %c1_365 = arith.constant 1 : index
    %c0_366 = arith.constant 0 : index
    %c0_367 = arith.constant 0 : index
    %521 = vector.load %arg7[%c1_365, %c0_366, %c0_367] : memref<4x16x20xf32, #tpu.memory_space<vmem>>, vector<1x16x16xf32>
    %522 = vector.shape_cast %521 : vector<1x16x16xf32> to vector<16x16xf32>
    %c1_368 = arith.constant 1 : index
    %c0_369 = arith.constant 0 : index
    %c1_370 = arith.constant 1 : index
    %523 = vector.load %arg7[%c1_368, %c0_369, %c1_370] : memref<4x16x20xf32, #tpu.memory_space<vmem>>, vector<1x16x16xf32>
    %524 = vector.shape_cast %523 : vector<1x16x16xf32> to vector<16x16xf32>
    %525 = arith.maximumf %522, %524 : vector<16x16xf32>
    %c1_371 = arith.constant 1 : index
    %c0_372 = arith.constant 0 : index
    %c2_373 = arith.constant 2 : index
    %526 = vector.load %arg7[%c1_371, %c0_372, %c2_373] : memref<4x16x20xf32, #tpu.memory_space<vmem>>, vector<1x16x16xf32>
    %527 = vector.shape_cast %526 : vector<1x16x16xf32> to vector<16x16xf32>
    %528 = arith.maximumf %525, %527 : vector<16x16xf32>
    %c1_374 = arith.constant 1 : index
    %c0_375 = arith.constant 0 : index
    %c3_376 = arith.constant 3 : index
    %529 = vector.load %arg7[%c1_374, %c0_375, %c3_376] : memref<4x16x20xf32, #tpu.memory_space<vmem>>, vector<1x16x16xf32>
    %530 = vector.shape_cast %529 : vector<1x16x16xf32> to vector<16x16xf32>
    %531 = arith.maximumf %528, %530 : vector<16x16xf32>
    %c1_377 = arith.constant 1 : index
    %c0_378 = arith.constant 0 : index
    %c4_379 = arith.constant 4 : index
    %532 = vector.load %arg7[%c1_377, %c0_378, %c4_379] : memref<4x16x20xf32, #tpu.memory_space<vmem>>, vector<1x16x16xf32>
    %533 = vector.shape_cast %532 : vector<1x16x16xf32> to vector<16x16xf32>
    %534 = arith.maximumf %531, %533 : vector<16x16xf32>
    %c1_380 = arith.constant 1 : index
    %c2_381 = arith.constant 2 : index
    %c0_382 = arith.constant 0 : index
    %535 = vector.load %arg8[%c1_380, %c2_381, %c0_382] : memref<4x20x16xf32, #tpu.memory_space<vmem>>, vector<1x16x16xf32>
    %536 = vector.shape_cast %535 : vector<1x16x16xf32> to vector<16x16xf32>
    %537 = vector.shape_cast %534 : vector<16x16xf32> to vector<1x16x16xf32>
    tpu.vector_store %arg8[%c1_380, %c2_381, %c0_382], %537 {strides = array<i32>} : memref<4x20x16xf32, #tpu.memory_space<vmem>>, vector<1x16x16xf32>,
    %c2_383 = arith.constant 2 : index
    %c0_384 = arith.constant 0 : index
    %c0_385 = arith.constant 0 : index
    %538 = vector.load %arg7[%c2_383, %c0_384, %c0_385] : memref<4x16x20xf32, #tpu.memory_space<vmem>>, vector<1x16x16xf32>
    %539 = vector.shape_cast %538 : vector<1x16x16xf32> to vector<16x16xf32>
    %c2_386 = arith.constant 2 : index
    %c0_387 = arith.constant 0 : index
    %c1_388 = arith.constant 1 : index
    %540 = vector.load %arg7[%c2_386, %c0_387, %c1_388] : memref<4x16x20xf32, #tpu.memory_space<vmem>>, vector<1x16x16xf32>
    %541 = vector.shape_cast %540 : vector<1x16x16xf32> to vector<16x16xf32>
    %542 = arith.maximumf %539, %541 : vector<16x16xf32>
    %c2_389 = arith.constant 2 : index
    %c0_390 = arith.constant 0 : index
    %c2_391 = arith.constant 2 : index
    %543 = vector.load %arg7[%c2_389, %c0_390, %c2_391] : memref<4x16x20xf32, #tpu.memory_space<vmem>>, vector<1x16x16xf32>
    %544 = vector.shape_cast %543 : vector<1x16x16xf32> to vector<16x16xf32>
    %545 = arith.maximumf %542, %544 : vector<16x16xf32>
    %c2_392 = arith.constant 2 : index
    %c0_393 = arith.constant 0 : index
    %c3_394 = arith.constant 3 : index
    %546 = vector.load %arg7[%c2_392, %c0_393, %c3_394] : memref<4x16x20xf32, #tpu.memory_space<vmem>>, vector<1x16x16xf32>
    %547 = vector.shape_cast %546 : vector<1x16x16xf32> to vector<16x16xf32>
    %548 = arith.maximumf %545, %547 : vector<16x16xf32>
    %c2_395 = arith.constant 2 : index
    %c0_396 = arith.constant 0 : index
    %c4_397 = arith.constant 4 : index
    %549 = vector.load %arg7[%c2_395, %c0_396, %c4_397] : memref<4x16x20xf32, #tpu.memory_space<vmem>>, vector<1x16x16xf32>
    %550 = vector.shape_cast %549 : vector<1x16x16xf32> to vector<16x16xf32>
    %551 = arith.maximumf %548, %550 : vector<16x16xf32>
    %c2_398 = arith.constant 2 : index
    %c2_399 = arith.constant 2 : index
    %c0_400 = arith.constant 0 : index
    %552 = vector.load %arg8[%c2_398, %c2_399, %c0_400] : memref<4x20x16xf32, #tpu.memory_space<vmem>>, vector<1x16x16xf32>
    %553 = vector.shape_cast %552 : vector<1x16x16xf32> to vector<16x16xf32>
    %554 = vector.shape_cast %551 : vector<16x16xf32> to vector<1x16x16xf32>
    tpu.vector_store %arg8[%c2_398, %c2_399, %c0_400], %554 {strides = array<i32>} : memref<4x20x16xf32, #tpu.memory_space<vmem>>, vector<1x16x16xf32>,
    %c3_401 = arith.constant 3 : index
    %c0_402 = arith.constant 0 : index
    %c0_403 = arith.constant 0 : index
    %555 = vector.load %arg7[%c3_401, %c0_402, %c0_403] : memref<4x16x20xf32, #tpu.memory_space<vmem>>, vector<1x16x16xf32>
    %556 = vector.shape_cast %555 : vector<1x16x16xf32> to vector<16x16xf32>
    %c3_404 = arith.constant 3 : index
    %c0_405 = arith.constant 0 : index
    %c1_406 = arith.constant 1 : index
    %557 = vector.load %arg7[%c3_404, %c0_405, %c1_406] : memref<4x16x20xf32, #tpu.memory_space<vmem>>, vector<1x16x16xf32>
    %558 = vector.shape_cast %557 : vector<1x16x16xf32> to vector<16x16xf32>
    %559 = arith.maximumf %556, %558 : vector<16x16xf32>
    %c3_407 = arith.constant 3 : index
    %c0_408 = arith.constant 0 : index
    %c2_409 = arith.constant 2 : index
    %560 = vector.load %arg7[%c3_407, %c0_408, %c2_409] : memref<4x16x20xf32, #tpu.memory_space<vmem>>, vector<1x16x16xf32>
    %561 = vector.shape_cast %560 : vector<1x16x16xf32> to vector<16x16xf32>
    %562 = arith.maximumf %559, %561 : vector<16x16xf32>
    %c3_410 = arith.constant 3 : index
    %c0_411 = arith.constant 0 : index
    %c3_412 = arith.constant 3 : index
    %563 = vector.load %arg7[%c3_410, %c0_411, %c3_412] : memref<4x16x20xf32, #tpu.memory_space<vmem>>, vector<1x16x16xf32>
    %564 = vector.shape_cast %563 : vector<1x16x16xf32> to vector<16x16xf32>
    %565 = arith.maximumf %562, %564 : vector<16x16xf32>
    %c3_413 = arith.constant 3 : index
    %c0_414 = arith.constant 0 : index
    %c4_415 = arith.constant 4 : index
    %566 = vector.load %arg7[%c3_413, %c0_414, %c4_415] : memref<4x16x20xf32, #tpu.memory_space<vmem>>, vector<1x16x16xf32>
    %567 = vector.shape_cast %566 : vector<1x16x16xf32> to vector<16x16xf32>
    %568 = arith.maximumf %565, %567 : vector<16x16xf32>
    %c3_416 = arith.constant 3 : index
    %c2_417 = arith.constant 2 : index
    %c0_418 = arith.constant 0 : index
    %569 = vector.load %arg8[%c3_416, %c2_417, %c0_418] : memref<4x20x16xf32, #tpu.memory_space<vmem>>, vector<1x16x16xf32>
    %570 = vector.shape_cast %569 : vector<1x16x16xf32> to vector<16x16xf32>
    %571 = vector.shape_cast %568 : vector<16x16xf32> to vector<1x16x16xf32>
    tpu.vector_store %arg8[%c3_416, %c2_417, %c0_418], %571 {strides = array<i32>} : memref<4x20x16xf32, #tpu.memory_space<vmem>>, vector<1x16x16xf32>,
    %c0_419 = arith.constant 0 : index
    %c0_420 = arith.constant 0 : index
    %c0_421 = arith.constant 0 : index
    %572 = vector.load %arg8[%c0_419, %c0_420, %c0_421] : memref<4x20x16xf32, #tpu.memory_space<vmem>>, vector<1x16x16xf32>
    %573 = vector.shape_cast %572 : vector<1x16x16xf32> to vector<16x16xf32>
    %c0_422 = arith.constant 0 : index
    %c1_423 = arith.constant 1 : index
    %c0_424 = arith.constant 0 : index
    %574 = vector.load %arg8[%c0_422, %c1_423, %c0_424] : memref<4x20x16xf32, #tpu.memory_space<vmem>>, vector<1x16x16xf32>
    %575 = vector.shape_cast %574 : vector<1x16x16xf32> to vector<16x16xf32>
    %576 = arith.maximumf %573, %575 : vector<16x16xf32>
    %c0_425 = arith.constant 0 : index
    %c2_426 = arith.constant 2 : index
    %c0_427 = arith.constant 0 : index
    %577 = vector.load %arg8[%c0_425, %c2_426, %c0_427] : memref<4x20x16xf32, #tpu.memory_space<vmem>>, vector<1x16x16xf32>
    %578 = vector.shape_cast %577 : vector<1x16x16xf32> to vector<16x16xf32>
    %579 = arith.maximumf %576, %578 : vector<16x16xf32>
    %c0_428 = arith.constant 0 : index
    %c3_429 = arith.constant 3 : index
    %c0_430 = arith.constant 0 : index
    %580 = vector.load %arg8[%c0_428, %c3_429, %c0_430] : memref<4x20x16xf32, #tpu.memory_space<vmem>>, vector<1x16x16xf32>
    %581 = vector.shape_cast %580 : vector<1x16x16xf32> to vector<16x16xf32>
    %582 = arith.maximumf %579, %581 : vector<16x16xf32>
    %c0_431 = arith.constant 0 : index
    %c4_432 = arith.constant 4 : index
    %c0_433 = arith.constant 0 : index
    %583 = vector.load %arg8[%c0_431, %c4_432, %c0_433] : memref<4x20x16xf32, #tpu.memory_space<vmem>>, vector<1x16x16xf32>
    %584 = vector.shape_cast %583 : vector<1x16x16xf32> to vector<16x16xf32>
    %585 = arith.maximumf %582, %584 : vector<16x16xf32>
    %c1_434 = arith.constant 1 : index
    %c0_435 = arith.constant 0 : index
    %c0_436 = arith.constant 0 : index
    %586 = vector.load %arg8[%c1_434, %c0_435, %c0_436] : memref<4x20x16xf32, #tpu.memory_space<vmem>>, vector<1x16x16xf32>
    %587 = vector.shape_cast %586 : vector<1x16x16xf32> to vector<16x16xf32>
    %c1_437 = arith.constant 1 : index
    %c1_438 = arith.constant 1 : index
    %c0_439 = arith.constant 0 : index
    %588 = vector.load %arg8[%c1_437, %c1_438, %c0_439] : memref<4x20x16xf32, #tpu.memory_space<vmem>>, vector<1x16x16xf32>
    %589 = vector.shape_cast %588 : vector<1x16x16xf32> to vector<16x16xf32>
    %590 = arith.maximumf %587, %589 : vector<16x16xf32>
    %c1_440 = arith.constant 1 : index
    %c2_441 = arith.constant 2 : index
    %c0_442 = arith.constant 0 : index
    %591 = vector.load %arg8[%c1_440, %c2_441, %c0_442] : memref<4x20x16xf32, #tpu.memory_space<vmem>>, vector<1x16x16xf32>
    %592 = vector.shape_cast %591 : vector<1x16x16xf32> to vector<16x16xf32>
    %593 = arith.maximumf %590, %592 : vector<16x16xf32>
    %c1_443 = arith.constant 1 : index
    %c3_444 = arith.constant 3 : index
    %c0_445 = arith.constant 0 : index
    %594 = vector.load %arg8[%c1_443, %c3_444, %c0_445] : memref<4x20x16xf32, #tpu.memory_space<vmem>>, vector<1x16x16xf32>
    %595 = vector.shape_cast %594 : vector<1x16x16xf32> to vector<16x16xf32>
    %596 = arith.maximumf %593, %595 : vector<16x16xf32>
    %c1_446 = arith.constant 1 : index
    %c4_447 = arith.constant 4 : index
    %c0_448 = arith.constant 0 : index
    %597 = vector.load %arg8[%c1_446, %c4_447, %c0_448] : memref<4x20x16xf32, #tpu.memory_space<vmem>>, vector<1x16x16xf32>
    %598 = vector.shape_cast %597 : vector<1x16x16xf32> to vector<16x16xf32>
    %599 = arith.maximumf %596, %598 : vector<16x16xf32>
    %c2_449 = arith.constant 2 : index
    %c0_450 = arith.constant 0 : index
    %c0_451 = arith.constant 0 : index
    %600 = vector.load %arg8[%c2_449, %c0_450, %c0_451] : memref<4x20x16xf32, #tpu.memory_space<vmem>>, vector<1x16x16xf32>
    %601 = vector.shape_cast %600 : vector<1x16x16xf32> to vector<16x16xf32>
    %c2_452 = arith.constant 2 : index
    %c1_453 = arith.constant 1 : index
    %c0_454 = arith.constant 0 : index
    %602 = vector.load %arg8[%c2_452, %c1_453, %c0_454] : memref<4x20x16xf32, #tpu.memory_space<vmem>>, vector<1x16x16xf32>
    %603 = vector.shape_cast %602 : vector<1x16x16xf32> to vector<16x16xf32>
    %604 = arith.maximumf %601, %603 : vector<16x16xf32>
    %c2_455 = arith.constant 2 : index
    %c2_456 = arith.constant 2 : index
    %c0_457 = arith.constant 0 : index
    %605 = vector.load %arg8[%c2_455, %c2_456, %c0_457] : memref<4x20x16xf32, #tpu.memory_space<vmem>>, vector<1x16x16xf32>
    %606 = vector.shape_cast %605 : vector<1x16x16xf32> to vector<16x16xf32>
    %607 = arith.maximumf %604, %606 : vector<16x16xf32>
    %c2_458 = arith.constant 2 : index
    %c3_459 = arith.constant 3 : index
    %c0_460 = arith.constant 0 : index
    %608 = vector.load %arg8[%c2_458, %c3_459, %c0_460] : memref<4x20x16xf32, #tpu.memory_space<vmem>>, vector<1x16x16xf32>
    %609 = vector.shape_cast %608 : vector<1x16x16xf32> to vector<16x16xf32>
    %610 = arith.maximumf %607, %609 : vector<16x16xf32>
    %c2_461 = arith.constant 2 : index
    %c4_462 = arith.constant 4 : index
    %c0_463 = arith.constant 0 : index
    %611 = vector.load %arg8[%c2_461, %c4_462, %c0_463] : memref<4x20x16xf32, #tpu.memory_space<vmem>>, vector<1x16x16xf32>
    %612 = vector.shape_cast %611 : vector<1x16x16xf32> to vector<16x16xf32>
    %613 = arith.maximumf %610, %612 : vector<16x16xf32>
    %c3_464 = arith.constant 3 : index
    %c0_465 = arith.constant 0 : index
    %c0_466 = arith.constant 0 : index
    %614 = vector.load %arg8[%c3_464, %c0_465, %c0_466] : memref<4x20x16xf32, #tpu.memory_space<vmem>>, vector<1x16x16xf32>
    %615 = vector.shape_cast %614 : vector<1x16x16xf32> to vector<16x16xf32>
    %c3_467 = arith.constant 3 : index
    %c1_468 = arith.constant 1 : index
    %c0_469 = arith.constant 0 : index
    %616 = vector.load %arg8[%c3_467, %c1_468, %c0_469] : memref<4x20x16xf32, #tpu.memory_space<vmem>>, vector<1x16x16xf32>
    %617 = vector.shape_cast %616 : vector<1x16x16xf32> to vector<16x16xf32>
    %618 = arith.maximumf %615, %617 : vector<16x16xf32>
    %c3_470 = arith.constant 3 : index
    %c2_471 = arith.constant 2 : index
    %c0_472 = arith.constant 0 : index
    %619 = vector.load %arg8[%c3_470, %c2_471, %c0_472] : memref<4x20x16xf32, #tpu.memory_space<vmem>>, vector<1x16x16xf32>
    %620 = vector.shape_cast %619 : vector<1x16x16xf32> to vector<16x16xf32>
    %621 = arith.maximumf %618, %620 : vector<16x16xf32>
    %c3_473 = arith.constant 3 : index
    %c3_474 = arith.constant 3 : index
    %c0_475 = arith.constant 0 : index
    %622 = vector.load %arg8[%c3_473, %c3_474, %c0_475] : memref<4x20x16xf32, #tpu.memory_space<vmem>>, vector<1x16x16xf32>
    %623 = vector.shape_cast %622 : vector<1x16x16xf32> to vector<16x16xf32>
    %624 = arith.maximumf %621, %623 : vector<16x16xf32>
    %c3_476 = arith.constant 3 : index
    %c4_477 = arith.constant 4 : index
    %c0_478 = arith.constant 0 : index
    %625 = vector.load %arg8[%c3_476, %c4_477, %c0_478] : memref<4x20x16xf32, #tpu.memory_space<vmem>>, vector<1x16x16xf32>
    %626 = vector.shape_cast %625 : vector<1x16x16xf32> to vector<16x16xf32>
    %627 = arith.maximumf %624, %626 : vector<16x16xf32>
    %c0_479 = arith.constant 0 : index
    %c8 = arith.constant 8 : index
    %628 = memref.load %arg4[%c0_479, %c8] : memref<8x16xf32, #tpu.memory_space<smem>>
    %629 = vector.broadcast %628 : f32 to vector<16x16xf32>
    %630 = arith.mulf %585, %629 : vector<16x16xf32>
    %631 = arith.addf %379, %630 : vector<16x16xf32>
    %c0_480 = arith.constant 0 : index
    %c9 = arith.constant 9 : index
    %632 = memref.load %arg4[%c0_480, %c9] : memref<8x16xf32, #tpu.memory_space<smem>>
    %633 = vector.broadcast %632 : f32 to vector<16x16xf32>
    %634 = arith.mulf %599, %633 : vector<16x16xf32>
    %635 = arith.addf %631, %634 : vector<16x16xf32>
    %c0_481 = arith.constant 0 : index
    %c10 = arith.constant 10 : index
    %636 = memref.load %arg4[%c0_481, %c10] : memref<8x16xf32, #tpu.memory_space<smem>>
    %637 = vector.broadcast %636 : f32 to vector<16x16xf32>
    %638 = arith.mulf %613, %637 : vector<16x16xf32>
    %639 = arith.addf %635, %638 : vector<16x16xf32>
    %c0_482 = arith.constant 0 : index
    %c11 = arith.constant 11 : index
    %640 = memref.load %arg4[%c0_482, %c11] : memref<8x16xf32, #tpu.memory_space<smem>>
    %641 = vector.broadcast %640 : f32 to vector<16x16xf32>
    %642 = arith.mulf %627, %641 : vector<16x16xf32>
    %643 = arith.addf %639, %642 : vector<16x16xf32>
    %c1_483 = arith.constant 1 : index
    %c8_484 = arith.constant 8 : index
    %644 = memref.load %arg4[%c1_483, %c8_484] : memref<8x16xf32, #tpu.memory_space<smem>>
    %645 = vector.broadcast %644 : f32 to vector<16x16xf32>
    %646 = arith.mulf %585, %645 : vector<16x16xf32>
    %647 = arith.addf %395, %646 : vector<16x16xf32>
    %c1_485 = arith.constant 1 : index
    %c9_486 = arith.constant 9 : index
    %648 = memref.load %arg4[%c1_485, %c9_486] : memref<8x16xf32, #tpu.memory_space<smem>>
    %649 = vector.broadcast %648 : f32 to vector<16x16xf32>
    %650 = arith.mulf %599, %649 : vector<16x16xf32>
    %651 = arith.addf %647, %650 : vector<16x16xf32>
    %c1_487 = arith.constant 1 : index
    %c10_488 = arith.constant 10 : index
    %652 = memref.load %arg4[%c1_487, %c10_488] : memref<8x16xf32, #tpu.memory_space<smem>>
    %653 = vector.broadcast %652 : f32 to vector<16x16xf32>
    %654 = arith.mulf %613, %653 : vector<16x16xf32>
    %655 = arith.addf %651, %654 : vector<16x16xf32>
    %c1_489 = arith.constant 1 : index
    %c11_490 = arith.constant 11 : index
    %656 = memref.load %arg4[%c1_489, %c11_490] : memref<8x16xf32, #tpu.memory_space<smem>>
    %657 = vector.broadcast %656 : f32 to vector<16x16xf32>
    %658 = arith.mulf %627, %657 : vector<16x16xf32>
    %659 = arith.addf %655, %658 : vector<16x16xf32>
    %c2_491 = arith.constant 2 : index
    %c8_492 = arith.constant 8 : index
    %660 = memref.load %arg4[%c2_491, %c8_492] : memref<8x16xf32, #tpu.memory_space<smem>>
    %661 = vector.broadcast %660 : f32 to vector<16x16xf32>
    %662 = arith.mulf %585, %661 : vector<16x16xf32>
    %663 = arith.addf %411, %662 : vector<16x16xf32>
    %c2_493 = arith.constant 2 : index
    %c9_494 = arith.constant 9 : index
    %664 = memref.load %arg4[%c2_493, %c9_494] : memref<8x16xf32, #tpu.memory_space<smem>>
    %665 = vector.broadcast %664 : f32 to vector<16x16xf32>
    %666 = arith.mulf %599, %665 : vector<16x16xf32>
    %667 = arith.addf %663, %666 : vector<16x16xf32>
    %c2_495 = arith.constant 2 : index
    %c10_496 = arith.constant 10 : index
    %668 = memref.load %arg4[%c2_495, %c10_496] : memref<8x16xf32, #tpu.memory_space<smem>>
    %669 = vector.broadcast %668 : f32 to vector<16x16xf32>
    %670 = arith.mulf %613, %669 : vector<16x16xf32>
    %671 = arith.addf %667, %670 : vector<16x16xf32>
    %c2_497 = arith.constant 2 : index
    %c11_498 = arith.constant 11 : index
    %672 = memref.load %arg4[%c2_497, %c11_498] : memref<8x16xf32, #tpu.memory_space<smem>>
    %673 = vector.broadcast %672 : f32 to vector<16x16xf32>
    %674 = arith.mulf %627, %673 : vector<16x16xf32>
    %675 = arith.addf %671, %674 : vector<16x16xf32>
    %c3_499 = arith.constant 3 : index
    %c8_500 = arith.constant 8 : index
    %676 = memref.load %arg4[%c3_499, %c8_500] : memref<8x16xf32, #tpu.memory_space<smem>>
    %677 = vector.broadcast %676 : f32 to vector<16x16xf32>
    %678 = arith.mulf %585, %677 : vector<16x16xf32>
    %679 = arith.addf %427, %678 : vector<16x16xf32>
    %c3_501 = arith.constant 3 : index
    %c9_502 = arith.constant 9 : index
    %680 = memref.load %arg4[%c3_501, %c9_502] : memref<8x16xf32, #tpu.memory_space<smem>>
    %681 = vector.broadcast %680 : f32 to vector<16x16xf32>
    %682 = arith.mulf %599, %681 : vector<16x16xf32>
    %683 = arith.addf %679, %682 : vector<16x16xf32>
    %c3_503 = arith.constant 3 : index
    %c10_504 = arith.constant 10 : index
    %684 = memref.load %arg4[%c3_503, %c10_504] : memref<8x16xf32, #tpu.memory_space<smem>>
    %685 = vector.broadcast %684 : f32 to vector<16x16xf32>
    %686 = arith.mulf %613, %685 : vector<16x16xf32>
    %687 = arith.addf %683, %686 : vector<16x16xf32>
    %c3_505 = arith.constant 3 : index
    %c11_506 = arith.constant 11 : index
    %688 = memref.load %arg4[%c3_505, %c11_506] : memref<8x16xf32, #tpu.memory_space<smem>>
    %689 = vector.broadcast %688 : f32 to vector<16x16xf32>
    %690 = arith.mulf %627, %689 : vector<16x16xf32>
    %691 = arith.addf %687, %690 : vector<16x16xf32>
    %c4_507 = arith.constant 4 : index
    %c8_508 = arith.constant 8 : index
    %692 = memref.load %arg4[%c4_507, %c8_508] : memref<8x16xf32, #tpu.memory_space<smem>>
    %693 = vector.broadcast %692 : f32 to vector<16x16xf32>
    %694 = arith.mulf %585, %693 : vector<16x16xf32>
    %695 = arith.addf %443, %694 : vector<16x16xf32>
    %c4_509 = arith.constant 4 : index
    %c9_510 = arith.constant 9 : index
    %696 = memref.load %arg4[%c4_509, %c9_510] : memref<8x16xf32, #tpu.memory_space<smem>>
    %697 = vector.broadcast %696 : f32 to vector<16x16xf32>
    %698 = arith.mulf %599, %697 : vector<16x16xf32>
    %699 = arith.addf %695, %698 : vector<16x16xf32>
    %c4_511 = arith.constant 4 : index
    %c10_512 = arith.constant 10 : index
    %700 = memref.load %arg4[%c4_511, %c10_512] : memref<8x16xf32, #tpu.memory_space<smem>>
    %701 = vector.broadcast %700 : f32 to vector<16x16xf32>
    %702 = arith.mulf %613, %701 : vector<16x16xf32>
    %703 = arith.addf %699, %702 : vector<16x16xf32>
    %c4_513 = arith.constant 4 : index
    %c11_514 = arith.constant 11 : index
    %704 = memref.load %arg4[%c4_513, %c11_514] : memref<8x16xf32, #tpu.memory_space<smem>>
    %705 = vector.broadcast %704 : f32 to vector<16x16xf32>
    %706 = arith.mulf %627, %705 : vector<16x16xf32>
    %707 = arith.addf %703, %706 : vector<16x16xf32>
    %c5_515 = arith.constant 5 : index
    %c8_516 = arith.constant 8 : index
    %708 = memref.load %arg4[%c5_515, %c8_516] : memref<8x16xf32, #tpu.memory_space<smem>>
    %709 = vector.broadcast %708 : f32 to vector<16x16xf32>
    %710 = arith.mulf %585, %709 : vector<16x16xf32>
    %711 = arith.addf %459, %710 : vector<16x16xf32>
    %c5_517 = arith.constant 5 : index
    %c9_518 = arith.constant 9 : index
    %712 = memref.load %arg4[%c5_517, %c9_518] : memref<8x16xf32, #tpu.memory_space<smem>>
    %713 = vector.broadcast %712 : f32 to vector<16x16xf32>
    %714 = arith.mulf %599, %713 : vector<16x16xf32>
    %715 = arith.addf %711, %714 : vector<16x16xf32>
    %c5_519 = arith.constant 5 : index
    %c10_520 = arith.constant 10 : index
    %716 = memref.load %arg4[%c5_519, %c10_520] : memref<8x16xf32, #tpu.memory_space<smem>>
    %717 = vector.broadcast %716 : f32 to vector<16x16xf32>
    %718 = arith.mulf %613, %717 : vector<16x16xf32>
    %719 = arith.addf %715, %718 : vector<16x16xf32>
    %c5_521 = arith.constant 5 : index
    %c11_522 = arith.constant 11 : index
    %720 = memref.load %arg4[%c5_521, %c11_522] : memref<8x16xf32, #tpu.memory_space<smem>>
    %721 = vector.broadcast %720 : f32 to vector<16x16xf32>
    %722 = arith.mulf %627, %721 : vector<16x16xf32>
    %723 = arith.addf %719, %722 : vector<16x16xf32>
    %c6_523 = arith.constant 6 : index
    %c8_524 = arith.constant 8 : index
    %724 = memref.load %arg4[%c6_523, %c8_524] : memref<8x16xf32, #tpu.memory_space<smem>>
    %725 = vector.broadcast %724 : f32 to vector<16x16xf32>
    %726 = arith.mulf %585, %725 : vector<16x16xf32>
    %727 = arith.addf %475, %726 : vector<16x16xf32>
    %c6_525 = arith.constant 6 : index
    %c9_526 = arith.constant 9 : index
    %728 = memref.load %arg4[%c6_525, %c9_526] : memref<8x16xf32, #tpu.memory_space<smem>>
    %729 = vector.broadcast %728 : f32 to vector<16x16xf32>
    %730 = arith.mulf %599, %729 : vector<16x16xf32>
    %731 = arith.addf %727, %730 : vector<16x16xf32>
    %c6_527 = arith.constant 6 : index
    %c10_528 = arith.constant 10 : index
    %732 = memref.load %arg4[%c6_527, %c10_528] : memref<8x16xf32, #tpu.memory_space<smem>>
    %733 = vector.broadcast %732 : f32 to vector<16x16xf32>
    %734 = arith.mulf %613, %733 : vector<16x16xf32>
    %735 = arith.addf %731, %734 : vector<16x16xf32>
    %c6_529 = arith.constant 6 : index
    %c11_530 = arith.constant 11 : index
    %736 = memref.load %arg4[%c6_529, %c11_530] : memref<8x16xf32, #tpu.memory_space<smem>>
    %737 = vector.broadcast %736 : f32 to vector<16x16xf32>
    %738 = arith.mulf %627, %737 : vector<16x16xf32>
    %739 = arith.addf %735, %738 : vector<16x16xf32>
    %c7_531 = arith.constant 7 : index
    %c8_532 = arith.constant 8 : index
    %740 = memref.load %arg4[%c7_531, %c8_532] : memref<8x16xf32, #tpu.memory_space<smem>>
    %741 = vector.broadcast %740 : f32 to vector<16x16xf32>
    %742 = arith.mulf %585, %741 : vector<16x16xf32>
    %743 = arith.addf %491, %742 : vector<16x16xf32>
    %c7_533 = arith.constant 7 : index
    %c9_534 = arith.constant 9 : index
    %744 = memref.load %arg4[%c7_533, %c9_534] : memref<8x16xf32, #tpu.memory_space<smem>>
    %745 = vector.broadcast %744 : f32 to vector<16x16xf32>
    %746 = arith.mulf %599, %745 : vector<16x16xf32>
    %747 = arith.addf %743, %746 : vector<16x16xf32>
    %c7_535 = arith.constant 7 : index
    %c10_536 = arith.constant 10 : index
    %748 = memref.load %arg4[%c7_535, %c10_536] : memref<8x16xf32, #tpu.memory_space<smem>>
    %749 = vector.broadcast %748 : f32 to vector<16x16xf32>
    %750 = arith.mulf %613, %749 : vector<16x16xf32>
    %751 = arith.addf %747, %750 : vector<16x16xf32>
    %c7_537 = arith.constant 7 : index
    %c11_538 = arith.constant 11 : index
    %752 = memref.load %arg4[%c7_537, %c11_538] : memref<8x16xf32, #tpu.memory_space<smem>>
    %753 = vector.broadcast %752 : f32 to vector<16x16xf32>
    %754 = arith.mulf %627, %753 : vector<16x16xf32>
    %755 = arith.addf %751, %754 : vector<16x16xf32>
    %c0_539 = arith.constant 0 : index
    %c0_540 = arith.constant 0 : index
    %c2_541 = arith.constant 2 : index
    %756 = vector.load %arg7[%c0_539, %c0_540, %c2_541] : memref<4x16x20xf32, #tpu.memory_space<vmem>>, vector<1x16x16xf32>
    %757 = vector.shape_cast %756 : vector<1x16x16xf32> to vector<16x16xf32>
    %758 = vector.shape_cast %585 : vector<16x16xf32> to vector<1x16x16xf32>
    tpu.vector_store %arg7[%c0_539, %c0_540, %c2_541], %758 {strides = array<i32>} : memref<4x16x20xf32, #tpu.memory_space<vmem>>, vector<1x16x16xf32>,
    %c1_542 = arith.constant 1 : index
    %c0_543 = arith.constant 0 : index
    %c2_544 = arith.constant 2 : index
    %759 = vector.load %arg7[%c1_542, %c0_543, %c2_544] : memref<4x16x20xf32, #tpu.memory_space<vmem>>, vector<1x16x16xf32>
    %760 = vector.shape_cast %759 : vector<1x16x16xf32> to vector<16x16xf32>
    %761 = vector.shape_cast %599 : vector<16x16xf32> to vector<1x16x16xf32>
    tpu.vector_store %arg7[%c1_542, %c0_543, %c2_544], %761 {strides = array<i32>} : memref<4x16x20xf32, #tpu.memory_space<vmem>>, vector<1x16x16xf32>,
    %c2_545 = arith.constant 2 : index
    %c0_546 = arith.constant 0 : index
    %c2_547 = arith.constant 2 : index
    %762 = vector.load %arg7[%c2_545, %c0_546, %c2_547] : memref<4x16x20xf32, #tpu.memory_space<vmem>>, vector<1x16x16xf32>
    %763 = vector.shape_cast %762 : vector<1x16x16xf32> to vector<16x16xf32>
    %764 = vector.shape_cast %613 : vector<16x16xf32> to vector<1x16x16xf32>
    tpu.vector_store %arg7[%c2_545, %c0_546, %c2_547], %764 {strides = array<i32>} : memref<4x16x20xf32, #tpu.memory_space<vmem>>, vector<1x16x16xf32>,
    %c3_548 = arith.constant 3 : index
    %c0_549 = arith.constant 0 : index
    %c2_550 = arith.constant 2 : index
    %765 = vector.load %arg7[%c3_548, %c0_549, %c2_550] : memref<4x16x20xf32, #tpu.memory_space<vmem>>, vector<1x16x16xf32>
    %766 = vector.shape_cast %765 : vector<1x16x16xf32> to vector<16x16xf32>
    %767 = vector.shape_cast %627 : vector<16x16xf32> to vector<1x16x16xf32>
    tpu.vector_store %arg7[%c3_548, %c0_549, %c2_550], %767 {strides = array<i32>} : memref<4x16x20xf32, #tpu.memory_space<vmem>>, vector<1x16x16xf32>,
    %c0_551 = arith.constant 0 : index
    %c0_552 = arith.constant 0 : index
    %c0_553 = arith.constant 0 : index
    %768 = vector.load %arg7[%c0_551, %c0_552, %c0_553] : memref<4x16x20xf32, #tpu.memory_space<vmem>>, vector<1x16x16xf32>
    %769 = vector.shape_cast %768 : vector<1x16x16xf32> to vector<16x16xf32>
    %c0_554 = arith.constant 0 : index
    %c0_555 = arith.constant 0 : index
    %c1_556 = arith.constant 1 : index
    %770 = vector.load %arg7[%c0_554, %c0_555, %c1_556] : memref<4x16x20xf32, #tpu.memory_space<vmem>>, vector<1x16x16xf32>
    %771 = vector.shape_cast %770 : vector<1x16x16xf32> to vector<16x16xf32>
    %772 = arith.maximumf %769, %771 : vector<16x16xf32>
    %c0_557 = arith.constant 0 : index
    %c0_558 = arith.constant 0 : index
    %c2_559 = arith.constant 2 : index
    %773 = vector.load %arg7[%c0_557, %c0_558, %c2_559] : memref<4x16x20xf32, #tpu.memory_space<vmem>>, vector<1x16x16xf32>
    %774 = vector.shape_cast %773 : vector<1x16x16xf32> to vector<16x16xf32>
    %775 = arith.maximumf %772, %774 : vector<16x16xf32>
    %c0_560 = arith.constant 0 : index
    %c0_561 = arith.constant 0 : index
    %c3_562 = arith.constant 3 : index
    %776 = vector.load %arg7[%c0_560, %c0_561, %c3_562] : memref<4x16x20xf32, #tpu.memory_space<vmem>>, vector<1x16x16xf32>
    %777 = vector.shape_cast %776 : vector<1x16x16xf32> to vector<16x16xf32>
    %778 = arith.maximumf %775, %777 : vector<16x16xf32>
    %c0_563 = arith.constant 0 : index
    %c0_564 = arith.constant 0 : index
    %c4_565 = arith.constant 4 : index
    %779 = vector.load %arg7[%c0_563, %c0_564, %c4_565] : memref<4x16x20xf32, #tpu.memory_space<vmem>>, vector<1x16x16xf32>
    %780 = vector.shape_cast %779 : vector<1x16x16xf32> to vector<16x16xf32>
    %781 = arith.maximumf %778, %780 : vector<16x16xf32>
    %c0_566 = arith.constant 0 : index
    %c2_567 = arith.constant 2 : index
    %c0_568 = arith.constant 0 : index
    %782 = vector.load %arg8[%c0_566, %c2_567, %c0_568] : memref<4x20x16xf32, #tpu.memory_space<vmem>>, vector<1x16x16xf32>
    %783 = vector.shape_cast %782 : vector<1x16x16xf32> to vector<16x16xf32>
    %784 = vector.shape_cast %781 : vector<16x16xf32> to vector<1x16x16xf32>
    tpu.vector_store %arg8[%c0_566, %c2_567, %c0_568], %784 {strides = array<i32>} : memref<4x20x16xf32, #tpu.memory_space<vmem>>, vector<1x16x16xf32>,
    %c1_569 = arith.constant 1 : index
    %c0_570 = arith.constant 0 : index
    %c0_571 = arith.constant 0 : index
    %785 = vector.load %arg7[%c1_569, %c0_570, %c0_571] : memref<4x16x20xf32, #tpu.memory_space<vmem>>, vector<1x16x16xf32>
    %786 = vector.shape_cast %785 : vector<1x16x16xf32> to vector<16x16xf32>
    %c1_572 = arith.constant 1 : index
    %c0_573 = arith.constant 0 : index
    %c1_574 = arith.constant 1 : index
    %787 = vector.load %arg7[%c1_572, %c0_573, %c1_574] : memref<4x16x20xf32, #tpu.memory_space<vmem>>, vector<1x16x16xf32>
    %788 = vector.shape_cast %787 : vector<1x16x16xf32> to vector<16x16xf32>
    %789 = arith.maximumf %786, %788 : vector<16x16xf32>
    %c1_575 = arith.constant 1 : index
    %c0_576 = arith.constant 0 : index
    %c2_577 = arith.constant 2 : index
    %790 = vector.load %arg7[%c1_575, %c0_576, %c2_577] : memref<4x16x20xf32, #tpu.memory_space<vmem>>, vector<1x16x16xf32>
    %791 = vector.shape_cast %790 : vector<1x16x16xf32> to vector<16x16xf32>
    %792 = arith.maximumf %789, %791 : vector<16x16xf32>
    %c1_578 = arith.constant 1 : index
    %c0_579 = arith.constant 0 : index
    %c3_580 = arith.constant 3 : index
    %793 = vector.load %arg7[%c1_578, %c0_579, %c3_580] : memref<4x16x20xf32, #tpu.memory_space<vmem>>, vector<1x16x16xf32>
    %794 = vector.shape_cast %793 : vector<1x16x16xf32> to vector<16x16xf32>
    %795 = arith.maximumf %792, %794 : vector<16x16xf32>
    %c1_581 = arith.constant 1 : index
    %c0_582 = arith.constant 0 : index
    %c4_583 = arith.constant 4 : index
    %796 = vector.load %arg7[%c1_581, %c0_582, %c4_583] : memref<4x16x20xf32, #tpu.memory_space<vmem>>, vector<1x16x16xf32>
    %797 = vector.shape_cast %796 : vector<1x16x16xf32> to vector<16x16xf32>
    %798 = arith.maximumf %795, %797 : vector<16x16xf32>
    %c1_584 = arith.constant 1 : index
    %c2_585 = arith.constant 2 : index
    %c0_586 = arith.constant 0 : index
    %799 = vector.load %arg8[%c1_584, %c2_585, %c0_586] : memref<4x20x16xf32, #tpu.memory_space<vmem>>, vector<1x16x16xf32>
    %800 = vector.shape_cast %799 : vector<1x16x16xf32> to vector<16x16xf32>
    %801 = vector.shape_cast %798 : vector<16x16xf32> to vector<1x16x16xf32>
    tpu.vector_store %arg8[%c1_584, %c2_585, %c0_586], %801 {strides = array<i32>} : memref<4x20x16xf32, #tpu.memory_space<vmem>>, vector<1x16x16xf32>,
    %c2_587 = arith.constant 2 : index
    %c0_588 = arith.constant 0 : index
    %c0_589 = arith.constant 0 : index
    %802 = vector.load %arg7[%c2_587, %c0_588, %c0_589] : memref<4x16x20xf32, #tpu.memory_space<vmem>>, vector<1x16x16xf32>
    %803 = vector.shape_cast %802 : vector<1x16x16xf32> to vector<16x16xf32>
    %c2_590 = arith.constant 2 : index
    %c0_591 = arith.constant 0 : index
    %c1_592 = arith.constant 1 : index
    %804 = vector.load %arg7[%c2_590, %c0_591, %c1_592] : memref<4x16x20xf32, #tpu.memory_space<vmem>>, vector<1x16x16xf32>
    %805 = vector.shape_cast %804 : vector<1x16x16xf32> to vector<16x16xf32>
    %806 = arith.maximumf %803, %805 : vector<16x16xf32>
    %c2_593 = arith.constant 2 : index
    %c0_594 = arith.constant 0 : index
    %c2_595 = arith.constant 2 : index
    %807 = vector.load %arg7[%c2_593, %c0_594, %c2_595] : memref<4x16x20xf32, #tpu.memory_space<vmem>>, vector<1x16x16xf32>
    %808 = vector.shape_cast %807 : vector<1x16x16xf32> to vector<16x16xf32>
    %809 = arith.maximumf %806, %808 : vector<16x16xf32>
    %c2_596 = arith.constant 2 : index
    %c0_597 = arith.constant 0 : index
    %c3_598 = arith.constant 3 : index
    %810 = vector.load %arg7[%c2_596, %c0_597, %c3_598] : memref<4x16x20xf32, #tpu.memory_space<vmem>>, vector<1x16x16xf32>
    %811 = vector.shape_cast %810 : vector<1x16x16xf32> to vector<16x16xf32>
    %812 = arith.maximumf %809, %811 : vector<16x16xf32>
    %c2_599 = arith.constant 2 : index
    %c0_600 = arith.constant 0 : index
    %c4_601 = arith.constant 4 : index
    %813 = vector.load %arg7[%c2_599, %c0_600, %c4_601] : memref<4x16x20xf32, #tpu.memory_space<vmem>>, vector<1x16x16xf32>
    %814 = vector.shape_cast %813 : vector<1x16x16xf32> to vector<16x16xf32>
    %815 = arith.maximumf %812, %814 : vector<16x16xf32>
    %c2_602 = arith.constant 2 : index
    %c2_603 = arith.constant 2 : index
    %c0_604 = arith.constant 0 : index
    %816 = vector.load %arg8[%c2_602, %c2_603, %c0_604] : memref<4x20x16xf32, #tpu.memory_space<vmem>>, vector<1x16x16xf32>
    %817 = vector.shape_cast %816 : vector<1x16x16xf32> to vector<16x16xf32>
    %818 = vector.shape_cast %815 : vector<16x16xf32> to vector<1x16x16xf32>
    tpu.vector_store %arg8[%c2_602, %c2_603, %c0_604], %818 {strides = array<i32>} : memref<4x20x16xf32, #tpu.memory_space<vmem>>, vector<1x16x16xf32>,
    %c3_605 = arith.constant 3 : index
    %c0_606 = arith.constant 0 : index
    %c0_607 = arith.constant 0 : index
    %819 = vector.load %arg7[%c3_605, %c0_606, %c0_607] : memref<4x16x20xf32, #tpu.memory_space<vmem>>, vector<1x16x16xf32>
    %820 = vector.shape_cast %819 : vector<1x16x16xf32> to vector<16x16xf32>
    %c3_608 = arith.constant 3 : index
    %c0_609 = arith.constant 0 : index
    %c1_610 = arith.constant 1 : index
    %821 = vector.load %arg7[%c3_608, %c0_609, %c1_610] : memref<4x16x20xf32, #tpu.memory_space<vmem>>, vector<1x16x16xf32>
    %822 = vector.shape_cast %821 : vector<1x16x16xf32> to vector<16x16xf32>
    %823 = arith.maximumf %820, %822 : vector<16x16xf32>
    %c3_611 = arith.constant 3 : index
    %c0_612 = arith.constant 0 : index
    %c2_613 = arith.constant 2 : index
    %824 = vector.load %arg7[%c3_611, %c0_612, %c2_613] : memref<4x16x20xf32, #tpu.memory_space<vmem>>, vector<1x16x16xf32>
    %825 = vector.shape_cast %824 : vector<1x16x16xf32> to vector<16x16xf32>
    %826 = arith.maximumf %823, %825 : vector<16x16xf32>
    %c3_614 = arith.constant 3 : index
    %c0_615 = arith.constant 0 : index
    %c3_616 = arith.constant 3 : index
    %827 = vector.load %arg7[%c3_614, %c0_615, %c3_616] : memref<4x16x20xf32, #tpu.memory_space<vmem>>, vector<1x16x16xf32>
    %828 = vector.shape_cast %827 : vector<1x16x16xf32> to vector<16x16xf32>
    %829 = arith.maximumf %826, %828 : vector<16x16xf32>
    %c3_617 = arith.constant 3 : index
    %c0_618 = arith.constant 0 : index
    %c4_619 = arith.constant 4 : index
    %830 = vector.load %arg7[%c3_617, %c0_618, %c4_619] : memref<4x16x20xf32, #tpu.memory_space<vmem>>, vector<1x16x16xf32>
    %831 = vector.shape_cast %830 : vector<1x16x16xf32> to vector<16x16xf32>
    %832 = arith.maximumf %829, %831 : vector<16x16xf32>
    %c3_620 = arith.constant 3 : index
    %c2_621 = arith.constant 2 : index
    %c0_622 = arith.constant 0 : index
    %833 = vector.load %arg8[%c3_620, %c2_621, %c0_622] : memref<4x20x16xf32, #tpu.memory_space<vmem>>, vector<1x16x16xf32>
    %834 = vector.shape_cast %833 : vector<1x16x16xf32> to vector<16x16xf32>
    %835 = vector.shape_cast %832 : vector<16x16xf32> to vector<1x16x16xf32>
    tpu.vector_store %arg8[%c3_620, %c2_621, %c0_622], %835 {strides = array<i32>} : memref<4x20x16xf32, #tpu.memory_space<vmem>>, vector<1x16x16xf32>,
    %c0_623 = arith.constant 0 : index
    %c0_624 = arith.constant 0 : index
    %c0_625 = arith.constant 0 : index
    %836 = vector.load %arg8[%c0_623, %c0_624, %c0_625] : memref<4x20x16xf32, #tpu.memory_space<vmem>>, vector<1x16x16xf32>
    %837 = vector.shape_cast %836 : vector<1x16x16xf32> to vector<16x16xf32>
    %c0_626 = arith.constant 0 : index
    %c1_627 = arith.constant 1 : index
    %c0_628 = arith.constant 0 : index
    %838 = vector.load %arg8[%c0_626, %c1_627, %c0_628] : memref<4x20x16xf32, #tpu.memory_space<vmem>>, vector<1x16x16xf32>
    %839 = vector.shape_cast %838 : vector<1x16x16xf32> to vector<16x16xf32>
    %840 = arith.maximumf %837, %839 : vector<16x16xf32>
    %c0_629 = arith.constant 0 : index
    %c2_630 = arith.constant 2 : index
    %c0_631 = arith.constant 0 : index
    %841 = vector.load %arg8[%c0_629, %c2_630, %c0_631] : memref<4x20x16xf32, #tpu.memory_space<vmem>>, vector<1x16x16xf32>
    %842 = vector.shape_cast %841 : vector<1x16x16xf32> to vector<16x16xf32>
    %843 = arith.maximumf %840, %842 : vector<16x16xf32>
    %c0_632 = arith.constant 0 : index
    %c3_633 = arith.constant 3 : index
    %c0_634 = arith.constant 0 : index
    %844 = vector.load %arg8[%c0_632, %c3_633, %c0_634] : memref<4x20x16xf32, #tpu.memory_space<vmem>>, vector<1x16x16xf32>
    %845 = vector.shape_cast %844 : vector<1x16x16xf32> to vector<16x16xf32>
    %846 = arith.maximumf %843, %845 : vector<16x16xf32>
    %c0_635 = arith.constant 0 : index
    %c4_636 = arith.constant 4 : index
    %c0_637 = arith.constant 0 : index
    %847 = vector.load %arg8[%c0_635, %c4_636, %c0_637] : memref<4x20x16xf32, #tpu.memory_space<vmem>>, vector<1x16x16xf32>
    %848 = vector.shape_cast %847 : vector<1x16x16xf32> to vector<16x16xf32>
    %849 = arith.maximumf %846, %848 : vector<16x16xf32>
    %c1_638 = arith.constant 1 : index
    %c0_639 = arith.constant 0 : index
    %c0_640 = arith.constant 0 : index
    %850 = vector.load %arg8[%c1_638, %c0_639, %c0_640] : memref<4x20x16xf32, #tpu.memory_space<vmem>>, vector<1x16x16xf32>
    %851 = vector.shape_cast %850 : vector<1x16x16xf32> to vector<16x16xf32>
    %c1_641 = arith.constant 1 : index
    %c1_642 = arith.constant 1 : index
    %c0_643 = arith.constant 0 : index
    %852 = vector.load %arg8[%c1_641, %c1_642, %c0_643] : memref<4x20x16xf32, #tpu.memory_space<vmem>>, vector<1x16x16xf32>
    %853 = vector.shape_cast %852 : vector<1x16x16xf32> to vector<16x16xf32>
    %854 = arith.maximumf %851, %853 : vector<16x16xf32>
    %c1_644 = arith.constant 1 : index
    %c2_645 = arith.constant 2 : index
    %c0_646 = arith.constant 0 : index
    %855 = vector.load %arg8[%c1_644, %c2_645, %c0_646] : memref<4x20x16xf32, #tpu.memory_space<vmem>>, vector<1x16x16xf32>
    %856 = vector.shape_cast %855 : vector<1x16x16xf32> to vector<16x16xf32>
    %857 = arith.maximumf %854, %856 : vector<16x16xf32>
    %c1_647 = arith.constant 1 : index
    %c3_648 = arith.constant 3 : index
    %c0_649 = arith.constant 0 : index
    %858 = vector.load %arg8[%c1_647, %c3_648, %c0_649] : memref<4x20x16xf32, #tpu.memory_space<vmem>>, vector<1x16x16xf32>
    %859 = vector.shape_cast %858 : vector<1x16x16xf32> to vector<16x16xf32>
    %860 = arith.maximumf %857, %859 : vector<16x16xf32>
    %c1_650 = arith.constant 1 : index
    %c4_651 = arith.constant 4 : index
    %c0_652 = arith.constant 0 : index
    %861 = vector.load %arg8[%c1_650, %c4_651, %c0_652] : memref<4x20x16xf32, #tpu.memory_space<vmem>>, vector<1x16x16xf32>
    %862 = vector.shape_cast %861 : vector<1x16x16xf32> to vector<16x16xf32>
    %863 = arith.maximumf %860, %862 : vector<16x16xf32>
    %c2_653 = arith.constant 2 : index
    %c0_654 = arith.constant 0 : index
    %c0_655 = arith.constant 0 : index
    %864 = vector.load %arg8[%c2_653, %c0_654, %c0_655] : memref<4x20x16xf32, #tpu.memory_space<vmem>>, vector<1x16x16xf32>
    %865 = vector.shape_cast %864 : vector<1x16x16xf32> to vector<16x16xf32>
    %c2_656 = arith.constant 2 : index
    %c1_657 = arith.constant 1 : index
    %c0_658 = arith.constant 0 : index
    %866 = vector.load %arg8[%c2_656, %c1_657, %c0_658] : memref<4x20x16xf32, #tpu.memory_space<vmem>>, vector<1x16x16xf32>
    %867 = vector.shape_cast %866 : vector<1x16x16xf32> to vector<16x16xf32>
    %868 = arith.maximumf %865, %867 : vector<16x16xf32>
    %c2_659 = arith.constant 2 : index
    %c2_660 = arith.constant 2 : index
    %c0_661 = arith.constant 0 : index
    %869 = vector.load %arg8[%c2_659, %c2_660, %c0_661] : memref<4x20x16xf32, #tpu.memory_space<vmem>>, vector<1x16x16xf32>
    %870 = vector.shape_cast %869 : vector<1x16x16xf32> to vector<16x16xf32>
    %871 = arith.maximumf %868, %870 : vector<16x16xf32>
    %c2_662 = arith.constant 2 : index
    %c3_663 = arith.constant 3 : index
    %c0_664 = arith.constant 0 : index
    %872 = vector.load %arg8[%c2_662, %c3_663, %c0_664] : memref<4x20x16xf32, #tpu.memory_space<vmem>>, vector<1x16x16xf32>
    %873 = vector.shape_cast %872 : vector<1x16x16xf32> to vector<16x16xf32>
    %874 = arith.maximumf %871, %873 : vector<16x16xf32>
    %c2_665 = arith.constant 2 : index
    %c4_666 = arith.constant 4 : index
    %c0_667 = arith.constant 0 : index
    %875 = vector.load %arg8[%c2_665, %c4_666, %c0_667] : memref<4x20x16xf32, #tpu.memory_space<vmem>>, vector<1x16x16xf32>
    %876 = vector.shape_cast %875 : vector<1x16x16xf32> to vector<16x16xf32>
    %877 = arith.maximumf %874, %876 : vector<16x16xf32>
    %c3_668 = arith.constant 3 : index
    %c0_669 = arith.constant 0 : index
    %c0_670 = arith.constant 0 : index
    %878 = vector.load %arg8[%c3_668, %c0_669, %c0_670] : memref<4x20x16xf32, #tpu.memory_space<vmem>>, vector<1x16x16xf32>
    %879 = vector.shape_cast %878 : vector<1x16x16xf32> to vector<16x16xf32>
    %c3_671 = arith.constant 3 : index
    %c1_672 = arith.constant 1 : index
    %c0_673 = arith.constant 0 : index
    %880 = vector.load %arg8[%c3_671, %c1_672, %c0_673] : memref<4x20x16xf32, #tpu.memory_space<vmem>>, vector<1x16x16xf32>
    %881 = vector.shape_cast %880 : vector<1x16x16xf32> to vector<16x16xf32>
    %882 = arith.maximumf %879, %881 : vector<16x16xf32>
    %c3_674 = arith.constant 3 : index
    %c2_675 = arith.constant 2 : index
    %c0_676 = arith.constant 0 : index
    %883 = vector.load %arg8[%c3_674, %c2_675, %c0_676] : memref<4x20x16xf32, #tpu.memory_space<vmem>>, vector<1x16x16xf32>
    %884 = vector.shape_cast %883 : vector<1x16x16xf32> to vector<16x16xf32>
    %885 = arith.maximumf %882, %884 : vector<16x16xf32>
    %c3_677 = arith.constant 3 : index
    %c3_678 = arith.constant 3 : index
    %c0_679 = arith.constant 0 : index
    %886 = vector.load %arg8[%c3_677, %c3_678, %c0_679] : memref<4x20x16xf32, #tpu.memory_space<vmem>>, vector<1x16x16xf32>
    %887 = vector.shape_cast %886 : vector<1x16x16xf32> to vector<16x16xf32>
    %888 = arith.maximumf %885, %887 : vector<16x16xf32>
    %c3_680 = arith.constant 3 : index
    %c4_681 = arith.constant 4 : index
    %c0_682 = arith.constant 0 : index
    %889 = vector.load %arg8[%c3_680, %c4_681, %c0_682] : memref<4x20x16xf32, #tpu.memory_space<vmem>>, vector<1x16x16xf32>
    %890 = vector.shape_cast %889 : vector<1x16x16xf32> to vector<16x16xf32>
    %891 = arith.maximumf %888, %890 : vector<16x16xf32>
    %c0_683 = arith.constant 0 : index
    %c12 = arith.constant 12 : index
    %892 = memref.load %arg4[%c0_683, %c12] : memref<8x16xf32, #tpu.memory_space<smem>>
    %893 = vector.broadcast %892 : f32 to vector<16x16xf32>
    %894 = arith.mulf %849, %893 : vector<16x16xf32>
    %895 = arith.addf %643, %894 : vector<16x16xf32>
    %c0_684 = arith.constant 0 : index
    %c13 = arith.constant 13 : index
    %896 = memref.load %arg4[%c0_684, %c13] : memref<8x16xf32, #tpu.memory_space<smem>>
    %897 = vector.broadcast %896 : f32 to vector<16x16xf32>
    %898 = arith.mulf %863, %897 : vector<16x16xf32>
    %899 = arith.addf %895, %898 : vector<16x16xf32>
    %c0_685 = arith.constant 0 : index
    %c14 = arith.constant 14 : index
    %900 = memref.load %arg4[%c0_685, %c14] : memref<8x16xf32, #tpu.memory_space<smem>>
    %901 = vector.broadcast %900 : f32 to vector<16x16xf32>
    %902 = arith.mulf %877, %901 : vector<16x16xf32>
    %903 = arith.addf %899, %902 : vector<16x16xf32>
    %c0_686 = arith.constant 0 : index
    %c15 = arith.constant 15 : index
    %904 = memref.load %arg4[%c0_686, %c15] : memref<8x16xf32, #tpu.memory_space<smem>>
    %905 = vector.broadcast %904 : f32 to vector<16x16xf32>
    %906 = arith.mulf %891, %905 : vector<16x16xf32>
    %907 = arith.addf %903, %906 : vector<16x16xf32>
    %c1_687 = arith.constant 1 : index
    %c12_688 = arith.constant 12 : index
    %908 = memref.load %arg4[%c1_687, %c12_688] : memref<8x16xf32, #tpu.memory_space<smem>>
    %909 = vector.broadcast %908 : f32 to vector<16x16xf32>
    %910 = arith.mulf %849, %909 : vector<16x16xf32>
    %911 = arith.addf %659, %910 : vector<16x16xf32>
    %c1_689 = arith.constant 1 : index
    %c13_690 = arith.constant 13 : index
    %912 = memref.load %arg4[%c1_689, %c13_690] : memref<8x16xf32, #tpu.memory_space<smem>>
    %913 = vector.broadcast %912 : f32 to vector<16x16xf32>
    %914 = arith.mulf %863, %913 : vector<16x16xf32>
    %915 = arith.addf %911, %914 : vector<16x16xf32>
    %c1_691 = arith.constant 1 : index
    %c14_692 = arith.constant 14 : index
    %916 = memref.load %arg4[%c1_691, %c14_692] : memref<8x16xf32, #tpu.memory_space<smem>>
    %917 = vector.broadcast %916 : f32 to vector<16x16xf32>
    %918 = arith.mulf %877, %917 : vector<16x16xf32>
    %919 = arith.addf %915, %918 : vector<16x16xf32>
    %c1_693 = arith.constant 1 : index
    %c15_694 = arith.constant 15 : index
    %920 = memref.load %arg4[%c1_693, %c15_694] : memref<8x16xf32, #tpu.memory_space<smem>>
    %921 = vector.broadcast %920 : f32 to vector<16x16xf32>
    %922 = arith.mulf %891, %921 : vector<16x16xf32>
    %923 = arith.addf %919, %922 : vector<16x16xf32>
    %c2_695 = arith.constant 2 : index
    %c12_696 = arith.constant 12 : index
    %924 = memref.load %arg4[%c2_695, %c12_696] : memref<8x16xf32, #tpu.memory_space<smem>>
    %925 = vector.broadcast %924 : f32 to vector<16x16xf32>
    %926 = arith.mulf %849, %925 : vector<16x16xf32>
    %927 = arith.addf %675, %926 : vector<16x16xf32>
    %c2_697 = arith.constant 2 : index
    %c13_698 = arith.constant 13 : index
    %928 = memref.load %arg4[%c2_697, %c13_698] : memref<8x16xf32, #tpu.memory_space<smem>>
    %929 = vector.broadcast %928 : f32 to vector<16x16xf32>
    %930 = arith.mulf %863, %929 : vector<16x16xf32>
    %931 = arith.addf %927, %930 : vector<16x16xf32>
    %c2_699 = arith.constant 2 : index
    %c14_700 = arith.constant 14 : index
    %932 = memref.load %arg4[%c2_699, %c14_700] : memref<8x16xf32, #tpu.memory_space<smem>>
    %933 = vector.broadcast %932 : f32 to vector<16x16xf32>
    %934 = arith.mulf %877, %933 : vector<16x16xf32>
    %935 = arith.addf %931, %934 : vector<16x16xf32>
    %c2_701 = arith.constant 2 : index
    %c15_702 = arith.constant 15 : index
    %936 = memref.load %arg4[%c2_701, %c15_702] : memref<8x16xf32, #tpu.memory_space<smem>>
    %937 = vector.broadcast %936 : f32 to vector<16x16xf32>
    %938 = arith.mulf %891, %937 : vector<16x16xf32>
    %939 = arith.addf %935, %938 : vector<16x16xf32>
    %c3_703 = arith.constant 3 : index
    %c12_704 = arith.constant 12 : index
    %940 = memref.load %arg4[%c3_703, %c12_704] : memref<8x16xf32, #tpu.memory_space<smem>>
    %941 = vector.broadcast %940 : f32 to vector<16x16xf32>
    %942 = arith.mulf %849, %941 : vector<16x16xf32>
    %943 = arith.addf %691, %942 : vector<16x16xf32>
    %c3_705 = arith.constant 3 : index
    %c13_706 = arith.constant 13 : index
    %944 = memref.load %arg4[%c3_705, %c13_706] : memref<8x16xf32, #tpu.memory_space<smem>>
    %945 = vector.broadcast %944 : f32 to vector<16x16xf32>
    %946 = arith.mulf %863, %945 : vector<16x16xf32>
    %947 = arith.addf %943, %946 : vector<16x16xf32>
    %c3_707 = arith.constant 3 : index
    %c14_708 = arith.constant 14 : index
    %948 = memref.load %arg4[%c3_707, %c14_708] : memref<8x16xf32, #tpu.memory_space<smem>>
    %949 = vector.broadcast %948 : f32 to vector<16x16xf32>
    %950 = arith.mulf %877, %949 : vector<16x16xf32>
    %951 = arith.addf %947, %950 : vector<16x16xf32>
    %c3_709 = arith.constant 3 : index
    %c15_710 = arith.constant 15 : index
    %952 = memref.load %arg4[%c3_709, %c15_710] : memref<8x16xf32, #tpu.memory_space<smem>>
    %953 = vector.broadcast %952 : f32 to vector<16x16xf32>
    %954 = arith.mulf %891, %953 : vector<16x16xf32>
    %955 = arith.addf %951, %954 : vector<16x16xf32>
    %c4_711 = arith.constant 4 : index
    %c12_712 = arith.constant 12 : index
    %956 = memref.load %arg4[%c4_711, %c12_712] : memref<8x16xf32, #tpu.memory_space<smem>>
    %957 = vector.broadcast %956 : f32 to vector<16x16xf32>
    %958 = arith.mulf %849, %957 : vector<16x16xf32>
    %959 = arith.addf %707, %958 : vector<16x16xf32>
    %c4_713 = arith.constant 4 : index
    %c13_714 = arith.constant 13 : index
    %960 = memref.load %arg4[%c4_713, %c13_714] : memref<8x16xf32, #tpu.memory_space<smem>>
    %961 = vector.broadcast %960 : f32 to vector<16x16xf32>
    %962 = arith.mulf %863, %961 : vector<16x16xf32>
    %963 = arith.addf %959, %962 : vector<16x16xf32>
    %c4_715 = arith.constant 4 : index
    %c14_716 = arith.constant 14 : index
    %964 = memref.load %arg4[%c4_715, %c14_716] : memref<8x16xf32, #tpu.memory_space<smem>>
    %965 = vector.broadcast %964 : f32 to vector<16x16xf32>
    %966 = arith.mulf %877, %965 : vector<16x16xf32>
    %967 = arith.addf %963, %966 : vector<16x16xf32>
    %c4_717 = arith.constant 4 : index
    %c15_718 = arith.constant 15 : index
    %968 = memref.load %arg4[%c4_717, %c15_718] : memref<8x16xf32, #tpu.memory_space<smem>>
    %969 = vector.broadcast %968 : f32 to vector<16x16xf32>
    %970 = arith.mulf %891, %969 : vector<16x16xf32>
    %971 = arith.addf %967, %970 : vector<16x16xf32>
    %c5_719 = arith.constant 5 : index
    %c12_720 = arith.constant 12 : index
    %972 = memref.load %arg4[%c5_719, %c12_720] : memref<8x16xf32, #tpu.memory_space<smem>>
    %973 = vector.broadcast %972 : f32 to vector<16x16xf32>
    %974 = arith.mulf %849, %973 : vector<16x16xf32>
    %975 = arith.addf %723, %974 : vector<16x16xf32>
    %c5_721 = arith.constant 5 : index
    %c13_722 = arith.constant 13 : index
    %976 = memref.load %arg4[%c5_721, %c13_722] : memref<8x16xf32, #tpu.memory_space<smem>>
    %977 = vector.broadcast %976 : f32 to vector<16x16xf32>
    %978 = arith.mulf %863, %977 : vector<16x16xf32>
    %979 = arith.addf %975, %978 : vector<16x16xf32>
    %c5_723 = arith.constant 5 : index
    %c14_724 = arith.constant 14 : index
    %980 = memref.load %arg4[%c5_723, %c14_724] : memref<8x16xf32, #tpu.memory_space<smem>>
    %981 = vector.broadcast %980 : f32 to vector<16x16xf32>
    %982 = arith.mulf %877, %981 : vector<16x16xf32>
    %983 = arith.addf %979, %982 : vector<16x16xf32>
    %c5_725 = arith.constant 5 : index
    %c15_726 = arith.constant 15 : index
    %984 = memref.load %arg4[%c5_725, %c15_726] : memref<8x16xf32, #tpu.memory_space<smem>>
    %985 = vector.broadcast %984 : f32 to vector<16x16xf32>
    %986 = arith.mulf %891, %985 : vector<16x16xf32>
    %987 = arith.addf %983, %986 : vector<16x16xf32>
    %c6_727 = arith.constant 6 : index
    %c12_728 = arith.constant 12 : index
    %988 = memref.load %arg4[%c6_727, %c12_728] : memref<8x16xf32, #tpu.memory_space<smem>>
    %989 = vector.broadcast %988 : f32 to vector<16x16xf32>
    %990 = arith.mulf %849, %989 : vector<16x16xf32>
    %991 = arith.addf %739, %990 : vector<16x16xf32>
    %c6_729 = arith.constant 6 : index
    %c13_730 = arith.constant 13 : index
    %992 = memref.load %arg4[%c6_729, %c13_730] : memref<8x16xf32, #tpu.memory_space<smem>>
    %993 = vector.broadcast %992 : f32 to vector<16x16xf32>
    %994 = arith.mulf %863, %993 : vector<16x16xf32>
    %995 = arith.addf %991, %994 : vector<16x16xf32>
    %c6_731 = arith.constant 6 : index
    %c14_732 = arith.constant 14 : index
    %996 = memref.load %arg4[%c6_731, %c14_732] : memref<8x16xf32, #tpu.memory_space<smem>>
    %997 = vector.broadcast %996 : f32 to vector<16x16xf32>
    %998 = arith.mulf %877, %997 : vector<16x16xf32>
    %999 = arith.addf %995, %998 : vector<16x16xf32>
    %c6_733 = arith.constant 6 : index
    %c15_734 = arith.constant 15 : index
    %1000 = memref.load %arg4[%c6_733, %c15_734] : memref<8x16xf32, #tpu.memory_space<smem>>
    %1001 = vector.broadcast %1000 : f32 to vector<16x16xf32>
    %1002 = arith.mulf %891, %1001 : vector<16x16xf32>
    %1003 = arith.addf %999, %1002 : vector<16x16xf32>
    %c7_735 = arith.constant 7 : index
    %c12_736 = arith.constant 12 : index
    %1004 = memref.load %arg4[%c7_735, %c12_736] : memref<8x16xf32, #tpu.memory_space<smem>>
    %1005 = vector.broadcast %1004 : f32 to vector<16x16xf32>
    %1006 = arith.mulf %849, %1005 : vector<16x16xf32>
    %1007 = arith.addf %755, %1006 : vector<16x16xf32>
    %c7_737 = arith.constant 7 : index
    %c13_738 = arith.constant 13 : index
    %1008 = memref.load %arg4[%c7_737, %c13_738] : memref<8x16xf32, #tpu.memory_space<smem>>
    %1009 = vector.broadcast %1008 : f32 to vector<16x16xf32>
    %1010 = arith.mulf %863, %1009 : vector<16x16xf32>
    %1011 = arith.addf %1007, %1010 : vector<16x16xf32>
    %c7_739 = arith.constant 7 : index
    %c14_740 = arith.constant 14 : index
    %1012 = memref.load %arg4[%c7_739, %c14_740] : memref<8x16xf32, #tpu.memory_space<smem>>
    %1013 = vector.broadcast %1012 : f32 to vector<16x16xf32>
    %1014 = arith.mulf %877, %1013 : vector<16x16xf32>
    %1015 = arith.addf %1011, %1014 : vector<16x16xf32>
    %c7_741 = arith.constant 7 : index
    %c15_742 = arith.constant 15 : index
    %1016 = memref.load %arg4[%c7_741, %c15_742] : memref<8x16xf32, #tpu.memory_space<smem>>
    %1017 = vector.broadcast %1016 : f32 to vector<16x16xf32>
    %1018 = arith.mulf %891, %1017 : vector<16x16xf32>
    %1019 = arith.addf %1015, %1018 : vector<16x16xf32>
    %c0_743 = arith.constant 0 : index
    %1020 = memref.load %arg5[%c0_743] : memref<8xf32, #tpu.memory_space<smem>>
    %1021 = vector.broadcast %1020 : f32 to vector<16x16xf32>
    %1022 = arith.addf %907, %1021 : vector<16x16xf32>
    %cst_744 = arith.constant 0.000000e+00 : f32
    %1023 = vector.broadcast %cst_744 : f32 to vector<16x16xf32>
    %1024 = arith.maximumf %1022, %1023 : vector<16x16xf32>
    %c0_745 = arith.constant 0 : index
    %c0_746 = arith.constant 0 : index
    %c0_747 = arith.constant 0 : index
    %c0_748 = arith.constant 0 : index
    %1025 = vector.load %arg6[%c0_745, %c0_746, %c0_747, %c0_748] : memref<1x8x16x16xf32, #tpu.memory_space<vmem>>, vector<1x1x16x16xf32>
    %1026 = vector.shape_cast %1025 : vector<1x1x16x16xf32> to vector<16x16xf32>
    %1027 = vector.shape_cast %1024 : vector<16x16xf32> to vector<1x1x16x16xf32>
    tpu.vector_store %arg6[%c0_745, %c0_746, %c0_747, %c0_748], %1027 {strides = array<i32>} : memref<1x8x16x16xf32, #tpu.memory_space<vmem>>, vector<1x1x16x16xf32>,
    %c1_749 = arith.constant 1 : index
    %1028 = memref.load %arg5[%c1_749] : memref<8xf32, #tpu.memory_space<smem>>
    %1029 = vector.broadcast %1028 : f32 to vector<16x16xf32>
    %1030 = arith.addf %923, %1029 : vector<16x16xf32>
    %cst_750 = arith.constant 0.000000e+00 : f32
    %1031 = vector.broadcast %cst_750 : f32 to vector<16x16xf32>
    %1032 = arith.maximumf %1030, %1031 : vector<16x16xf32>
    %c0_751 = arith.constant 0 : index
    %c1_752 = arith.constant 1 : index
    %c0_753 = arith.constant 0 : index
    %c0_754 = arith.constant 0 : index
    %1033 = vector.load %arg6[%c0_751, %c1_752, %c0_753, %c0_754] : memref<1x8x16x16xf32, #tpu.memory_space<vmem>>, vector<1x1x16x16xf32>
    %1034 = vector.shape_cast %1033 : vector<1x1x16x16xf32> to vector<16x16xf32>
    %1035 = vector.shape_cast %1032 : vector<16x16xf32> to vector<1x1x16x16xf32>
    tpu.vector_store %arg6[%c0_751, %c1_752, %c0_753, %c0_754], %1035 {strides = array<i32>} : memref<1x8x16x16xf32, #tpu.memory_space<vmem>>, vector<1x1x16x16xf32>,
    %c2_755 = arith.constant 2 : index
    %1036 = memref.load %arg5[%c2_755] : memref<8xf32, #tpu.memory_space<smem>>
    %1037 = vector.broadcast %1036 : f32 to vector<16x16xf32>
    %1038 = arith.addf %939, %1037 : vector<16x16xf32>
    %cst_756 = arith.constant 0.000000e+00 : f32
    %1039 = vector.broadcast %cst_756 : f32 to vector<16x16xf32>
    %1040 = arith.maximumf %1038, %1039 : vector<16x16xf32>
    %c0_757 = arith.constant 0 : index
    %c2_758 = arith.constant 2 : index
    %c0_759 = arith.constant 0 : index
    %c0_760 = arith.constant 0 : index
    %1041 = vector.load %arg6[%c0_757, %c2_758, %c0_759, %c0_760] : memref<1x8x16x16xf32, #tpu.memory_space<vmem>>, vector<1x1x16x16xf32>
    %1042 = vector.shape_cast %1041 : vector<1x1x16x16xf32> to vector<16x16xf32>
    %1043 = vector.shape_cast %1040 : vector<16x16xf32> to vector<1x1x16x16xf32>
    tpu.vector_store %arg6[%c0_757, %c2_758, %c0_759, %c0_760], %1043 {strides = array<i32>} : memref<1x8x16x16xf32, #tpu.memory_space<vmem>>, vector<1x1x16x16xf32>,
    %c3_761 = arith.constant 3 : index
    %1044 = memref.load %arg5[%c3_761] : memref<8xf32, #tpu.memory_space<smem>>
    %1045 = vector.broadcast %1044 : f32 to vector<16x16xf32>
    %1046 = arith.addf %955, %1045 : vector<16x16xf32>
    %cst_762 = arith.constant 0.000000e+00 : f32
    %1047 = vector.broadcast %cst_762 : f32 to vector<16x16xf32>
    %1048 = arith.maximumf %1046, %1047 : vector<16x16xf32>
    %c0_763 = arith.constant 0 : index
    %c3_764 = arith.constant 3 : index
    %c0_765 = arith.constant 0 : index
    %c0_766 = arith.constant 0 : index
    %1049 = vector.load %arg6[%c0_763, %c3_764, %c0_765, %c0_766] : memref<1x8x16x16xf32, #tpu.memory_space<vmem>>, vector<1x1x16x16xf32>
    %1050 = vector.shape_cast %1049 : vector<1x1x16x16xf32> to vector<16x16xf32>
    %1051 = vector.shape_cast %1048 : vector<16x16xf32> to vector<1x1x16x16xf32>
    tpu.vector_store %arg6[%c0_763, %c3_764, %c0_765, %c0_766], %1051 {strides = array<i32>} : memref<1x8x16x16xf32, #tpu.memory_space<vmem>>, vector<1x1x16x16xf32>,
    %c4_767 = arith.constant 4 : index
    %1052 = memref.load %arg5[%c4_767] : memref<8xf32, #tpu.memory_space<smem>>
    %1053 = vector.broadcast %1052 : f32 to vector<16x16xf32>
    %1054 = arith.addf %971, %1053 : vector<16x16xf32>
    %cst_768 = arith.constant 0.000000e+00 : f32
    %1055 = vector.broadcast %cst_768 : f32 to vector<16x16xf32>
    %1056 = arith.maximumf %1054, %1055 : vector<16x16xf32>
    %c0_769 = arith.constant 0 : index
    %c4_770 = arith.constant 4 : index
    %c0_771 = arith.constant 0 : index
    %c0_772 = arith.constant 0 : index
    %1057 = vector.load %arg6[%c0_769, %c4_770, %c0_771, %c0_772] : memref<1x8x16x16xf32, #tpu.memory_space<vmem>>, vector<1x1x16x16xf32>
    %1058 = vector.shape_cast %1057 : vector<1x1x16x16xf32> to vector<16x16xf32>
    %1059 = vector.shape_cast %1056 : vector<16x16xf32> to vector<1x1x16x16xf32>
    tpu.vector_store %arg6[%c0_769, %c4_770, %c0_771, %c0_772], %1059 {strides = array<i32>} : memref<1x8x16x16xf32, #tpu.memory_space<vmem>>, vector<1x1x16x16xf32>,
    %c5_773 = arith.constant 5 : index
    %1060 = memref.load %arg5[%c5_773] : memref<8xf32, #tpu.memory_space<smem>>
    %1061 = vector.broadcast %1060 : f32 to vector<16x16xf32>
    %1062 = arith.addf %987, %1061 : vector<16x16xf32>
    %cst_774 = arith.constant 0.000000e+00 : f32
    %1063 = vector.broadcast %cst_774 : f32 to vector<16x16xf32>
    %1064 = arith.maximumf %1062, %1063 : vector<16x16xf32>
    %c0_775 = arith.constant 0 : index
    %c5_776 = arith.constant 5 : index
    %c0_777 = arith.constant 0 : index
    %c0_778 = arith.constant 0 : index
    %1065 = vector.load %arg6[%c0_775, %c5_776, %c0_777, %c0_778] : memref<1x8x16x16xf32, #tpu.memory_space<vmem>>, vector<1x1x16x16xf32>
    %1066 = vector.shape_cast %1065 : vector<1x1x16x16xf32> to vector<16x16xf32>
    %1067 = vector.shape_cast %1064 : vector<16x16xf32> to vector<1x1x16x16xf32>
    tpu.vector_store %arg6[%c0_775, %c5_776, %c0_777, %c0_778], %1067 {strides = array<i32>} : memref<1x8x16x16xf32, #tpu.memory_space<vmem>>, vector<1x1x16x16xf32>,
    %c6_779 = arith.constant 6 : index
    %1068 = memref.load %arg5[%c6_779] : memref<8xf32, #tpu.memory_space<smem>>
    %1069 = vector.broadcast %1068 : f32 to vector<16x16xf32>
    %1070 = arith.addf %1003, %1069 : vector<16x16xf32>
    %cst_780 = arith.constant 0.000000e+00 : f32
    %1071 = vector.broadcast %cst_780 : f32 to vector<16x16xf32>
    %1072 = arith.maximumf %1070, %1071 : vector<16x16xf32>
    %c0_781 = arith.constant 0 : index
    %c6_782 = arith.constant 6 : index
    %c0_783 = arith.constant 0 : index
    %c0_784 = arith.constant 0 : index
    %1073 = vector.load %arg6[%c0_781, %c6_782, %c0_783, %c0_784] : memref<1x8x16x16xf32, #tpu.memory_space<vmem>>, vector<1x1x16x16xf32>
    %1074 = vector.shape_cast %1073 : vector<1x1x16x16xf32> to vector<16x16xf32>
    %1075 = vector.shape_cast %1072 : vector<16x16xf32> to vector<1x1x16x16xf32>
    tpu.vector_store %arg6[%c0_781, %c6_782, %c0_783, %c0_784], %1075 {strides = array<i32>} : memref<1x8x16x16xf32, #tpu.memory_space<vmem>>, vector<1x1x16x16xf32>,
    %c7_785 = arith.constant 7 : index
    %1076 = memref.load %arg5[%c7_785] : memref<8xf32, #tpu.memory_space<smem>>
    %1077 = vector.broadcast %1076 : f32 to vector<16x16xf32>
    %1078 = arith.addf %1019, %1077 : vector<16x16xf32>
    %cst_786 = arith.constant 0.000000e+00 : f32
    %1079 = vector.broadcast %cst_786 : f32 to vector<16x16xf32>
    %1080 = arith.maximumf %1078, %1079 : vector<16x16xf32>
    %c0_787 = arith.constant 0 : index
    %c7_788 = arith.constant 7 : index
    %c0_789 = arith.constant 0 : index
    %c0_790 = arith.constant 0 : index
    %1081 = vector.load %arg6[%c0_787, %c7_788, %c0_789, %c0_790] : memref<1x8x16x16xf32, #tpu.memory_space<vmem>>, vector<1x1x16x16xf32>
    %1082 = vector.shape_cast %1081 : vector<1x1x16x16xf32> to vector<16x16xf32>
    %1083 = vector.shape_cast %1080 : vector<16x16xf32> to vector<1x1x16x16xf32>
    tpu.vector_store %arg6[%c0_787, %c7_788, %c0_789, %c0_790], %1083 {strides = array<i32>} : memref<1x8x16x16xf32, #tpu.memory_space<vmem>>, vector<1x1x16x16xf32>,
    return
  }
  func.func @transform_0(%arg0: i32) -> (i32, i32, i32, i32) {
    %c0_i32 = arith.constant 0 : i32
    %c0_i32_0 = arith.constant 0 : i32
    %c0_i32_1 = arith.constant 0 : i32
    %c0_i32_2 = arith.constant 0 : i32
    return %arg0, %c0_i32, %c0_i32_0, %c0_i32_1 : i32, i32, i32, i32
  }
  func.func @transform_1(%arg0: i32) -> (i32, i32) {
    %c0_i32 = arith.constant 0 : i32
    %c0_i32_0 = arith.constant 0 : i32
    %c0_i32_1 = arith.constant 0 : i32
    return %c0_i32, %c0_i32_0 : i32, i32
  }
  func.func @transform_2(%arg0: i32) -> i32 {
    %c0_i32 = arith.constant 0 : i32
    %c0_i32_0 = arith.constant 0 : i32
    return %c0_i32 : i32
  }
  func.func @transform_3(%arg0: i32) -> (i32, i32) {
    %c0_i32 = arith.constant 0 : i32
    %c0_i32_0 = arith.constant 0 : i32
    %c0_i32_1 = arith.constant 0 : i32
    return %c0_i32, %c0_i32_0 : i32, i32
  }
  func.func @transform_4(%arg0: i32) -> i32 {
    %c0_i32 = arith.constant 0 : i32
    %c0_i32_0 = arith.constant 0 : i32
    return %c0_i32 : i32
  }
  func.func @transform_5(%arg0: i32) -> (i32, i32, i32, i32) {
    %c0_i32 = arith.constant 0 : i32
    %c0_i32_0 = arith.constant 0 : i32
    %c0_i32_1 = arith.constant 0 : i32
    %c0_i32_2 = arith.constant 0 : i32
    return %arg0, %c0_i32, %c0_i32_0, %c0_i32_1 : i32, i32, i32, i32
  }
}

</mosaic_0001>

<bundles_post_ra>
// kernel: sppf_forward.1
= control target key start
LH: loop header
LB: loop body
LE: loop exit
PB: predicated region body
PF: predicated region fallthrough
CT: control target
= control target key end

     0   :  { %s4656_s0 = inlined_call_operand.hbm [shape: f32[2,4,16,16], index: 0, kind: input, shape index: {}]   ;;  %s4657_s1 = inlined_call_operand.hbm [shape: f32[4,4], index: 1, kind: input, shape index: {}]   ;;  %s4658_s2 = inlined_call_operand.vmem [shape: f32[4], index: 2, kind: input, shape index: {}]   ;;  %s4659_s3 = inlined_call_operand.hbm [shape: f32[8,16], index: 3, kind: input, shape index: {}]   ;;  %s4660_s4 = inlined_call_operand.vmem [shape: f32[8], index: 4, kind: input, shape index: {}]   ;;  %s4661_s5 = inlined_call_operand.hbm [shape: f32[2,8,16,16], index: 5, kind: output, shape index: {}]  }
   0x1   :  { %4713 = sst [smem:[#allocation47_spill]] %s4656_s0 }
   0x2   :  { %4714 = sst [smem:[#allocation48_spill]] %s4657_s1 }
   0x3   :  { %4715 = sst [smem:[#allocation49_spill]] %s4658_s2 }
   0x4   :  { %4716 = sst [smem:[#allocation50_spill]] %s4659_s3 }
   0x5   :  { %4717 = sst [smem:[#allocation51_spill]] %s4660_s4 }
   0x6   :  { %4718 = sst [smem:[#allocation52_spill]] %s4661_s5 }
   0x7   :  { %10 = vsyncpa [#allocation5], 0 }
   0x8   :  { %12 = vsyncpa [#allocation5 + $0x1], 0 }
   0x9   :  { %13 = vsyncpa [#allocation7], 0 }
   0xa   :  { %14 = vsyncpa [#allocation8], 0 }
   0xb   :  { %15 = vsyncpa [#allocation12], 0 }
   0xc   :  { %16 = vsyncpa [#allocation14], 0 }
   0xd   :  { %17 = vsyncpa [#allocation6], 0 }
   0xe   :  { %19 = vsyncpa [#allocation6 + $0x1], 0  ;;  %s2708_s18 = smov 0   ;;  %s2710_s19 = smov 0  }
   0xf   :  { %s2712_s20 = smov 0   ;;  %s2714_s21 = smov 0  }
  0x10 LB: > { %4719 = sst [smem:[#allocation22_spill]] %s2648_s18  ;;  %s2729_s22 = sadd.s32 4294967295, %s2660_s21   ;;  %s2660_s21 = sphi %s2714_s21, %s4830_s21   ;;  %s2656_s20 = sphi %s2712_s20, %s4833_s20   ;;  %s2652_s19 = sphi %s2710_s19, %s4832_s19   ;;  %s2648_s18 = sphi %s2708_s18, %s4831_s18  }
  0x11   : > { %4720 = sst [smem:[#allocation23_spill]] %s2652_s19  ;;  %s2207_s23 = sadd.s32 4294967294, %s2660_s21  }
  0x12   : > { %4721 = sst [smem:[#allocation24_spill]] %s2656_s20  ;;  %p45_p0 = scmp.ne.s32.totalorder %s2652_s19, %s2648_s18 }
  0x13   : > { %4722 = sst [smem:[#allocation25_spill]] %s2660_s21  ;;  %p4662_p1 = scmp.eq.s32.totalorder %s2729_s22, 0 }
  0x14   : > { %4723 = sst [smem:[#allocation26_spill]] %s2729_s22  ;;  %p153_p2 = scmp.eq.s32.totalorder %s2729_s22, 1 }
  0x15   : > { %p159_p3 = scmp.eq.s32.totalorder %s2207_s23, 1  ;;  %p2738_p4 = por %p4662_p1, %p45_p0 }
  0x16   : > { %p2208_p5 = scmp.ge.s32.totalorder %s2660_s21, 1  ;;  %p166_p7 = scmp.lt.s32.totalorder %s2660_s21, 3 }
  0x17   : > { %s4724_s24 = scalar_select %p2738_p4, 1, 0 }
  0x18   : > { %p2743_p6 = por %p159_p3, %p45_p0  ;;  %p2748_p8 = pnand %p2208_p5, %p166_p7 }
  0x19   : > { %s4728_s2 = sld [smem:[#allocation49_spill]]  ;;  %s2662_s9 = smov [#allocation9]  }
  0x1a   : > { %s4725_s25 = scalar_select %p2743_p6, 1, 0 }
  0x1b   : > { %s4727_s26 = scalar_select %p2748_p8, 1, 0 }
  0x1c   : > { %4726 = sst [smem:[#allocation27_spill]] %s4725_s25  ;;  %p2423_p10 = pneg %p2748_p8 }
  0x1d   : > { %s4729_s4 = sld [smem:[#allocation51_spill]] }
  0x1e   : > { %p2763_p11 = pnand %p2423_p10, %p4662_p1  ;;  %s4731_s1 = sld [smem:[#allocation48_spill]] }
  0x1f   : > { %s188_s29 = sshll.u32 %s4728_s2, 4  ;;  %s189_s29 = int_to_ptr.vmem [resolvable:$true] %s188_s29 }
  0x20   : > { %s2511_s12 = scalar_lea.vmem %s189_s29, 16  ;;  %p2513_p13 = pneg %p2763_p11 }
  0x21   : > { %p2512_p12 = scmp.ne.s32.totalorder %s189_s29, %s2511_s12  ;;  %p2519_p5 = scmp.lt.s32.totalorder %s189_s29, %s189_s29 }
  0x22   : > { %p2520_p7 = scmp.lt.s32.totalorder %s2511_s12, %s2511_s12 }
  0x23   : > { %s208_s7 = sshll.u32 %s4729_s4, 4  ;;  %p2514_p0 = pnand %p2513_p13, %p2512_p12  ;;  %s209_s7 = int_to_ptr.vmem [resolvable:$true] %s208_s7 }
  0x24   : > { %2426 = dma.hbm_to_smem (!%p2763_p11), %s4731_s1, 64, %s2662_s9, [#allocation7]  }
  0x25   : > { %p2515_p3 = pneg %p2514_p0  ;;  %p2521_p10 = por %p2520_p7, %p2519_p5 }
  0x27   : > { %p2522_p9 = pnand %p2521_p10, %p2515_p3 }
  0x29   : > { %2525 = shalt.err (!%p2522_p9)
}
  0x2a   : > { %s2663_s13 = smov [#allocation10]   ;;  %s2664_s14 = smov [#allocation11]  }
  0x2b   : > { %2429 = dma.vmem_to_smem (!%p2763_p11), %s189_s29, 16, %s2663_s13, [#allocation8]  }
  0x2c   : > { %s4732_s3 = sld [smem:[#allocation50_spill]]  ;;  %s2537_s17 = scalar_lea.vmem %s209_s7, 16 }
  0x2d   : > { %p2538_p12 = scmp.ne.s32.totalorder %s209_s7, %s2537_s17  ;;  %p2545_p3 = scmp.lt.s32.totalorder %s209_s7, %s209_s7 }
  0x2e   : > { %p2546_p9 = scmp.lt.s32.totalorder %s2537_s17, %s2537_s17 }
  0x2f   : > { %p2540_p0 = pnand %p2538_p12, %p2513_p13 }
  0x30   : > { %p2547_p7 = por %p2546_p9, %p2545_p3 }
  0x31   : > { %p2541_p5 = pneg %p2540_p0 }
  0x32   : > { %2432 = dma.hbm_to_smem (!%p2763_p11), %s4732_s3, 128, %s2664_s14, [#allocation12]  }
  0x33   : > { %p2548_p10 = pnand %p2547_p7, %p2541_p5 }
  0x35   : > { %2551 = shalt.err (!%p2548_p10)
}
  0x36   : > { %s2665_s23 = smov [#allocation13]   ;;  %s2790_s27 = sadd.s32 1, %s2660_s21  }
  0x37   : > { %2435 = dma.vmem_to_smem (!%p2763_p11), %s209_s7, 16, %s2665_s23, [#allocation14]  }
  0x38   : > { %4733 = sst [smem:[#allocation28_spill]] %s2790_s27  ;;  %s32_s28 = sadd.s32 1, %s2656_s20 }
  0x39   : > { %s29_s29 = ssub.s32 %s2660_s21, %s2790_s27  ;;  %p39_p13 = scmp.ne.s32.totalorder %s2656_s20, %s2652_s19 }
  0x3a   : > { %p30_p12 = scmp.eq.s32.totalorder %s29_s29, 0  ;;  %p40_p0 = scmp.eq.s32.totalorder %s2660_s21, 0 }
  0x3b   : > { %p2800_p5 = por %p153_p2, %p39_p13  ;;  %p2448_p3 = scmp.lt.s32.totalorder %s2660_s21, 2 }
  0x3c   : > { %s2806_s6 = scalar_select %p30_p12, %s2656_s20, %s32_s28  }
  0x3d   : > { %s4734_s30 = scalar_select %p2800_p5, 1, 0 }
  0x3e   : > { %4736 = sst [smem:[#allocation30_spill]] %s2806_s6  ;;  %p41_p9 = por %p40_p0, %p39_p13 }
  0x3f   : > { %4735 = sst [smem:[#allocation29_spill]] %s4734_s30  ;;  %s219_s8 = sand.u32 1, %s2656_s20  }
  0x40   : > { %s2214_s9 = sshll.u32 %s219_s8, 6  ;;  %s2401_s7 = sshll.u32 %s2660_s21, 10 }
  0x41   : > { %s4737_s0 = sld [smem:[#allocation47_spill]]  ;;  %s223_s13 = scalar_lea.vmem [#allocation4], %s2214_s9 }
  0x42   : > { %s230_s14 = sshll.u32 %s223_s13, 4  ;;  %p2817_p2 = pnand %p2448_p3, %p41_p9  ;;  %s2815_s14 = int_to_ptr.vmem [resolvable:$true] %s230_s14 }
  0x43   : > { %s2821_s16 = scalar_lea.sflag [#allocation5], %s219_s8 }
  0x44   : > { %p2554_p7 = pneg %p2817_p2 }
  0x47   : > { %s2813_s12 = scalar_lea.hbm %s4737_s0, %s2401_s7  ;;  %s2557_s29 = scalar_lea.hbm %s4737_s0, 2048 }
  0x48   : > { %s2552_s17 = scalar_lea.hbm %s2813_s12, 1024  ;;  %p2558_p12 = scmp.lt.s32.totalorder %s2813_s12, %s4737_s0 }
  0x49   : > { %p2553_p11 = scmp.ne.s32.totalorder %s2813_s12, %s2552_s17  ;;  %p2559_p0 = scmp.lt.s32.totalorder %s2557_s29, %s2552_s17 }
  0x4b   : > { %p2555_p10 = pnand %p2554_p7, %p2553_p11  ;;  %p2560_p3 = por %p2559_p0, %p2558_p12 }
  0x4d   : > { %p2556_p13 = pneg %p2555_p10 }
  0x4f   : > { %p2561_p9 = pnand %p2560_p3, %p2556_p13 }
  0x51   : > { %2564 = shalt.err (!%p2561_p9)
}
  0x52   : > { %s2565_s8 = scalar_lea.vmem %s2815_s14, 1024  ;;  %s2666_s10 = smov [#allocation4]  }
  0x53   : > { %p2566_p1 = scmp.ne.s32.totalorder %s2815_s14, %s2565_s8  ;;  %s2570_s11 = sshll.u32 %s2666_s10, 4  ;;  %s2571_s11 = int_to_ptr.vmem [resolvable:$false] %s2570_s11 }
  0x54   : > { %s2572_s13 = scalar_lea.vmem %s2571_s11, 2048  ;;  %p2573_p10 = scmp.lt.s32.totalorder %s2815_s14, %s2571_s11 }
  0x55   : > { %p2568_p6 = pnand %p2566_p1, %p2554_p7  ;;  %p2574_p5 = scmp.lt.s32.totalorder %s2572_s13, %s2565_s8 }
  0x57   : > { %p2569_p11 = pneg %p2568_p6  ;;  %p2575_p4 = por %p2574_p5, %p2573_p10 }
  0x59   : > { %p2576_p8 = pnand %p2575_p4, %p2569_p11 }
  0x5b   : > { %2579 = shalt.err (!%p2576_p8)
}
  0x5c   : > { %s2667_s17 = smov 128   ;;  %s2668_s23 = smov 8  }
  0x5d   : > { %2439 = dma.hbm_to_vmem [thread:$0]  (!%p2817_p2), %s2813_s12, 1024, %s2815_s14, %s2821_s16, %s2667_s17, %s2667_s17, %s2668_s23  }
  0x5e   : > { %p4739_p1 = scmp.ne.s32.totalorder %s4727_s26, 0 }
  0x60   : > { %242 = sbr.rel (%p4739_p1) target bundleno = 1110 (0x456), region = 40 }
  0x65   : > { %s2845_s28 = sand.u32 1, %s2652_s19   ;;  %p4741_p4 = scmp.ne.s32.totalorder %s4724_s24, 0 }
  0x66   : > { %4740 = sst [smem:[#allocation31_spill]] %s2845_s28  ;;  %s2218_s29 = sshll.u32 %s2845_s28, 6 }
  0x67   : > { %s245_s9 = scalar_lea.sflag [#allocation5], %s2845_s28  ;;  %s2849_s7 = scalar_lea.vmem [#allocation4], %s2218_s29 }
  0x68   : > { %2623 = dma.done.wait (%p4741_p4), %s245_s9, 1024  }
  0x69   : > { %2625 = vsyncadd (%p4741_p4), %s245_s9, 4294966272  ;;  %p4742_p6 = scmp.eq.s32.totalorder %s2729_s22, 0 }
  0x6b   : > { %2627 = dma.done.wait (%p4742_p6), [#allocation7], 64   ;;  %p4743_p8 = pmov %p4742_p6 }
  0x6c   : > { %p4744_p5 = pmov %p4742_p6 }
  0x6d   : > { %2629 = vsyncadd (%p4743_p8), [#allocation7], 4294967232 }
  0x6e   : > { %2631 = dma.done.wait (%p4744_p5), [#allocation8], 16   ;;  %p4745_p2 = pmov %p4744_p5 }
  0x70   : > { %2633 = vsyncadd (%p4745_p2), [#allocation8], 4294967280  ;;  %p4746_p7 = pmov %p4745_p2 }
  0x71   : > { %p4747_p13 = pmov %p4745_p2 }
  0x72   : > { %2635 = dma.done.wait (%p4746_p7), [#allocation12], 128  }
  0x73   : > { %2637 = vsyncadd (%p4747_p13), [#allocation12], 4294967168  ;;  %p4748_p12 = pmov %p4745_p2 }
  0x74   : > { %p4749_p0 = pmov %p4745_p2 }
  0x75   : > { %2639 = dma.done.wait (%p4748_p12), [#allocation14], 16  }
  0x76   : > { %2641 = vsyncadd (%p4749_p0), [#allocation14], 4294967280 }
  0x77   : > { %269 = sfence }
  0x78   : > { %s326_s24 = sld [smem:[#allocation9]]  ;;  %v2878_v0 = vld [vmem:[%s2849_s7] sm:$0xff]  ;;  %v2883_v1 = vld [vmem:[%s2849_s7 + $0x8] sm:$0xff]  ;;  %v2886_v2 = vld [vmem:[%s2849_s7 + $0x10] sm:$0xff]  ;;  %vm292_vm0 = vcmask 162816   ;;  %v2669_v11 = vmov -inf  }
  0x79   : > { %s2871_s26 = sld [smem:[#allocation9 + $0x1]]  ;;  %v2891_v3 = vld [vmem:[%s2849_s7 + $0x18] sm:$0xff]  ;;  %v2894_v4 = vld [vmem:[%s2849_s7 + $0x20] sm:$0xff]  ;;  %v2899_v6 = vld [vmem:[%s2849_s7 + $0x28] sm:$0xff]  ;;  %293 = vst.msk [vmem:[#allocation2] sm:$0xff] %vm292_vm0, %v2669_v11  ;;  %s2670_s0 = smov 2  }
  0x7a   : > { %s2873_s12 = sld [smem:[#allocation9 + $0x2]]  ;;  %v2902_v7 = vld [vmem:[%s2849_s7 + $0x30] sm:$0xff]  ;;  %294 = vst.msk [vmem:[#allocation2 + $0x8] sm:$0xff] %vm292_vm0, %v2669_v11  ;;  %295 = vst.msk [vmem:[#allocation2 + $0x10] sm:$0xff] %vm292_vm0, %v2669_v11  ;;  %v2922_v14 = vld [vmem:[%s2849_s7 + $0x38] sm:$0xff]  ;;  %vm638_vm1 = vcmask 146448  }
  0x7b   : > { %s2875_s14 = sld [smem:[#allocation9 + $0x3]]  ;;  %296 = vst.msk [vmem:[#allocation2 + $0x18] sm:$0xff] %vm292_vm0, %v2669_v11  ;;  %297 = vst.msk [vmem:[#allocation2 + $0x20] sm:$0xff] %vm292_vm0, %v2669_v11  ;;  %vm301_vm2 = vcmask 130048   ;;  %vm304_vm3 = vcmask 125952  }
  0x7c   : > { %s2880_s15 = sld [smem:[#allocation10]]  ;;  %298 = vst.msk [vmem:[#allocation2 + $0x28] sm:$0xff] %vm292_vm0, %v2669_v11  ;;  %299 = vst.msk [vmem:[#allocation2 + $0x30] sm:$0xff] %vm292_vm0, %v2669_v11 }
  0x7d   : > { %s2888_s16 = sld [smem:[#allocation11]]  ;;  %300 = vst.msk [vmem:[#allocation2 + $0x38] sm:$0xff] %vm292_vm0, %v2669_v11 }
  0x7e   : > { %v327_v5 = vstv %s326_s24  ;;  %s2896_s8 = sld [smem:[#allocation11 + $0x80]]  ;;  %302 = vst.msk [vmem:[#allocation3] sm:$0xff] %vm301_vm2, %v2669_v11  ;;  %303 = vst.msk [vmem:[#allocation3 + $0x8] sm:$0xff] %vm301_vm2, %v2669_v11 }
  0x7f   : > { %v328_v8 = vmul.f32 %v327_v5, %v2878_v0  ;;  %v331_v9 = vstv %s2871_s26  ;;  %s2906_s10 = sld [smem:[#allocation11 + $0x100]]  ;;  %v329_v10 = vmul.f32 %v327_v5, %v2883_v1  ;;  %306 = vst.msk [vmem:[#allocation3 + $0x18] sm:$0xff] %vm301_vm2, %v2669_v11  ;;  %307 = vst.msk [vmem:[#allocation3 + $0x20] sm:$0xff] %vm301_vm2, %v2669_v11 }
  0x80   : > { %v332_v12 = vmul.f32 %v2886_v2, %v331_v9  ;;  %v337_v13 = vstv %s2873_s12  ;;  %s2919_s11 = sld [smem:[#allocation11 + $0x180]]  ;;  %v333_v15 = vmul.f32 %v2891_v3, %v331_v9  ;;  %309 = vst.msk [vmem:[#allocation3 + $0x30] sm:$0xff] %vm301_vm2, %v2669_v11  ;;  %310 = vst.msk [vmem:[#allocation3 + $0x38] sm:$0xff] %vm301_vm2, %v2669_v11 }
  0x81   : > { %v338_v16 = vmul.f32 %v2894_v4, %v337_v13  ;;  %v343_v17 = vstv %s2875_s14  ;;  %s2927_s13 = sld [smem:[#allocation11 + $0x200]]  ;;  %v339_v18 = vmul.f32 %v2899_v6, %v337_v13  ;;  %312 = vst.msk [vmem:[#allocation3 + $0x48] sm:$0xff] %vm301_vm2, %v2669_v11  ;;  %313 = vst.msk [vmem:[#allocation3 + $0x50] sm:$0xff] %vm301_vm2, %v2669_v11 }
  0x82   : > { %v334_v19 = vadd.f32 %v332_v12, %v328_v8  ;;  %v344_v20 = vmul.f32 %v2902_v7, %v343_v17  ;;  %s2931_s17 = sld [smem:[#allocation11 + $0x280]]  ;;  %v335_v21 = vadd.f32 %v333_v15, %v329_v10  ;;  %v345_v22 = vmul.f32 %v2922_v14, %v343_v17  ;;  %305 = vst.msk [vmem:[#allocation3 + $0x10] sm:$0xf] %vm304_vm3, %v2669_v11 }
  0x83   : > { %s2933_s23 = sld [smem:[#allocation11 + $0x300]]  ;;  %v349_v25 = vstv %s2880_s15  ;;  %v439_v31 = vstv %s2888_s16  ;;  %308 = vst.msk [vmem:[#allocation3 + $0x28] sm:$0xf] %vm304_vm3, %v2669_v11  ;;  %311 = vst.msk [vmem:[#allocation3 + $0x40] sm:$0xf] %vm304_vm3, %v2669_v11 }
  0x84   : > { %v340_v23 = vadd.f32 %v338_v16, %v334_v19  ;;  %s2936_s29 = sld [smem:[#allocation11 + $0x380]]  ;;  %v341_v24 = vadd.f32 %v339_v18, %v335_v21  ;;  %v463_v32 = vstv %s2896_s8  ;;  %314 = vst.msk [vmem:[#allocation3 + $0x58] sm:$0xf] %vm304_vm3, %v2669_v11 }
  0x85   : > { %s2939_s9 = sld [smem:[#allocation9 + $0x80]]  ;;  %v487_v35 = vstv %s2906_s10 }
  0x86   : > { %v346_v26 = vadd.f32 %v344_v20, %v340_v23  ;;  %v347_v27 = vadd.f32 %v345_v22, %v341_v24  ;;  %s2941_s7 = sld [smem:[#allocation9 + $0x81]]  ;;  %v511_v36 = vstv %s2919_s11 }
  0x87   : > { %s2943_s24 = sld [smem:[#allocation9 + $0x82]]  ;;  %v535_v37 = vstv %s2927_s13 }
  0x88   : > { %v350_v28 = vadd.f32 %v349_v25, %v346_v26  ;;  %v351_v29 = vadd.f32 %v349_v25, %v347_v27  ;;  %s2945_s26 = sld [smem:[#allocation9 + $0x83]]  ;;  %v559_v38 = vstv %s2931_s17 }
  0x89   : > { %s2947_s12 = sld [smem:[#allocation10 + $0x1]]  ;;  %v583_v39 = vstv %s2933_s23 }
  0x8a   : > { %v352_v30 = vmax.f32 %v350_v28, 0.0  ;;  %s2949_s14 = sld [smem:[#allocation11 + $0x1]]  ;;  %v2956_v33 = vmax.f32 %v351_v29, 0.0  ;;  %v607_v40 = vstv %s2936_s29 }
  0x8b   : > { %s2951_s15 = sld [smem:[#allocation11 + $0x81]]  ;;  %v355_v34 = vstv %s2939_s9 }
  0x8c   : > { %632 = vrot.lane.b32.xlu0 %v352_v30, %s2670_s0  ;;  %s2958_s1 = sld [smem:[#allocation11 + $0x101]]  ;;  %v2971_v41 = vmul.f32 %v439_v31, %v352_v30  ;;  %v2973_v42 = vmul.f32 %v463_v32, %v352_v30  ;;  %v356_v43 = vmul.f32 %v355_v34, %v2878_v0  ;;  %v359_v44 = vstv %s2941_s7 }
  0x8d   : > { %s2961_s2 = sld [smem:[#allocation11 + $0x181]]  ;;  %v365_v45 = vstv %s2943_s24  ;;  %v2985_v47 = vmul.f32 %v487_v35, %v352_v30  ;;  %v2987_v48 = vmul.f32 %v511_v36, %v352_v30  ;;  %v360_v49 = vmul.f32 %v2886_v2, %v359_v44 }
  0x8e   : > { %s2967_s3 = sld [smem:[#allocation11 + $0x201]]  ;;  %v371_v46 = vstv %s2945_s26  ;;  %v366_v50 = vmul.f32 %v2894_v4, %v365_v45  ;;  %v2993_v51 = vmul.f32 %v535_v37, %v352_v30  ;;  %v2995_v52 = vmul.f32 %v559_v38, %v352_v30 }
  0x8f   : > { %s2975_s16 = sld [smem:[#allocation11 + $0x281]]  ;;  %v2997_v53 = vmul.f32 %v583_v39, %v352_v30  ;;  %v357_v54 = vmul.f32 %v355_v34, %v2883_v1  ;;  %v362_v55 = vadd.f32 %v360_v49, %v356_v43  ;;  %v372_v56 = vmul.f32 %v2902_v7, %v371_v46 }
  0x90   : > { %634 = vrot.lane.b32.xlu0 %v2956_v33, %s2670_s0  ;;  %s2983_s8 = sld [smem:[#allocation11 + $0x301]]  ;;  %v361_v57 = vmul.f32 %v2891_v3, %v359_v44  ;;  %v367_v58 = vmul.f32 %v2899_v6, %v365_v45  ;;  %v3009_v59 = vmul.f32 %v607_v40, %v352_v30  ;;  %v3012_v60 = vmul.f32 %v439_v31, %v2956_v33 }
  0x91   : > { %s2991_s10 = sld [smem:[#allocation11 + $0x381]]  ;;  %v3015_v61 = vmul.f32 %v463_v32, %v2956_v33  ;;  %v3018_v62 = vmul.f32 %v487_v35, %v2956_v33  ;;  %v3023_v63 = vmul.f32 %v511_v36, %v2956_v33  ;;  %v368_v5 = vadd.f32 %v366_v50, %v362_v55 }
  0x92   : > { %s3000_s11 = sld [smem:[#allocation9 + $0x100]]  ;;  %v363_v8 = vadd.f32 %v361_v57, %v357_v54  ;;  %v373_v9 = vmul.f32 %v2922_v14, %v371_v46  ;;  %v3029_v10 = vmul.f32 %v535_v37, %v2956_v33  ;;  %v3032_v12 = vmul.f32 %v559_v38, %v2956_v33 }
  0x93   : > { %s3005_s13 = sld [smem:[#allocation9 + $0x101]]  ;;  %v3035_v13 = vmul.f32 %v583_v39, %v2956_v33  ;;  %v377_v15 = vstv %s2947_s12  ;;  %v374_v16 = vadd.f32 %v372_v56, %v368_v5  ;;  %v445_v17 = vstv %s2949_s14 }
  0x94   : > { %s3020_s17 = sld [smem:[#allocation9 + $0x102]]  ;;  %v469_v18 = vstv %s2951_s15  ;;  %v369_v19 = vadd.f32 %v367_v58, %v363_v8  ;;  %v493_v20 = vstv %s2958_s1  ;;  %v517_v21 = vstv %s2961_s2 }
  0x95   : > { %s3026_s23 = sld [smem:[#allocation9 + $0x103]]  ;;  %v541_v22 = vstv %s2967_s3  ;;  %v378_v24 = vadd.f32 %v377_v15, %v374_v16  ;;  %v565_v28 = vstv %s2975_s16 }
  0x96   : > { %s3040_s9 = sld [smem:[#allocation10 + $0x2]]  ;;  %v375_v25 = vadd.f32 %v373_v9, %v369_v19  ;;  %v589_v29 = vstv %s2983_s8 }
  0x97   : > { %s3046_s7 = sld [smem:[#allocation11 + $0x2]]  ;;  %v380_v32 = vmax.f32 %v378_v24, 0.0  ;;  %v613_v34 = vstv %s2991_s10 }
  0x98   : > { %v383_v23 = vstv %s3000_s11  ;;  %s3050_s24 = sld [smem:[#allocation11 + $0x82]]  ;;  %v379_v37 = vadd.f32 %v377_v15, %v375_v25 }
  0x99   : > { %v384_v26 = vmul.f32 %v383_v23, %v2878_v0  ;;  %v387_v27 = vstv %s3005_s13  ;;  %s3056_s1 = sld [smem:[#allocation11 + $0x102]]  ;;  %v385_v35 = vmul.f32 %v383_v23, %v2883_v1  ;;  %643 = vrot.lane.b32.xlu1 %v380_v32, %s2670_s0  ;;  %v446_v44 = vmul.f32 %v445_v17, %v380_v32 }
  0x9a   : > { %v388_v30 = vmul.f32 %v2886_v2, %v387_v27  ;;  %v393_v31 = vstv %s3020_s17  ;;  %s3059_s2 = sld [smem:[#allocation11 + $0x182]]  ;;  %v389_v36 = vmul.f32 %v2891_v3, %v387_v27  ;;  %v470_v45 = vmul.f32 %v469_v18, %v380_v32 }
  0x9b   : > { %v394_v39 = vmul.f32 %v2894_v4, %v393_v31  ;;  %v399_v43 = vstv %s3026_s23  ;;  %s3067_s3 = sld [smem:[#allocation11 + $0x202]]  ;;  %v494_v46 = vmul.f32 %v493_v20, %v380_v32  ;;  %v518_v49 = vmul.f32 %v517_v21, %v380_v32 }
  0x9c   : > { %v390_v38 = vadd.f32 %v388_v30, %v384_v26  ;;  %s3070_s26 = sld [smem:[#allocation11 + $0x282]]  ;;  %v542_v50 = vmul.f32 %v541_v22, %v380_v32  ;;  %v566_v54 = vmul.f32 %v565_v28, %v380_v32  ;;  %v590_v55 = vmul.f32 %v589_v29, %v380_v32 }
  0x9d   : > { %v614_v56 = vmul.f32 %v613_v34, %v380_v32  ;;  %s3072_s12 = sld [smem:[#allocation11 + $0x302]]  ;;  %v3075_v57 = vadd.f32 %v446_v44, %v2971_v41  ;;  %v3078_v58 = vadd.f32 %v470_v45, %v2973_v42  ;;  %v3081_v5 = vadd.f32 %v494_v46, %v2985_v47 }
  0x9e   : > { %v3084_v8 = vadd.f32 %v518_v49, %v2987_v48  ;;  %s3086_s14 = sld [smem:[#allocation9 + $0x180]]  ;;  %v3089_v9 = vadd.f32 %v542_v50, %v2993_v51  ;;  %v3092_v15 = vadd.f32 %v566_v54, %v2995_v52  ;;  %v3095_v41 = vadd.f32 %v590_v55, %v2997_v53 }
  0x9f   : > { %v3098_v42 = vadd.f32 %v614_v56, %v3009_v59  ;;  %s3100_s15 = sld [smem:[#allocation9 + $0x181]]  ;;  %v609_v47 = vmul.f32 %v607_v40, %v2956_v33  ;;  %v381_v48 = vmax.f32 %v379_v37, 0.0  ;;  %v400_v16 = vmul.f32 %v2902_v7, %v399_v43 }
  0xa0   : > { %v405_v19 = vstv %s3040_s9  ;;  %s3107_s16 = sld [smem:[#allocation9 + $0x182]]  ;;  %v396_v51 = vadd.f32 %v394_v39, %v390_v38  ;;  %v451_v52 = vstv %s3046_s7  ;;  %v475_v23 = vstv %s3050_s24  ;;  %s4672_s9 = smov 127  }
  0xa1   : > { %v391_v24 = vadd.f32 %v389_v36, %v385_v35  ;;  %s3111_s8 = sld [smem:[#allocation9 + $0x183]]  ;;  %v447_v53 = vmul.f32 %v445_v17, %v381_v48  ;;  %v471_v59 = vmul.f32 %v469_v18, %v381_v48  ;;  %v495_v25 = vmul.f32 %v493_v20, %v381_v48  ;;  %645 = vrot.lane.b32.xlu1 %v381_v48, %s2670_s0  ;;  %s4670_s7 = smov 126  }
  0xa2   : > { %v519_v26 = vmul.f32 %v517_v21, %v381_v48  ;;  %s3114_s29 = sld [smem:[#allocation11 + $0x382]]  ;;  %v543_v33 = vmul.f32 %v541_v22, %v381_v48  ;;  %v567_v40 = vmul.f32 %v565_v28, %v381_v48  ;;  %v591_v27 = vmul.f32 %v589_v29, %v381_v48  ;;  %s4668_s24 = smov 125  }
  0xa3   : > { %v615_v30 = vmul.f32 %v613_v34, %v381_v48  ;;  %v3117_v32 = vadd.f32 %v447_v53, %v3012_v60  ;;  %v3120_v17 = vadd.f32 %v471_v59, %v3015_v61  ;;  %v3123_v18 = vadd.f32 %v495_v25, %v3018_v62  ;;  %s3158_s10 = sld [smem:[#allocation10 + $0x3]] }
  0xa4   : > { %v3126_v20 = vadd.f32 %v519_v26, %v3023_v63  ;;  %v3129_v21 = vadd.f32 %v543_v33, %v3029_v10  ;;  %v3132_v22 = vadd.f32 %v567_v40, %v3032_v12  ;;  %v3135_v60 = vadd.f32 %v591_v27, %v3035_v13  ;;  %s3161_s11 = sld [smem:[#allocation11 + $0x3]] }
  0xa5   : > { %v3137_v61 = vadd.f32 %v615_v30, %v609_v47  ;;  %v402_v62 = vadd.f32 %v400_v16, %v396_v51  ;;  %v499_v28 = vstv %s3056_s1  ;;  %v523_v63 = vstv %s3059_s2  ;;  %s3170_s13 = sld [smem:[#allocation11 + $0x83]] }
  0xa6   : > { %v395_v10 = vmul.f32 %v2899_v6, %v393_v31  ;;  %v401_v29 = vmul.f32 %v2922_v14, %v399_v43  ;;  %v411_v34 = vstv %s3086_s14  ;;  %v415_v12 = vstv %s3100_s15  ;;  %s3172_s17 = sld [smem:[#allocation11 + $0x103]] }
  0xa7   : > { %v421_v35 = vstv %s3107_s16  ;;  %v406_v36 = vadd.f32 %v405_v19, %v402_v62  ;;  %v412_v37 = vmul.f32 %v411_v34, %v2878_v0  ;;  %v416_v38 = vmul.f32 %v2886_v2, %v415_v12  ;;  %s3178_s23 = sld [smem:[#allocation11 + $0x183]] }
  0xa8   : > { %v397_v13 = vadd.f32 %v395_v10, %v391_v24  ;;  %v547_v39 = vstv %s3067_s3  ;;  %v571_v44 = vstv %s3070_s26  ;;  %v595_v45 = vstv %s3072_s12  ;;  %s3184_s1 = sld [smem:[#allocation11 + $0x203]]  ;;  %s4666_s12 = smov 124  }
  0xa9   : > { %v427_v46 = vstv %s3111_s8  ;;  %v408_v49 = vmax.f32 %v406_v36, 0.0  ;;  %v619_v31 = vstv %s3114_s29  ;;  %v422_v43 = vmul.f32 %v2894_v4, %v421_v35  ;;  %s3188_s2 = sld [smem:[#allocation11 + $0x283]] }
  0xaa   : > { %v403_v50 = vadd.f32 %v401_v29, %v397_v13  ;;  %v418_v54 = vadd.f32 %v416_v38, %v412_v37  ;;  %v428_v55 = vmul.f32 %v2902_v7, %v427_v46  ;;  %v413_v0 = vmul.f32 %v411_v34, %v2883_v1  ;;  %s3190_s3 = sld [smem:[#allocation11 + $0x303]] }
  0xab   : > { %v417_v2 = vmul.f32 %v2891_v3, %v415_v12  ;;  %v452_v56 = vmul.f32 %v451_v52, %v408_v49  ;;  %v476_v47 = vmul.f32 %v475_v23, %v408_v49  ;;  %v500_v48 = vmul.f32 %v499_v28, %v408_v49  ;;  %654 = vrot.lane.b32.xlu0 %v408_v49, %s2670_s0  ;;  %s3193_s26 = sld [smem:[#allocation11 + $0x383]] }
  0xac   : > { %v524_v16 = vmul.f32 %v523_v63, %v408_v49  ;;  %v548_v4 = vmul.f32 %v547_v39, %v408_v49  ;;  %v572_v51 = vmul.f32 %v571_v44, %v408_v49  ;;  %v596_v7 = vmul.f32 %v595_v45, %v408_v49  ;;  %s3367_s14 = sld [smem:[#allocation11 + $0x4]] }
  0xad   : > { %v620_v24 = vmul.f32 %v619_v31, %v408_v49  ;;  %v454_v1 = vadd.f32 %v452_v56, %v3075_v57  ;;  %v478_v3 = vadd.f32 %v476_v47, %v3078_v58  ;;  %v502_v53 = vadd.f32 %v500_v48, %v3081_v5  ;;  %s3369_s15 = sld [smem:[#allocation11 + $0x84]] }
  0xae   : > { %v526_v59 = vadd.f32 %v524_v16, %v3084_v8  ;;  %v550_v25 = vadd.f32 %v548_v4, %v3089_v9  ;;  %v574_v26 = vadd.f32 %v572_v51, %v3092_v15  ;;  %v598_v33 = vadd.f32 %v596_v7, %v3095_v41  ;;  %s3371_s16 = sld [smem:[#allocation11 + $0x104]] }
  0xaf   : > { %v622_v40 = vadd.f32 %v620_v24, %v3098_v42  ;;  %v407_v57 = vadd.f32 %v405_v19, %v403_v50  ;;  %v424_v58 = vadd.f32 %v422_v43, %v418_v54  ;;  %v433_v8 = vstv %s3158_s10  ;;  %s3373_s8 = sld [smem:[#allocation11 + $0x184]] }
  0xb0   : > { %v419_v15 = vadd.f32 %v417_v2, %v413_v0  ;;  %v423_v27 = vmul.f32 %v2899_v6, %v421_v35  ;;  %v429_v41 = vmul.f32 %v2922_v14, %v427_v46  ;;  %v457_v37 = vstv %s3161_s11  ;;  %s3377_s29 = sld [smem:[#allocation11 + $0x204]] }
  0xb1   : > { %v409_v5 = vmax.f32 %v407_v57, 0.0  ;;  %v430_v9 = vadd.f32 %v428_v55, %v424_v58  ;;  %v481_v38 = vstv %s3170_s13  ;;  %v601_v46 = vstv %s3190_s3  ;;  %s3383_s10 = sld [smem:[#allocation11 + $0x284]] }
  0xb2   : > { %v625_v49 = vstv %s3193_s26  ;;  %s3385_s11 = sld [smem:[#allocation11 + $0x304]] }
  0xb3   : > { %v453_v42 = vmul.f32 %v451_v52, %v409_v5  ;;  %v477_v30 = vmul.f32 %v475_v23, %v409_v5  ;;  %v501_v19 = vmul.f32 %v499_v28, %v409_v5  ;;  %v525_v62 = vmul.f32 %v523_v63, %v409_v5  ;;  %656 = vrot.lane.b32.xlu1 %v409_v5, %s2670_s0  ;;  %s3387_s13 = sld [smem:[#allocation11 + $0x384]] }
  0xb4   : > { %v549_v10 = vmul.f32 %v547_v39, %v409_v5  ;;  %v573_v29 = vmul.f32 %v571_v44, %v409_v5  ;;  %v597_v34 = vmul.f32 %v595_v45, %v409_v5  ;;  %v621_v12 = vmul.f32 %v619_v31, %v409_v5  ;;  %s3444_s3 = sld [smem:[#allocation11 + $0x205]] }
  0xb5   : > { %v455_v6 = vadd.f32 %v453_v42, %v3117_v32  ;;  %v479_v14 = vadd.f32 %v477_v30, %v3120_v17  ;;  %v503_v52 = vadd.f32 %v501_v19, %v3123_v18  ;;  %v527_v23 = vadd.f32 %v525_v62, %v3126_v20  ;;  %s3448_s26 = sld [smem:[#allocation11 + $0x285]] }
  0xb6   : > { %v551_v28 = vadd.f32 %v549_v10, %v3129_v21  ;;  %v575_v63 = vadd.f32 %v573_v29, %v3132_v22  ;;  %v599_v35 = vadd.f32 %v597_v34, %v3135_v60  ;;  %v623_v36 = vadd.f32 %v621_v12, %v3137_v61  ;;  %s4212_s4 = sld [smem:[#allocation11 + $0x18e]] }
  0xb7   : > { %v434_v13 = vadd.f32 %v433_v8, %v430_v9  ;;  %v425_v32 = vadd.f32 %v423_v27, %v419_v15  ;;  %v505_v39 = vstv %s3172_s17  ;;  %v529_v17 = vstv %s3178_s23  ;;  %s3411_s17 = sld [smem:[#allocation11 + $0x5]] }
  0xb8   : > { %v553_v44 = vstv %s3184_s1  ;;  %v577_v18 = vstv %s3188_s2  ;;  %s3425_s23 = sld [smem:[#allocation11 + $0x85]] }
  0xb9   : > { %v436_v45 = vmax.f32 %v434_v13, 0.0  ;;  %v431_v20 = vadd.f32 %v429_v41, %v425_v32  ;;  %s3436_s1 = sld [smem:[#allocation11 + $0x105]] }
  0xba   : > { %s3441_s2 = sld [smem:[#allocation11 + $0x185]] }
  0xbb   : > { %v458_v31 = vmul.f32 %v457_v37, %v436_v45  ;;  %v482_v21 = vmul.f32 %v481_v38, %v436_v45  ;;  %v506_v50 = vmul.f32 %v505_v39, %v436_v45  ;;  %v530_v22 = vmul.f32 %v529_v17, %v436_v45  ;;  %665 = vrot.lane.b32.xlu0 %v436_v45, %s2670_s0  ;;  %s4214_s6 = sld [smem:[#allocation11 + $0x20e]] }
  0xbc   : > { %v554_v60 = vmul.f32 %v553_v44, %v436_v45  ;;  %v578_v61 = vmul.f32 %v577_v18, %v436_v45  ;;  %v602_v43 = vmul.f32 %v601_v46, %v436_v45  ;;  %v626_v54 = vmul.f32 %v625_v49, %v436_v45  ;;  %s4216_s20 = sld [smem:[#allocation11 + $0x28e]] }
  0xbd   : > { %v3219_v55 = vadd.f32 %v458_v31, %v454_v1  ;;  %v3221_v0 = vadd.f32 %v482_v21, %v478_v3  ;;  %v3223_v2 = vadd.f32 %v506_v50, %v502_v53  ;;  %v3225_v56 = vadd.f32 %v530_v22, %v526_v59  ;;  %s4219_s19 = sld [smem:[#allocation11 + $0x30e]] }
  0xbe   : > { %v3227_v47 = vadd.f32 %v554_v60, %v550_v25  ;;  %v3229_v48 = vadd.f32 %v578_v61, %v574_v26  ;;  %v3231_v16 = vadd.f32 %v602_v43, %v598_v33  ;;  %v3233_v4 = vadd.f32 %v626_v54, %v622_v40  ;;  %s4223_s27 = sld [smem:[#allocation11 + $0x38e]] }
  0xbf   : > { %v435_v51 = vadd.f32 %v433_v8, %v431_v20  ;;  %s4226_s21 = sld [smem:[#allocation11 + $0xf]] }
  0xc0   : > { %s4228_s25 = sld [smem:[#allocation11 + $0x8f]] }
  0xc1   : > { %v437_v7 = vmax.f32 %v435_v51, 0.0  ;;  %s4230_s18 = sld [smem:[#allocation11 + $0x10f]] }
  0xc2   : > { %s4232_s5 = sld [smem:[#allocation11 + $0x18f]] }
  0xc3   : > { %v459_v24 = vmul.f32 %v457_v37, %v437_v7  ;;  %v483_v57 = vmul.f32 %v481_v38, %v437_v7  ;;  %v507_v1 = vmul.f32 %v505_v39, %v437_v7  ;;  %v531_v58 = vmul.f32 %v529_v17, %v437_v7  ;;  %667 = vrot.lane.b32.xlu1 %v437_v7, %s2670_s0  ;;  %s4234_s30 = sld [smem:[#allocation11 + $0x20f]] }
  0xc4   : > { %v555_v3 = vmul.f32 %v553_v44, %v437_v7  ;;  %v579_v53 = vmul.f32 %v577_v18, %v437_v7  ;;  %v603_v59 = vmul.f32 %v601_v46, %v437_v7  ;;  %v627_v5 = vmul.f32 %v625_v49, %v437_v7  ;;  %4763 = sst [smem:[#allocation41_spill]] %s4223_s27 }
  0xc5   : > { %v3236_v25 = vadd.f32 %v459_v24, %v455_v6  ;;  %v3238_v26 = vadd.f32 %v483_v57, %v479_v14  ;;  %v3240_v33 = vadd.f32 %v507_v1, %v503_v52  ;;  %v3242_v40 = vadd.f32 %v531_v58, %v527_v23  ;;  %s4238_s22 = sld [smem:[#allocation11 + $0x28f]] }
  0xc6   : > { %v3244_v8 = vadd.f32 %v555_v3, %v551_v28  ;;  %v3246_v9 = vadd.f32 %v579_v53, %v575_v63  ;;  %v3248_v15 = vadd.f32 %v603_v59, %v599_v35  ;;  %v3250_v27 = vadd.f32 %v627_v5, %v623_v36  ;;  %s4241_s28 = sld [smem:[#allocation11 + $0x30f]] }
  0xc8   : > { %4764 = sst [smem:[#allocation42_spill]] %s4232_s5 }
  0xc9   : > { %s4245_s5 = sld [smem:[#allocation11 + $0x38f]] }
  0xcb   : > { %4765 = sst [smem:[#allocation43_spill]] %s4238_s22 }
  0xcc   : > { %4766 = sst [smem:[#allocation44_spill]] %s4241_s28 }
  0xcd   : > { %s4249_s22 = sld [smem:[#allocation13]] }
  0xce   : > { %s4256_s28 = sld [smem:[#allocation13 + $0x1]] }
  0xcf   : > { %4767 = sst [smem:[#allocation45_spill]] %s4245_s5 }
  0xd0   : > { %s4261_s5 = sld [smem:[#allocation13 + $0x2]] }
  0xfe   : > { %v633_v41 = vpop.permute.xlu0 %632 }
  0xff   : > { %639 = vst.msk [vmem:[#allocation2] sm:$0xff] %vm638_vm1, %v633_v41 }
 0x102   : > { %v635_v42 = vpop.permute.xlu0 %634 }
 0x103   : > { %640 = vst.msk [vmem:[#allocation2 + $0x8] sm:$0xff] %vm638_vm1, %v635_v42 }
 0x106   : > { %v3254_v30 = vld [vmem:[#allocation2] sm:$0xff] }
 0x107   : > { %678 = vrot.lane.b32.xlu0 %v3254_v30, %s4672_s9 }
 0x10a   : > { %v3258_v19 = vld [vmem:[#allocation2 + $0x8] sm:$0xff] }
 0x10b   : > { %680 = vrot.lane.b32.xlu1 %v3258_v19, %s4672_s9  ;;  %686 = vrot.lane.b32.xlu0 %v3254_v30, %s4670_s7  ;;  %v644_v62 = vpop.permute.xlu1 %643 }
 0x10c   : > { %650 = vst.msk [vmem:[#allocation2 + $0x10] sm:$0xff] %vm638_vm1, %v644_v62 }
 0x10f   : > { %688 = vrot.lane.b32.xlu1 %v3258_v19, %s4670_s7 }
 0x113   : > { %v646_v10 = vpop.permute.xlu1 %645  ;;  %v3268_v29 = vld [vmem:[#allocation2 + $0x10] sm:$0xff] }
 0x114   : > { %651 = vst.msk [vmem:[#allocation2 + $0x18] sm:$0xff] %vm638_vm1, %v646_v10  ;;  %716 = vrot.lane.b32.xlu0 %v3268_v29, %s4672_s9 }
 0x118   : > { %694 = vrot.lane.b32.xlu0 %v3254_v30, %s4668_s24 }
 0x11b   : > { %v3274_v34 = vld [vmem:[#allocation2 + $0x18] sm:$0xff] }
 0x11c   : > { %718 = vrot.lane.b32.xlu1 %v3274_v34, %s4672_s9  ;;  %724 = vrot.lane.b32.xlu0 %v3268_v29, %s4670_s7 }
 0x11d   : > { %v655_v12 = vpop.permute.xlu0 %654 }
 0x11e   : > { %661 = vst.msk [vmem:[#allocation2 + $0x20] sm:$0xff] %vm638_vm1, %v655_v12 }
 0x120   : > { %696 = vrot.lane.b32.xlu1 %v3258_v19, %s4668_s24 }
 0x124   : > { %726 = vrot.lane.b32.xlu1 %v3274_v34, %s4670_s7 }
 0x125   : > { %v657_v6 = vpop.permute.xlu1 %656  ;;  %v3301_v14 = vld [vmem:[#allocation2 + $0x20] sm:$0xff] }
 0x126   : > { %662 = vst.msk [vmem:[#allocation2 + $0x28] sm:$0xff] %vm638_vm1, %v657_v6  ;;  %755 = vrot.lane.b32.xlu0 %v3301_v14, %s4672_s9 }
 0x12a   : > { %702 = vrot.lane.b32.xlu0 %v3254_v30, %s4666_s12 }
 0x12d   : > { %v3312_v52 = vld [vmem:[#allocation2 + $0x28] sm:$0xff]  ;;  %v666_v23 = vpop.permute.xlu0 %665 }
 0x12e   : > { %757 = vrot.lane.b32.xlu1 %v3312_v52, %s4672_s9  ;;  %672 = vst.msk [vmem:[#allocation2 + $0x30] sm:$0xff] %vm638_vm1, %v666_v23  ;;  %732 = vrot.lane.b32.xlu0 %v3268_v29, %s4668_s24 }
 0x132   : > { %704 = vrot.lane.b32.xlu1 %v3258_v19, %s4666_s12  ;;  %763 = vrot.lane.b32.xlu0 %v3301_v14, %s4670_s7 }
 0x135   : > { %v668_v11 = vpop.permute.xlu1 %667  ;;  %v3323_v28 = vld [vmem:[#allocation2 + $0x30] sm:$0xff] }
 0x136   : > { %673 = vst.msk [vmem:[#allocation2 + $0x38] sm:$0xff] %vm638_vm1, %v668_v11  ;;  %734 = vrot.lane.b32.xlu1 %v3274_v34, %s4668_s24  ;;  %794 = vrot.lane.b32.xlu0 %v3323_v28, %s4672_s9  ;;  %v902_v11 = vstv %s3367_s14  ;;  %s3451_s14 = sld [smem:[#allocation11 + $0x305]] }
 0x13a   : > { %765 = vrot.lane.b32.xlu1 %v3312_v52, %s4670_s7  ;;  %740 = vrot.lane.b32.xlu0 %v3268_v29, %s4666_s12 }
 0x13d   : > { %v3334_v63 = vld [vmem:[#allocation2 + $0x38] sm:$0xff] }
 0x13e   : > { %796 = vrot.lane.b32.xlu1 %v3334_v63, %s4672_s9  ;;  %771 = vrot.lane.b32.xlu0 %v3301_v14, %s4668_s24  ;;  %s3571_s9 = sld [smem:[#allocation11 + $0x187]] }
 0x142   : > { %742 = vrot.lane.b32.xlu1 %v3274_v34, %s4666_s12  ;;  %802 = vrot.lane.b32.xlu0 %v3323_v28, %s4670_s7 }
 0x146   : > { %773 = vrot.lane.b32.xlu1 %v3312_v52, %s4668_s24  ;;  %779 = vrot.lane.b32.xlu0 %v3301_v14, %s4666_s12 }
 0x14a   : > { %804 = vrot.lane.b32.xlu1 %v3334_v63, %s4670_s7  ;;  %810 = vrot.lane.b32.xlu0 %v3323_v28, %s4668_s24  ;;  %s3563_s7 = sld [smem:[#allocation11 + $0x107]] }
 0x14e   : > { %781 = vrot.lane.b32.xlu1 %v3312_v52, %s4666_s12  ;;  %818 = vrot.lane.b32.xlu0 %v3323_v28, %s4666_s12 }
 0x152   : > { %812 = vrot.lane.b32.xlu1 %v3334_v63, %s4668_s24  ;;  %s3550_s24 = sld [smem:[#allocation11 + $0x87]] }
 0x156   : > { %820 = vrot.lane.b32.xlu1 %v3334_v63, %s4666_s12  ;;  %s3536_s12 = sld [smem:[#allocation11 + $0x7]] }
 0x179   : > { %v679_v35 = vpop.permute.xlu0 %678 }
 0x17a   : > { %v684_v45 = vmax.f32 %v3254_v30, %v679_v35  ;;  %v926_v35 = vstv %s3369_s15  ;;  %s3465_s15 = sld [smem:[#allocation11 + $0x385]] }
 0x17d   : > { %v681_v36 = vpop.permute.xlu1 %680  ;;  %v687_v13 = vpop.permute.xlu0 %686 }
 0x17e   : > { %v692_v46 = vmax.f32 %v684_v45, %v687_v13  ;;  %v685_v50 = vmax.f32 %v3258_v19, %v681_v36 }
 0x181   : > { %v689_v37 = vpop.permute.xlu1 %688 }
 0x182   : > { %v693_v61 = vmax.f32 %v685_v50, %v689_v37 }
 0x186   : > { %v717_v32 = vpop.permute.xlu0 %716 }
 0x187   : > { %v722_v1 = vmax.f32 %v3268_v29, %v717_v32  ;;  %v950_v32 = vstv %s3371_s16  ;;  %s3479_s16 = sld [smem:[#allocation11 + $0x6]] }
 0x18a   : > { %v695_v38 = vpop.permute.xlu0 %694 }
 0x18b   : > { %v700_v20 = vmax.f32 %v692_v46, %v695_v38  ;;  %v974_v38 = vstv %s3373_s8  ;;  %s3481_s8 = sld [smem:[#allocation11 + $0x86]] }
 0x18e   : > { %v719_v39 = vpop.permute.xlu1 %718  ;;  %v725_v17 = vpop.permute.xlu0 %724 }
 0x18f   : > { %v730_v59 = vmax.f32 %v722_v1, %v725_v17  ;;  %v723_v12 = vmax.f32 %v3274_v34, %v719_v39  ;;  %v998_v17 = vstv %s3377_s29  ;;  %s3483_s29 = sld [smem:[#allocation11 + $0x106]] }
 0x192   : > { %v697_v44 = vpop.permute.xlu1 %696 }
 0x193   : > { %v701_v43 = vmax.f32 %v693_v61, %v697_v44  ;;  %v1070_v61 = vstv %s3387_s13  ;;  %s3499_s13 = sld [smem:[#allocation11 + $0x286]] }
 0x196   : > { %v727_v49 = vpop.permute.xlu1 %726 }
 0x197   : > { %v731_v45 = vmax.f32 %v723_v12, %v727_v49 }
 0x198   : > { %v3361_v18 = vpop.permute.xlu0 %755 }
 0x199   : > { %v761_v34 = vmax.f32 %v3301_v14, %v3361_v18 }
 0x19c   : > { %v703_v31 = vpop.permute.xlu0 %702 }
 0x19d   : > { %v708_v21 = vmax.f32 %v700_v20, %v703_v31  ;;  %v1022_v20 = vstv %s3383_s10  ;;  %s3489_s10 = sld [smem:[#allocation11 + $0x186]] }
 0x19f   : > { %710 = vst.msk [vmem:[#allocation3 + $0x2] sm:$0xff] %vm301_vm2, %v708_v21 }
 0x1a0   : > { %v3365_v22 = vpop.permute.xlu1 %757  ;;  %v733_v60 = vpop.permute.xlu0 %732 }
 0x1a1   : > { %v738_v41 = vmax.f32 %v730_v59, %v733_v60  ;;  %v762_v31 = vmax.f32 %v3312_v52, %v3365_v22  ;;  %v1046_v60 = vstv %s3385_s11  ;;  %s3496_s11 = sld [smem:[#allocation11 + $0x206]] }
 0x1a4   : > { %v705_v54 = vpop.permute.xlu1 %704  ;;  %v764_v51 = vpop.permute.xlu0 %763 }
 0x1a5   : > { %v709_v7 = vmax.f32 %v701_v43, %v705_v54  ;;  %v769_v54 = vmax.f32 %v761_v34, %v764_v51 }
 0x1a6   : > { %v829_v24 = vld [vmem:[#allocation3] sm:$0xff] }
 0x1a7   : > { %v831_v57 = vld [vmem:[#allocation3 + $0x1] sm:$0xff]  ;;  %711 = vst.msk [vmem:[#allocation3 + $0xa] sm:$0xff] %vm301_vm2, %v709_v7 }
 0x1a8   : > { %v833_v58 = vmax.f32 %v829_v24, %v831_v57  ;;  %v3379_v3 = vpop.permute.xlu1 %734  ;;  %v3381_v53 = vpop.permute.xlu0 %794  ;;  %v835_v5 = vld [vmem:[#allocation3 + $0x2] sm:$0xff] }
 0x1a9   : > { %v739_v43 = vmax.f32 %v731_v45, %v3379_v3  ;;  %v800_v7 = vmax.f32 %v3323_v28, %v3381_v53 }
 0x1aa   : > { %v837_v42 = vmax.f32 %v833_v58, %v835_v5 }
 0x1ac   : > { %v3389_v30 = vpop.permute.xlu1 %765  ;;  %v741_v19 = vpop.permute.xlu0 %740 }
 0x1ad   : > { %v746_v62 = vmax.f32 %v738_v41, %v741_v19 }
 0x1ae   : > { %v830_v10 = vld [vmem:[#allocation3 + $0x8] sm:$0xff] }
 0x1af   : > { %v832_v29 = vld [vmem:[#allocation3 + $0x9] sm:$0xff]  ;;  %749 = vst.msk [vmem:[#allocation3 + $0x1a] sm:$0xff] %vm301_vm2, %v746_v62 }
 0x1b0   : > { %v834_v6 = vmax.f32 %v830_v10, %v832_v29  ;;  %v839_v23 = vld [vmem:[#allocation3 + $0x3] sm:$0xff]  ;;  %v3395_v13 = vpop.permute.xlu1 %796  ;;  %v772_v44 = vpop.permute.xlu0 %771  ;;  %v840_v21 = vld [vmem:[#allocation3 + $0xb] sm:$0xff] }
 0x1b1   : > { %v836_v36 = vld [vmem:[#allocation3 + $0xa] sm:$0xff]  ;;  %v841_v37 = vmax.f32 %v837_v42, %v839_v23 }
 0x1b2   : > { %v838_v39 = vmax.f32 %v834_v6, %v836_v36  ;;  %v843_v46 = vld [vmem:[#allocation3 + $0x4] sm:$0xff]  ;;  %v844_v19 = vld [vmem:[#allocation3 + $0xc] sm:$0xff] }
 0x1b3   : > { %v845_v50 = vmax.f32 %v841_v37, %v843_v46 }
 0x1b4   : > { %v842_v49 = vmax.f32 %v838_v39, %v840_v21  ;;  %v743_v1 = vpop.permute.xlu1 %742  ;;  %v803_v58 = vpop.permute.xlu0 %802 }
 0x1b5   : > { %1095 = vrot.lane.b32.xlu0 %v845_v50, %s2670_s0  ;;  %v903_v14 = vmul.f32 %v902_v11, %v845_v50  ;;  %v927_v18 = vmul.f32 %v926_v35, %v845_v50  ;;  %v951_v24 = vmul.f32 %v950_v32, %v845_v50  ;;  %v975_v57 = vmul.f32 %v974_v38, %v845_v50 }
 0x1b6   : > { %v999_v52 = vmul.f32 %v998_v17, %v845_v50  ;;  %v1023_v22 = vmul.f32 %v1022_v20, %v845_v50  ;;  %v1047_v59 = vmul.f32 %v1046_v60, %v845_v50  ;;  %v1071_v5 = vmul.f32 %v1070_v61, %v845_v50  ;;  %v847_v3 = vld [vmem:[#allocation3 + $0x18] sm:$0xff] }
 0x1b7   : > { %v849_v51 = vld [vmem:[#allocation3 + $0x19] sm:$0xff]  ;;  %v3414_v41 = vadd.f32 %v903_v14, %v3219_v55  ;;  %v3417_v28 = vadd.f32 %v927_v18, %v3221_v0  ;;  %v3420_v53 = vadd.f32 %v951_v24, %v3223_v2  ;;  %v3423_v42 = vadd.f32 %v975_v57, %v3225_v56 }
 0x1b8   : > { %v3428_v62 = vadd.f32 %v999_v52, %v3227_v47  ;;  %v3431_v10 = vadd.f32 %v1023_v22, %v3229_v48  ;;  %v3434_v55 = vadd.f32 %v1047_v59, %v3231_v16  ;;  %v777_v0 = vmax.f32 %v769_v54, %v772_v44  ;;  %v774_v12 = vpop.permute.xlu1 %773  ;;  %v780_v6 = vpop.permute.xlu0 %779 }
 0x1b9   : > { %v3439_v2 = vadd.f32 %v1071_v5, %v3233_v4  ;;  %v747_v56 = vmax.f32 %v739_v43, %v743_v1  ;;  %v846_v29 = vmax.f32 %v842_v49, %v844_v19  ;;  %v770_v47 = vmax.f32 %v762_v31, %v3389_v30 }
 0x1ba   : > { %v851_v23 = vmax.f32 %v847_v3, %v849_v51  ;;  %v808_v48 = vmax.f32 %v800_v7, %v803_v58  ;;  %v785_v36 = vmax.f32 %v777_v0, %v780_v6  ;;  %v801_v43 = vmax.f32 %v3334_v63, %v3395_v13 }
 0x1bb   : > { %750 = vst.msk [vmem:[#allocation3 + $0x22] sm:$0xff] %vm301_vm2, %v747_v56  ;;  %1097 = vrot.lane.b32.xlu1 %v846_v29, %s2670_s0  ;;  %v904_v16 = vmul.f32 %v902_v11, %v846_v29  ;;  %v928_v4 = vmul.f32 %v926_v35, %v846_v29  ;;  %v952_v37 = vmul.f32 %v950_v32, %v846_v29  ;;  %v908_v49 = vstv %s3411_s17  ;;  %s3576_s17 = sld [smem:[#allocation11 + $0x207]] }
 0x1bc   : > { %v976_v44 = vmul.f32 %v974_v38, %v846_v29  ;;  %v1000_v45 = vmul.f32 %v998_v17, %v846_v29  ;;  %v1024_v34 = vmul.f32 %v1022_v20, %v846_v29  ;;  %v1048_v39 = vmul.f32 %v1046_v60, %v846_v29  ;;  %788 = vst.msk [vmem:[#allocation3 + $0x32] sm:$0xff] %vm301_vm2, %v785_v36  ;;  %v805_v32 = vpop.permute.xlu1 %804  ;;  %v811_v38 = vpop.permute.xlu0 %810 }
 0x1bd   : > { %v1072_v46 = vmul.f32 %v1070_v61, %v846_v29  ;;  %v3454_v30 = vadd.f32 %v904_v16, %v3236_v25  ;;  %v3457_v31 = vadd.f32 %v928_v4, %v3238_v26  ;;  %v3460_v11 = vadd.f32 %v952_v37, %v3240_v33  ;;  %v853_v33 = vld [vmem:[#allocation3 + $0x1a] sm:$0xff] }
 0x1be   : > { %v3463_v35 = vadd.f32 %v976_v44, %v3242_v40  ;;  %v3468_v17 = vadd.f32 %v1000_v45, %v3244_v8  ;;  %v3471_v20 = vadd.f32 %v1024_v34, %v3246_v9  ;;  %v3474_v25 = vadd.f32 %v1048_v39, %v3248_v15 }
 0x1bf   : > { %v3477_v26 = vadd.f32 %v1072_v46, %v3250_v27  ;;  %v855_v40 = vmax.f32 %v851_v23, %v853_v33  ;;  %v778_v21 = vmax.f32 %v770_v47, %v774_v12  ;;  %v816_v8 = vmax.f32 %v808_v48, %v811_v38 }
 0x1c0   : > { %v782_v50 = vpop.permute.xlu1 %781  ;;  %v819_v60 = vpop.permute.xlu0 %818  ;;  %v932_v14 = vstv %s3425_s23  ;;  %v956_v58 = vstv %s3436_s1  ;;  %v980_v52 = vstv %s3441_s2  ;;  %v1004_v22 = vstv %s3444_s3  ;;  %s3582_s23 = sld [smem:[#allocation11 + $0x287]] }
 0x1c1   : > { %v786_v15 = vmax.f32 %v778_v21, %v782_v50  ;;  %v824_v27 = vmax.f32 %v816_v8, %v819_v60  ;;  %v809_v59 = vmax.f32 %v801_v43, %v805_v32  ;;  %v1028_v3 = vstv %s3448_s26  ;;  %s3516_s26 = sld [smem:[#allocation11 + $0x306]] }
 0x1c2   : > { %v848_v9 = vld [vmem:[#allocation3 + $0x20] sm:$0xff]  ;;  %v1052_v29 = vstv %s3451_s14  ;;  %v1076_v12 = vstv %s3465_s15  ;;  %v914_v6 = vstv %s3479_s16  ;;  %v938_v36 = vstv %s3481_s8  ;;  %s3522_s14 = sld [smem:[#allocation11 + $0x386]] }
 0x1c3   : > { %v850_v61 = vld [vmem:[#allocation3 + $0x21] sm:$0xff]  ;;  %v865_v24 = vld [vmem:[#allocation3 + $0x30] sm:$0xff]  ;;  %789 = vst.msk [vmem:[#allocation3 + $0x3a] sm:$0xff] %vm301_vm2, %v786_v15  ;;  %827 = vst.msk [vmem:[#allocation3 + $0x4a] sm:$0xff] %vm301_vm2, %v824_v27  ;;  %s3604_s1 = sld [smem:[#allocation11 + $0x307]] }
 0x1c4   : > { %v852_v54 = vmax.f32 %v848_v9, %v850_v61  ;;  %v857_v7 = vld [vmem:[#allocation3 + $0x1b] sm:$0xff]  ;;  %v867_v57 = vld [vmem:[#allocation3 + $0x31] sm:$0xff]  ;;  %v813_v51 = vpop.permute.xlu1 %812  ;;  %v858_v19 = vld [vmem:[#allocation3 + $0x23] sm:$0xff]  ;;  %s3609_s2 = sld [smem:[#allocation11 + $0x387]] }
 0x1c5   : > { %v854_v18 = vld [vmem:[#allocation3 + $0x22] sm:$0xff]  ;;  %v859_v1 = vmax.f32 %v855_v40, %v857_v7  ;;  %v869_v5 = vmax.f32 %v865_v24, %v867_v57  ;;  %v871_v0 = vld [vmem:[#allocation3 + $0x32] sm:$0xff]  ;;  %v817_v23 = vmax.f32 %v809_v59, %v813_v51  ;;  %v986_v7 = vstv %s3489_s10  ;;  %s3772_s3 = sld [smem:[#allocation11 + $0x8]] }
 0x1c6   : > { %v856_v63 = vmax.f32 %v852_v54, %v854_v18  ;;  %v861_v13 = vld [vmem:[#allocation3 + $0x1c] sm:$0xff]  ;;  %v862_v8 = vld [vmem:[#allocation3 + $0x24] sm:$0xff]  ;;  %v1034_v18 = vstv %s3499_s13  ;;  %s3774_s15 = sld [smem:[#allocation11 + $0x88]] }
 0x1c7   : > { %v863_v56 = vmax.f32 %v859_v1, %v861_v13  ;;  %v3504_v47 = vmax.f32 %v869_v5, %v871_v0  ;;  %v1058_v0 = vstv %s3516_s26  ;;  %s3776_s16 = sld [smem:[#allocation11 + $0x108]] }
 0x1c8   : > { %v860_v48 = vmax.f32 %v856_v63, %v858_v19  ;;  %v821_v32 = vpop.permute.xlu1 %820  ;;  %s3778_s8 = sld [smem:[#allocation11 + $0x188]] }
 0x1c9   : > { %1105 = vrot.lane.b32.xlu0 %v863_v56, %s2670_s0  ;;  %v909_v16 = vmul.f32 %v908_v49, %v863_v56  ;;  %v933_v4 = vmul.f32 %v932_v14, %v863_v56  ;;  %v957_v37 = vmul.f32 %v956_v58, %v863_v56  ;;  %v981_v44 = vmul.f32 %v980_v52, %v863_v56  ;;  %s3785_s10 = sld [smem:[#allocation11 + $0x288]] }
 0x1ca   : > { %v1005_v45 = vmul.f32 %v1004_v22, %v863_v56  ;;  %v1029_v34 = vmul.f32 %v1028_v3, %v863_v56  ;;  %v1053_v39 = vmul.f32 %v1052_v29, %v863_v56  ;;  %v1077_v46 = vmul.f32 %v1076_v12, %v863_v56  ;;  %v866_v50 = vld [vmem:[#allocation3 + $0x38] sm:$0xff]  ;;  %v885_v54 = vld [vmem:[#allocation3 + $0x49] sm:$0xff]  ;;  %s3792_s13 = sld [smem:[#allocation11 + $0x388]] }
 0x1cb   : > { %v3525_v38 = vadd.f32 %v909_v16, %v3414_v41  ;;  %v3528_v33 = vadd.f32 %v933_v4, %v3417_v28  ;;  %v3531_v40 = vadd.f32 %v957_v37, %v3420_v53  ;;  %v3534_v21 = vadd.f32 %v981_v44, %v3423_v42  ;;  %v868_v60 = vld [vmem:[#allocation3 + $0x39] sm:$0xff]  ;;  %v889_v56 = vld [vmem:[#allocation3 + $0x4a] sm:$0xff]  ;;  %s3822_s26 = sld [smem:[#allocation11 + $0x9]] }
 0x1cc   : > { %v3539_v41 = vadd.f32 %v1005_v45, %v3428_v62  ;;  %v3542_v28 = vadd.f32 %v1029_v34, %v3431_v10  ;;  %v3545_v53 = vadd.f32 %v1053_v39, %v3434_v55  ;;  %v3548_v42 = vadd.f32 %v1077_v46, %v3439_v2  ;;  %v875_v61 = vld [vmem:[#allocation3 + $0x33] sm:$0xff]  ;;  %v883_v10 = vld [vmem:[#allocation3 + $0x48] sm:$0xff] }
 0x1cd   : > { %v870_v9 = vmax.f32 %v866_v50, %v868_v60  ;;  %v864_v15 = vmax.f32 %v860_v48, %v862_v8  ;;  %v825_v27 = vmax.f32 %v817_v23, %v821_v32  ;;  %v962_v62 = vstv %s3483_s29  ;;  %v872_v43 = vld [vmem:[#allocation3 + $0x3a] sm:$0xff]  ;;  %s3782_s29 = sld [smem:[#allocation11 + $0x208]] }
 0x1ce   : > { %v877_v55 = vmax.f32 %v3504_v47, %v875_v61  ;;  %v1010_v2 = vstv %s3496_s11  ;;  %v887_v57 = vmax.f32 %v883_v10, %v885_v54  ;;  %v944_v16 = vstv %s3550_s24  ;;  %s4752_s24 = smov 125   ;;  %s3789_s11 = sld [smem:[#allocation11 + $0x308]] }
 0x1cf   : > { %v874_v24 = vmax.f32 %v870_v9, %v872_v43  ;;  %1107 = vrot.lane.b32.xlu1 %v864_v15, %s2670_s0  ;;  %v910_v1 = vmul.f32 %v908_v49, %v864_v15  ;;  %v934_v63 = vmul.f32 %v932_v14, %v864_v15  ;;  %828 = vst.msk [vmem:[#allocation3 + $0x52] sm:$0xff] %vm301_vm2, %v825_v27  ;;  %v880_v9 = vld [vmem:[#allocation3 + $0x3c] sm:$0xff]  ;;  %v968_v10 = vstv %s3563_s7  ;;  %s4751_s7 = smov 126  }
 0x1d0   : > { %v958_v13 = vmul.f32 %v956_v58, %v864_v15  ;;  %v982_v59 = vmul.f32 %v980_v52, %v864_v15  ;;  %v1006_v5 = vmul.f32 %v1004_v22, %v864_v15  ;;  %v1030_v51 = vmul.f32 %v1028_v3, %v864_v15  ;;  %v879_v58 = vld [vmem:[#allocation3 + $0x34] sm:$0xff] }
 0x1d1   : > { %v912_v19 = vadd.f32 %v910_v1, %v3454_v30  ;;  %v936_v49 = vadd.f32 %v934_v63, %v3457_v31  ;;  %v1054_v14 = vmul.f32 %v1052_v29, %v864_v15  ;;  %v876_v31 = vld [vmem:[#allocation3 + $0x3b] sm:$0xff]  ;;  %v1078_v47 = vmul.f32 %v1076_v12, %v864_v15 }
 0x1d2   : > { %v960_v52 = vadd.f32 %v958_v13, %v3460_v11  ;;  %v984_v22 = vadd.f32 %v982_v59, %v3463_v35  ;;  %v1008_v3 = vadd.f32 %v1006_v5, %v3468_v17  ;;  %v1032_v30 = vadd.f32 %v1030_v51, %v3471_v20 }
 0x1d3   : > { %v1056_v29 = vadd.f32 %v1054_v14, %v3474_v25  ;;  %v881_v11 = vmax.f32 %v877_v55, %v879_v58  ;;  %v1082_v35 = vstv %s3522_s14  ;;  %v891_v23 = vmax.f32 %v887_v57, %v889_v56  ;;  %s3836_s14 = sld [smem:[#allocation11 + $0x89]] }
 0x1d4   : > { %v878_v48 = vmax.f32 %v874_v24, %v876_v31  ;;  %v920_v17 = vstv %s3536_s12  ;;  %v1080_v20 = vadd.f32 %v1078_v47, %v3477_v26  ;;  %v992_v54 = vstv %s3571_s9  ;;  %s4750_s9 = smov 127   ;;  %s4753_s12 = smov 124  }
 0x1d5   : > { %1115 = vrot.lane.b32.xlu0 %v881_v11, %s2670_s0  ;;  %v915_v4 = vmul.f32 %v914_v6, %v881_v11  ;;  %v939_v37 = vmul.f32 %v938_v36, %v881_v11  ;;  %v963_v25 = vmul.f32 %v962_v62, %v881_v11  ;;  %v987_v12 = vmul.f32 %v986_v7, %v881_v11 }
 0x1d6   : > { %v884_v44 = vld [vmem:[#allocation3 + $0x50] sm:$0xff]  ;;  %v1011_v34 = vmul.f32 %v1010_v2, %v881_v11  ;;  %v1035_v39 = vmul.f32 %v1034_v18, %v881_v11  ;;  %v1059_v46 = vmul.f32 %v1058_v0, %v881_v11  ;;  %v1083_v43 = vmul.f32 %v1082_v35, %v881_v11 }
 0x1d7   : > { %v886_v45 = vld [vmem:[#allocation3 + $0x51] sm:$0xff]  ;;  %v917_v8 = vadd.f32 %v915_v4, %v3525_v38  ;;  %v941_v50 = vadd.f32 %v939_v37, %v3528_v33  ;;  %v965_v60 = vadd.f32 %v963_v25, %v3531_v40  ;;  %v989_v61 = vadd.f32 %v987_v12, %v3534_v21 }
 0x1d8   : > { %v888_v26 = vmax.f32 %v884_v44, %v886_v45  ;;  %v893_v32 = vld [vmem:[#allocation3 + $0x4b] sm:$0xff]  ;;  %v1013_v15 = vadd.f32 %v1011_v34, %v3539_v41  ;;  %v1037_v27 = vadd.f32 %v1035_v39, %v3542_v28  ;;  %v1061_v38 = vadd.f32 %v1059_v46, %v3545_v53  ;;  %v894_v47 = vld [vmem:[#allocation3 + $0x53] sm:$0xff] }
 0x1d9   : > { %v890_v33 = vld [vmem:[#allocation3 + $0x52] sm:$0xff]  ;;  %v882_v40 = vmax.f32 %v878_v48, %v880_v9  ;;  %v895_v24 = vmax.f32 %v891_v23, %v893_v32  ;;  %v1016_v57 = vstv %s3576_s17  ;;  %v1040_v21 = vstv %s3582_s23  ;;  %s3850_s17 = sld [smem:[#allocation11 + $0x109]] }
 0x1da   : > { %v892_v55 = vmax.f32 %v888_v26, %v890_v33  ;;  %v1085_v1 = vadd.f32 %v1083_v43, %v3548_v42  ;;  %v1064_v23 = vstv %s3604_s1  ;;  %v898_v37 = vld [vmem:[#allocation3 + $0x54] sm:$0xff]  ;;  %s3852_s23 = sld [smem:[#allocation11 + $0x189]] }
 0x1db   : > { %1117 = vrot.lane.b32.xlu1 %v882_v40, %s2670_s0  ;;  %v916_v41 = vmul.f32 %v914_v6, %v882_v40  ;;  %v940_v28 = vmul.f32 %v938_v36, %v882_v40  ;;  %v964_v53 = vmul.f32 %v962_v62, %v882_v40  ;;  %v988_v63 = vmul.f32 %v986_v7, %v882_v40  ;;  %v897_v6 = vld [vmem:[#allocation3 + $0x4c] sm:$0xff]  ;;  %s3857_s1 = sld [smem:[#allocation11 + $0x209]] }
 0x1dc   : > { %v1012_v13 = vmul.f32 %v1010_v2, %v882_v40  ;;  %v1036_v59 = vmul.f32 %v1034_v18, %v882_v40  ;;  %v1060_v5 = vmul.f32 %v1058_v0, %v882_v40  ;;  %v1084_v58 = vmul.f32 %v1082_v35, %v882_v40 }
 0x1dd   : > { %v918_v51 = vadd.f32 %v916_v41, %v912_v19  ;;  %v942_v42 = vadd.f32 %v940_v28, %v936_v49  ;;  %v966_v14 = vadd.f32 %v964_v53, %v960_v52  ;;  %v990_v31 = vadd.f32 %v988_v63, %v984_v22 }
 0x1de   : > { %v1014_v36 = vadd.f32 %v1012_v13, %v1008_v3  ;;  %v1038_v56 = vadd.f32 %v1036_v59, %v1032_v30  ;;  %v1062_v62 = vadd.f32 %v1060_v5, %v1056_v29  ;;  %v1086_v7 = vadd.f32 %v1084_v58, %v1080_v20 }
 0x1df   : > { %v899_v11 = vmax.f32 %v895_v24, %v897_v6  ;;  %v1088_v2 = vstv %s3609_s2  ;;  %v896_v48 = vmax.f32 %v892_v55, %v894_v47  ;;  %s3860_s2 = sld [smem:[#allocation11 + $0x289]] }
 0x1e1   : > { %1125 = vrot.lane.b32.xlu0 %v899_v11, %s2670_s0  ;;  %v921_v18 = vmul.f32 %v920_v17, %v899_v11  ;;  %v945_v19 = vmul.f32 %v944_v16, %v899_v11  ;;  %v969_v49 = vmul.f32 %v968_v10, %v899_v11  ;;  %v993_v0 = vmul.f32 %v992_v54, %v899_v11 }
 0x1e2   : > { %v1017_v52 = vmul.f32 %v1016_v57, %v899_v11  ;;  %v1041_v22 = vmul.f32 %v1040_v21, %v899_v11  ;;  %v1065_v3 = vmul.f32 %v1064_v23, %v899_v11  ;;  %v1089_v30 = vmul.f32 %v1088_v2, %v899_v11 }
 0x1e3   : > { %v3640_v29 = vadd.f32 %v921_v18, %v917_v8  ;;  %v3642_v35 = vadd.f32 %v945_v19, %v941_v50  ;;  %v3644_v20 = vadd.f32 %v969_v49, %v965_v60  ;;  %v3646_v4 = vadd.f32 %v993_v0, %v989_v61 }
 0x1e4   : > { %v3648_v25 = vadd.f32 %v1017_v52, %v1013_v15  ;;  %v3650_v44 = vadd.f32 %v1041_v22, %v1037_v27  ;;  %v3652_v45 = vadd.f32 %v1065_v3, %v1061_v38  ;;  %v3654_v12 = vadd.f32 %v1089_v30, %v1085_v1 }
 0x1e5   : > { %v900_v34 = vmax.f32 %v896_v48, %v898_v37 }
 0x1e7   : > { %1127 = vrot.lane.b32.xlu1 %v900_v34, %s2670_s0  ;;  %v922_v39 = vmul.f32 %v920_v17, %v900_v34  ;;  %v946_v46 = vmul.f32 %v944_v16, %v900_v34  ;;  %v970_v26 = vmul.f32 %v968_v10, %v900_v34  ;;  %v994_v32 = vmul.f32 %v992_v54, %v900_v34 }
 0x1e8   : > { %v1018_v8 = vmul.f32 %v1016_v57, %v900_v34  ;;  %v1042_v50 = vmul.f32 %v1040_v21, %v900_v34  ;;  %v1066_v60 = vmul.f32 %v1064_v23, %v900_v34  ;;  %v1090_v9 = vmul.f32 %v1088_v2, %v900_v34 }
 0x1e9   : > { %v3661_v61 = vadd.f32 %v922_v39, %v918_v51  ;;  %v3663_v15 = vadd.f32 %v946_v46, %v942_v42  ;;  %v3665_v27 = vadd.f32 %v970_v26, %v966_v14  ;;  %v3667_v38 = vadd.f32 %v994_v32, %v990_v31 }
 0x1ea   : > { %v3669_v33 = vadd.f32 %v1018_v8, %v1014_v36  ;;  %v3671_v43 = vadd.f32 %v1042_v50, %v1038_v56  ;;  %v3673_v17 = vadd.f32 %v1066_v60, %v1062_v62  ;;  %v3675_v16 = vadd.f32 %v1090_v9, %v1086_v7 }
 0x227   : > { %v1096_v40 = vpop.permute.xlu0 %1095 }
 0x228   : > { %1101 = vst.msk [vmem:[#allocation2] sm:$0xff] %vm638_vm1, %v1096_v40 }
 0x22d   : > { %v1098_v10 = vpop.permute.xlu1 %1097 }
 0x22e   : > { %1102 = vst.msk [vmem:[#allocation2 + $0x8] sm:$0xff] %vm638_vm1, %v1098_v10 }
 0x22f   : > { %v3679_v54 = vld [vmem:[#allocation2] sm:$0xff] }
 0x230   : > { %1137 = vrot.lane.b32.xlu0 %v3679_v54, %s4750_s9 }
 0x234   : > { %1145 = vrot.lane.b32.xlu0 %v3679_v54, %s4751_s7 }
 0x235   : > { %v3685_v55 = vld [vmem:[#allocation2 + $0x8] sm:$0xff] }
 0x236   : > { %1139 = vrot.lane.b32.xlu1 %v3685_v55, %s4750_s9 }
 0x23a   : > { %1147 = vrot.lane.b32.xlu1 %v3685_v55, %s4751_s7 }
 0x23b   : > { %v1106_v24 = vpop.permute.xlu0 %1105 }
 0x23c   : > { %1111 = vst.msk [vmem:[#allocation2 + $0x10] sm:$0xff] %vm638_vm1, %v1106_v24 }
 0x241   : > { %v1108_v57 = vpop.permute.xlu1 %1107 }
 0x242   : > { %1112 = vst.msk [vmem:[#allocation2 + $0x18] sm:$0xff] %vm638_vm1, %v1108_v57 }
 0x243   : > { %v3693_v21 = vld [vmem:[#allocation2 + $0x10] sm:$0xff] }
 0x244   : > { %1175 = vrot.lane.b32.xlu0 %v3693_v21, %s4750_s9 }
 0x247   : > { %v1116_v1 = vpop.permute.xlu0 %1115 }
 0x248   : > { %1121 = vst.msk [vmem:[#allocation2 + $0x20] sm:$0xff] %vm638_vm1, %v1116_v1  ;;  %1153 = vrot.lane.b32.xlu0 %v3679_v54, %s4752_s24 }
 0x249   : > { %v3700_v41 = vld [vmem:[#allocation2 + $0x18] sm:$0xff] }
 0x24a   : > { %1177 = vrot.lane.b32.xlu1 %v3700_v41, %s4750_s9 }
 0x24c   : > { %1183 = vrot.lane.b32.xlu0 %v3693_v21, %s4751_s7 }
 0x24d   : > { %v1118_v28 = vpop.permute.xlu1 %1117 }
 0x24e   : > { %1122 = vst.msk [vmem:[#allocation2 + $0x28] sm:$0xff] %vm638_vm1, %v1118_v28  ;;  %1155 = vrot.lane.b32.xlu1 %v3685_v55, %s4752_s24 }
 0x24f   : > { %v3709_v53 = vld [vmem:[#allocation2 + $0x20] sm:$0xff] }
 0x250   : > { %1213 = vrot.lane.b32.xlu0 %v3709_v53, %s4750_s9 }
 0x252   : > { %1185 = vrot.lane.b32.xlu1 %v3700_v41, %s4751_s7 }
 0x253   : > { %v1126_v63 = vpop.permute.xlu0 %1125 }
 0x254   : > { %1131 = vst.msk [vmem:[#allocation2 + $0x30] sm:$0xff] %vm638_vm1, %v1126_v63  ;;  %1161 = vrot.lane.b32.xlu0 %v3679_v54, %s4753_s12 }
 0x255   : > { %v3718_v13 = vld [vmem:[#allocation2 + $0x28] sm:$0xff] }
 0x256   : > { %1215 = vrot.lane.b32.xlu1 %v3718_v13, %s4750_s9 }
 0x258   : > { %1191 = vrot.lane.b32.xlu0 %v3693_v21, %s4752_s24 }
 0x259   : > { %v1128_v59 = vpop.permute.xlu1 %1127 }
 0x25a   : > { %1132 = vst.msk [vmem:[#allocation2 + $0x38] sm:$0xff] %vm638_vm1, %v1128_v59  ;;  %1163 = vrot.lane.b32.xlu1 %v3685_v55, %s4753_s12  ;;  %v1382_v59 = vstv %s3774_s15  ;;  %s3923_s15 = sld [smem:[#allocation11 + $0x8a]] }
 0x25b   : > { %v3731_v5 = vld [vmem:[#allocation2 + $0x30] sm:$0xff] }
 0x25c   : > { %1221 = vrot.lane.b32.xlu0 %v3709_v53, %s4751_s7 }
 0x25e   : > { %1193 = vrot.lane.b32.xlu1 %v3700_v41, %s4752_s24 }
 0x260   : > { %1251 = vrot.lane.b32.xlu0 %v3731_v5, %s4750_s9 }
 0x261   : > { %v3739_v51 = vld [vmem:[#allocation2 + $0x38] sm:$0xff] }
 0x262   : > { %1223 = vrot.lane.b32.xlu1 %v3718_v13, %s4751_s7 }
 0x264   : > { %1199 = vrot.lane.b32.xlu0 %v3693_v21, %s4753_s12 }
 0x266   : > { %1253 = vrot.lane.b32.xlu1 %v3739_v51, %s4750_s9 }
 0x268   : > { %1229 = vrot.lane.b32.xlu0 %v3709_v53, %s4752_s24 }
 0x26a   : > { %1201 = vrot.lane.b32.xlu1 %v3700_v41, %s4753_s12 }
 0x26c   : > { %1259 = vrot.lane.b32.xlu0 %v3731_v5, %s4751_s7 }
 0x26e   : > { %1231 = vrot.lane.b32.xlu1 %v3718_v13, %s4752_s24 }
 0x270   : > { %1237 = vrot.lane.b32.xlu0 %v3709_v53, %s4753_s12 }
 0x272   : > { %1261 = vrot.lane.b32.xlu1 %v3739_v51, %s4751_s7 }
 0x274   : > { %1267 = vrot.lane.b32.xlu0 %v3731_v5, %s4752_s24 }
 0x276   : > { %1239 = vrot.lane.b32.xlu1 %v3718_v13, %s4753_s12 }
 0x278   : > { %1275 = vrot.lane.b32.xlu0 %v3731_v5, %s4753_s12 }
 0x27a   : > { %1269 = vrot.lane.b32.xlu1 %v3739_v51, %s4752_s24 }
 0x27e   : > { %1277 = vrot.lane.b32.xlu1 %v3739_v51, %s4753_s12 }
 0x2a2   : > { %v1138_v42 = vpop.permute.xlu0 %1137 }
 0x2a3   : > { %v1143_v7 = vmax.f32 %v3679_v54, %v1138_v42  ;;  %v1406_v42 = vstv %s3776_s16  ;;  %s3925_s16 = sld [smem:[#allocation11 + $0x10a]] }
 0x2a6   : > { %v1146_v58 = vpop.permute.xlu0 %1145 }
 0x2a7   : > { %v1151_v23 = vmax.f32 %v1143_v7, %v1146_v58  ;;  %v1502_v7 = vstv %s3789_s11  ;;  %s3953_s11 = sld [smem:[#allocation11 + $0x20a]] }
 0x2a8   : > { %v1140_v14 = vpop.permute.xlu1 %1139 }
 0x2a9   : > { %v1144_v19 = vmax.f32 %v3685_v55, %v1140_v14 }
 0x2ac   : > { %v1148_v31 = vpop.permute.xlu1 %1147 }
 0x2ad   : > { %v1152_v52 = vmax.f32 %v1144_v19, %v1148_v31 }
 0x2b6   : > { %v1176_v6 = vpop.permute.xlu0 %1175 }
 0x2b7   : > { %v1181_v32 = vmax.f32 %v3693_v21, %v1176_v6  ;;  %v1358_v21 = vstv %s3772_s3  ;;  %s3913_s3 = sld [smem:[#allocation11 + $0xa]] }
 0x2ba   : > { %v1154_v36 = vpop.permute.xlu0 %1153 }
 0x2bb   : > { %v1159_v48 = vmax.f32 %v1151_v23, %v1154_v36  ;;  %v1430_v36 = vstv %s3778_s8  ;;  %v1526_v23 = vstv %s3792_s13  ;;  %s3866_s8 = sld [smem:[#allocation11 + $0x309]] }
 0x2bc   : > { %v1178_v56 = vpop.permute.xlu1 %1177  ;;  %s3955_s13 = sld [smem:[#allocation11 + $0x28a]] }
 0x2bd   : > { %v1182_v55 = vmax.f32 %v3700_v41, %v1178_v56  ;;  %v1454_v41 = vstv %s3782_s29  ;;  %s3875_s29 = sld [smem:[#allocation11 + $0x389]] }
 0x2be   : > { %v1184_v62 = vpop.permute.xlu0 %1183 }
 0x2bf   : > { %v1189_v9 = vmax.f32 %v1181_v32, %v1184_v62 }
 0x2c0   : > { %v1156_v47 = vpop.permute.xlu1 %1155 }
 0x2c1   : > { %v1160_v3 = vmax.f32 %v1152_v52, %v1156_v47  ;;  %v1478_v47 = vstv %s3785_s10  ;;  %s3939_s10 = sld [smem:[#allocation11 + $0x18a]] }
 0x2c2   : > { %v3766_v11 = vpop.permute.xlu0 %1213 }
 0x2c4   : > { %v1186_v2 = vpop.permute.xlu1 %1185 }
 0x2c5   : > { %v1190_v58 = vmax.f32 %v1182_v55, %v1186_v2 }
 0x2c6   : > { %v1162_v18 = vpop.permute.xlu0 %1161 }
 0x2c7   : > { %v1167_v49 = vmax.f32 %v1159_v48, %v1162_v18  ;;  %v1219_v18 = vmax.f32 %v3709_v53, %v3766_v11 }
 0x2c8   : > { %v3769_v0 = vpop.permute.xlu1 %1215 }
 0x2c9   : > { %1169 = vst.msk [vmem:[#allocation3 + $0x2] sm:$0xff] %vm301_vm2, %v1167_v49 }
 0x2ca   : > { %v1192_v22 = vpop.permute.xlu0 %1191 }
 0x2cb   : > { %v1197_v54 = vmax.f32 %v1189_v9, %v1192_v22 }
 0x2cc   : > { %v1164_v30 = vpop.permute.xlu1 %1163 }
 0x2cd   : > { %v1168_v37 = vmax.f32 %v1160_v3, %v1164_v30 }
 0x2ce   : > { %v3780_v34 = vpop.permute.xlu0 %1221 }
 0x2cf   : > { %1170 = vst.msk [vmem:[#allocation3 + $0xa] sm:$0xff] %vm301_vm2, %v1168_v37 }
 0x2d0   : > { %v3787_v39 = vpop.permute.xlu1 %1193  ;;  %v1285_v46 = vld [vmem:[#allocation3] sm:$0xff] }
 0x2d1   : > { %v1287_v26 = vld [vmem:[#allocation3 + $0x1] sm:$0xff]  ;;  %v1198_v2 = vmax.f32 %v1190_v58, %v3787_v39 }
 0x2d2   : > { %v1289_v8 = vmax.f32 %v1285_v46, %v1287_v26  ;;  %v3794_v50 = vpop.permute.xlu0 %1251  ;;  %v1291_v60 = vld [vmem:[#allocation3 + $0x2] sm:$0xff] }
 0x2d4   : > { %v1293_v40 = vmax.f32 %v1289_v8, %v1291_v60  ;;  %v3796_v10 = vpop.permute.xlu1 %1223 }
 0x2d6   : > { %v1200_v24 = vpop.permute.xlu0 %1199  ;;  %v1295_v57 = vld [vmem:[#allocation3 + $0x3] sm:$0xff] }
 0x2d7   : > { %v1286_v1 = vld [vmem:[#allocation3 + $0x8] sm:$0xff]  ;;  %v1205_v28 = vmax.f32 %v1197_v54, %v1200_v24  ;;  %v1297_v63 = vmax.f32 %v1293_v40, %v1295_v57 }
 0x2d8   : > { %v1288_v14 = vld [vmem:[#allocation3 + $0x9] sm:$0xff]  ;;  %v3802_v6 = vpop.permute.xlu1 %1253 }
 0x2d9   : > { %v1299_v31 = vld [vmem:[#allocation3 + $0x4] sm:$0xff]  ;;  %v1290_v56 = vmax.f32 %v1286_v1, %v1288_v14  ;;  %1207 = vst.msk [vmem:[#allocation3 + $0x1a] sm:$0xff] %vm301_vm2, %v1205_v28  ;;  %v1300_v24 = vld [vmem:[#allocation3 + $0xc] sm:$0xff] }
 0x2da   : > { %v1301_v62 = vmax.f32 %v1297_v63, %v1299_v31  ;;  %v1292_v48 = vld [vmem:[#allocation3 + $0xa] sm:$0xff]  ;;  %v3813_v19 = vpop.permute.xlu0 %1229 }
 0x2db   : > { %v1294_v49 = vmax.f32 %v1290_v56, %v1292_v48  ;;  %v1296_v54 = vld [vmem:[#allocation3 + $0xb] sm:$0xff] }
 0x2dc   : > { %1551 = vrot.lane.b32.xlu0 %v1301_v62, %s2670_s0  ;;  %v1359_v52 = vmul.f32 %v1358_v21, %v1301_v62  ;;  %v1383_v22 = vmul.f32 %v1382_v59, %v1301_v62  ;;  %v1407_v3 = vmul.f32 %v1406_v42, %v1301_v62  ;;  %v1431_v30 = vmul.f32 %v1430_v36, %v1301_v62  ;;  %v1202_v8 = vpop.permute.xlu1 %1201 }
 0x2dd   : > { %v1455_v37 = vmul.f32 %v1454_v41, %v1301_v62  ;;  %v1479_v46 = vmul.f32 %v1478_v47, %v1301_v62  ;;  %v1503_v26 = vmul.f32 %v1502_v7, %v1301_v62  ;;  %v1527_v32 = vmul.f32 %v1526_v23, %v1301_v62 }
 0x2de   : > { %v3825_v53 = vadd.f32 %v1359_v52, %v3640_v29  ;;  %v3828_v11 = vadd.f32 %v1383_v22, %v3642_v35  ;;  %v3831_v39 = vadd.f32 %v1407_v3, %v3644_v20  ;;  %v3834_v60 = vadd.f32 %v1431_v30, %v3646_v4  ;;  %v1260_v20 = vpop.permute.xlu0 %1259 }
 0x2df   : > { %v3839_v9 = vadd.f32 %v1455_v37, %v3648_v25  ;;  %v3842_v40 = vadd.f32 %v1479_v46, %v3650_v44  ;;  %v3845_v29 = vadd.f32 %v1503_v26, %v3652_v45  ;;  %v3848_v35 = vadd.f32 %v1527_v32, %v3654_v12 }
 0x2e0   : > { %v1206_v4 = vmax.f32 %v1198_v2, %v1202_v8  ;;  %v1298_v55 = vmax.f32 %v1294_v49, %v1296_v54  ;;  %v1220_v25 = vmax.f32 %v3718_v13, %v3769_v0  ;;  %v1227_v44 = vmax.f32 %v1219_v18, %v3780_v34  ;;  %v1232_v45 = vpop.permute.xlu1 %1231  ;;  %v1303_v12 = vld [vmem:[#allocation3 + $0x18] sm:$0xff] }
 0x2e1   : > { %v1305_v57 = vld [vmem:[#allocation3 + $0x19] sm:$0xff]  ;;  %v1257_v13 = vmax.f32 %v3731_v5, %v3794_v50  ;;  %v1364_v49 = vstv %s3822_s26  ;;  %v1412_v52 = vstv %s3850_s17  ;;  %v1436_v30 = vstv %s3852_s23  ;;  %s3957_s23 = sld [smem:[#allocation11 + $0x30a]] }
 0x2e2   : > { %1208 = vst.msk [vmem:[#allocation3 + $0x22] sm:$0xff] %vm301_vm2, %v1206_v4  ;;  %v1302_v1 = vmax.f32 %v1298_v55, %v1300_v24  ;;  %v1228_v28 = vmax.f32 %v1220_v25, %v3796_v10  ;;  %v1235_v0 = vmax.f32 %v1227_v44, %v3813_v19  ;;  %v1238_v34 = vpop.permute.xlu0 %1237  ;;  %v1307_v63 = vmax.f32 %v1303_v12, %v1305_v57  ;;  %s3983_s26 = sld [smem:[#allocation11 + $0x8b]] }
 0x2e3   : > { %v1258_v46 = vmax.f32 %v3739_v51, %v3802_v6  ;;  %v1460_v32 = vstv %s3857_s1  ;;  %v1484_v8 = vstv %s3860_s2  ;;  %v1508_v55 = vstv %s3866_s8  ;;  %s3959_s1 = sld [smem:[#allocation11 + $0x38a]] }
 0x2e4   : > { %1553 = vrot.lane.b32.xlu1 %v1302_v1, %s2670_s0  ;;  %v1360_v14 = vmul.f32 %v1358_v21, %v1302_v1  ;;  %v1384_v58 = vmul.f32 %v1382_v59, %v1302_v1  ;;  %v1408_v31 = vmul.f32 %v1406_v42, %v1302_v1  ;;  %v1432_v56 = vmul.f32 %v1430_v36, %v1302_v1  ;;  %v1262_v48 = vpop.permute.xlu1 %1261  ;;  %s3969_s2 = sld [smem:[#allocation11 + $0xb]] }
 0x2e5   : > { %v1456_v10 = vmul.f32 %v1454_v41, %v1302_v1  ;;  %v1480_v62 = vmul.f32 %v1478_v47, %v1302_v1  ;;  %v1504_v5 = vmul.f32 %v1502_v7, %v1302_v1  ;;  %v1528_v50 = vmul.f32 %v1526_v23, %v1302_v1  ;;  %s4000_s17 = sld [smem:[#allocation11 + $0x18b]] }
 0x2e6   : > { %v3878_v18 = vadd.f32 %v1360_v14, %v3661_v61  ;;  %v3881_v2 = vadd.f32 %v1384_v58, %v3663_v15  ;;  %v3884_v21 = vadd.f32 %v1408_v31, %v3665_v27  ;;  %v3887_v59 = vadd.f32 %v1432_v56, %v3667_v38  ;;  %v1268_v41 = vpop.permute.xlu0 %1267  ;;  %v1309_v27 = vld [vmem:[#allocation3 + $0x1a] sm:$0xff]  ;;  %s4006_s8 = sld [smem:[#allocation11 + $0x20b]] }
 0x2e7   : > { %v3890_v42 = vadd.f32 %v1456_v10, %v3669_v33  ;;  %v3893_v36 = vadd.f32 %v1480_v62, %v3671_v43  ;;  %v3896_v61 = vadd.f32 %v1504_v5, %v3673_v17  ;;  %v3899_v15 = vadd.f32 %v1528_v50, %v3675_v16 }
 0x2e8   : > { %v1236_v47 = vmax.f32 %v1228_v28, %v1232_v45  ;;  %v1265_v7 = vmax.f32 %v1257_v13, %v1260_v20  ;;  %v1243_v23 = vmax.f32 %v1235_v0, %v1238_v34  ;;  %v1311_v38 = vmax.f32 %v1307_v63, %v1309_v27  ;;  %v1240_v33 = vpop.permute.xlu1 %1239 }
 0x2e9   : > { %v1313_v19 = vld [vmem:[#allocation3 + $0x1b] sm:$0xff]  ;;  %v1388_v43 = vstv %s3836_s14  ;;  %v1532_v25 = vstv %s3875_s29  ;;  %v1266_v45 = vmax.f32 %v1258_v46, %v1262_v48  ;;  %v1314_v5 = vld [vmem:[#allocation3 + $0x23] sm:$0xff]  ;;  %s3997_s14 = sld [smem:[#allocation11 + $0x10b]] }
 0x2ea   : > { %v1304_v17 = vld [vmem:[#allocation3 + $0x20] sm:$0xff]  ;;  %1245 = vst.msk [vmem:[#allocation3 + $0x32] sm:$0xff] %vm301_vm2, %v1243_v23  ;;  %v1244_v16 = vmax.f32 %v1236_v47, %v1240_v33  ;;  %v1273_v22 = vmax.f32 %v1265_v7, %v1268_v41  ;;  %v1315_v3 = vmax.f32 %v1311_v38, %v1313_v19  ;;  %v1276_v54 = vpop.permute.xlu0 %1275  ;;  %s4012_s29 = sld [smem:[#allocation11 + $0x28b]] }
 0x2eb   : > { %v1306_v37 = vld [vmem:[#allocation3 + $0x21] sm:$0xff] }
 0x2ec   : > { %v1317_v26 = vld [vmem:[#allocation3 + $0x1c] sm:$0xff]  ;;  %v1308_v20 = vmax.f32 %v1304_v17, %v1306_v37  ;;  %1246 = vst.msk [vmem:[#allocation3 + $0x3a] sm:$0xff] %vm301_vm2, %v1244_v16  ;;  %v1281_v44 = vmax.f32 %v1273_v22, %v1276_v54  ;;  %v1270_v12 = vpop.permute.xlu1 %1269 }
 0x2ed   : > { %v1319_v4 = vmax.f32 %v1315_v3, %v1317_v26  ;;  %v1310_v24 = vld [vmem:[#allocation3 + $0x22] sm:$0xff] }
 0x2ee   : > { %v1312_v57 = vmax.f32 %v1308_v20, %v1310_v24  ;;  %1283 = vst.msk [vmem:[#allocation3 + $0x4a] sm:$0xff] %vm301_vm2, %v1281_v44  ;;  %v1418_v44 = vstv %s3925_s16  ;;  %v1466_v24 = vstv %s3953_s11  ;;  %s4173_s16 = sld [smem:[#allocation11 + $0x18c]] }
 0x2ef   : > { %1561 = vrot.lane.b32.xlu0 %v1319_v4, %s2670_s0  ;;  %v1365_v51 = vmul.f32 %v1364_v49, %v1319_v4  ;;  %v1389_v6 = vmul.f32 %v1388_v43, %v1319_v4  ;;  %v1413_v1 = vmul.f32 %v1412_v52, %v1319_v4  ;;  %v1437_v28 = vmul.f32 %v1436_v30, %v1319_v4  ;;  %s4181_s11 = sld [smem:[#allocation11 + $0x38c]] }
 0x2f0   : > { %v1461_v13 = vmul.f32 %v1460_v32, %v1319_v4  ;;  %v1485_v0 = vmul.f32 %v1484_v8, %v1319_v4  ;;  %v1509_v34 = vmul.f32 %v1508_v55, %v1319_v4  ;;  %v1533_v63 = vmul.f32 %v1532_v25, %v1319_v4 }
 0x2f1   : > { %v3928_v14 = vadd.f32 %v1365_v51, %v3825_v53  ;;  %v3931_v58 = vadd.f32 %v1389_v6, %v3828_v11  ;;  %v3934_v31 = vadd.f32 %v1413_v1, %v3831_v39  ;;  %v3937_v56 = vadd.f32 %v1437_v28, %v3834_v60  ;;  %v1278_v39 = vpop.permute.xlu1 %1277  ;;  %v1321_v50 = vld [vmem:[#allocation3 + $0x30] sm:$0xff] }
 0x2f2   : > { %v3942_v10 = vadd.f32 %v1461_v13, %v3839_v9  ;;  %v3945_v62 = vadd.f32 %v1485_v0, %v3842_v40  ;;  %v3948_v53 = vadd.f32 %v1509_v34, %v3845_v29  ;;  %v3951_v11 = vadd.f32 %v1533_v63, %v3848_v35  ;;  %v1323_v48 = vld [vmem:[#allocation3 + $0x31] sm:$0xff]  ;;  %v1318_v40 = vld [vmem:[#allocation3 + $0x24] sm:$0xff] }
 0x2f3   : > { %v1274_v60 = vmax.f32 %v1266_v45, %v1270_v12  ;;  %v1316_v9 = vmax.f32 %v1312_v57, %v1314_v5  ;;  %v1325_v41 = vmax.f32 %v1321_v50, %v1323_v48  ;;  %v1322_v29 = vld [vmem:[#allocation3 + $0x38] sm:$0xff]  ;;  %v1490_v45 = vstv %s3955_s13  ;;  %s4183_s13 = sld [smem:[#allocation11 + $0xd]] }
 0x2f4   : > { %v1327_v47 = vld [vmem:[#allocation3 + $0x32] sm:$0xff]  ;;  %v1514_v12 = vstv %s3957_s23  ;;  %v1538_v57 = vstv %s3959_s1  ;;  %v1332_v51 = vld [vmem:[#allocation3 + $0x3b] sm:$0xff]  ;;  %s4187_s23 = sld [smem:[#allocation11 + $0x8d]] }
 0x2f5   : > { %v1320_v35 = vmax.f32 %v1316_v9, %v1318_v40  ;;  %v1282_v27 = vmax.f32 %v1274_v60, %v1278_v39  ;;  %v1324_v7 = vld [vmem:[#allocation3 + $0x39] sm:$0xff]  ;;  %v1329_v23 = vmax.f32 %v1325_v41, %v1327_v47  ;;  %v1339_v54 = vld [vmem:[#allocation3 + $0x48] sm:$0xff]  ;;  %s4189_s1 = sld [smem:[#allocation11 + $0x10d]] }
 0x2f6   : > { %v1326_v38 = vmax.f32 %v1322_v29, %v1324_v7  ;;  %v1331_v26 = vld [vmem:[#allocation3 + $0x33] sm:$0xff]  ;;  %v1341_v20 = vld [vmem:[#allocation3 + $0x49] sm:$0xff] }
 0x2f7   : > { %1563 = vrot.lane.b32.xlu1 %v1320_v35, %s2670_s0  ;;  %v1366_v33 = vmul.f32 %v1364_v49, %v1320_v35  ;;  %v1390_v19 = vmul.f32 %v1388_v43, %v1320_v35  ;;  %v1414_v17 = vmul.f32 %v1412_v52, %v1320_v35  ;;  %v1438_v16 = vmul.f32 %v1436_v30, %v1320_v35  ;;  %v1345_v6 = vld [vmem:[#allocation3 + $0x4a] sm:$0xff] }
 0x2f8   : > { %1284 = vst.msk [vmem:[#allocation3 + $0x52] sm:$0xff] %vm301_vm2, %v1282_v27  ;;  %v1462_v22 = vmul.f32 %v1460_v32, %v1320_v35  ;;  %v1486_v3 = vmul.f32 %v1484_v8, %v1320_v35  ;;  %v1510_v37 = vmul.f32 %v1508_v55, %v1320_v35  ;;  %v1534_v46 = vmul.f32 %v1532_v25, %v1320_v35 }
 0x2f9   : > { %v3972_v4 = vadd.f32 %v1366_v33, %v3878_v18  ;;  %v3975_v49 = vadd.f32 %v1390_v19, %v3881_v2  ;;  %v3978_v43 = vadd.f32 %v1414_v17, %v3884_v21  ;;  %v3981_v52 = vadd.f32 %v1438_v16, %v3887_v59  ;;  %v1328_v59 = vld [vmem:[#allocation3 + $0x3a] sm:$0xff]  ;;  %4756 = sst [smem:[#allocation34_spill]] %s4183_s13 }
 0x2fa   : > { %v3986_v30 = vadd.f32 %v1462_v22, %v3890_v42  ;;  %v3989_v18 = vadd.f32 %v1486_v3, %v3893_v36  ;;  %v3992_v2 = vadd.f32 %v1510_v37, %v3896_v61  ;;  %v3995_v21 = vadd.f32 %v1534_v46, %v3899_v15  ;;  %v1335_v36 = vld [vmem:[#allocation3 + $0x34] sm:$0xff] }
 0x2fb   : > { %v1333_v32 = vmax.f32 %v1329_v23, %v1331_v26  ;;  %v1370_v8 = vstv %s3913_s3  ;;  %v1330_v55 = vmax.f32 %v1326_v38, %v1328_v59  ;;  %v1343_v42 = vmax.f32 %v1339_v54, %v1341_v20  ;;  %s4014_s3 = sld [smem:[#allocation11 + $0x30b]] }
 0x2fc   : > { %v1394_v25 = vstv %s3923_s15  ;;  %v1442_v61 = vstv %s3939_s10  ;;  %s4020_s15 = sld [smem:[#allocation11 + $0x38b]]  ;;  %v1400_v33 = vstv %s3983_s26  ;;  %v1424_v19 = vstv %s3997_s14 }
 0x2fd   : > { %v1337_v15 = vmax.f32 %v1333_v32, %v1335_v36  ;;  %v1334_v1 = vmax.f32 %v1330_v55, %v1332_v51  ;;  %v1347_v28 = vmax.f32 %v1343_v42, %v1345_v6  ;;  %v1448_v17 = vstv %s4000_s17  ;;  %s4175_s10 = sld [smem:[#allocation11 + $0x20c]] }
 0x2fe   : > { %v1472_v16 = vstv %s4006_s8  ;;  %s4193_s26 = sld [smem:[#allocation11 + $0x20d]] }
 0x2ff   : > { %1571 = vrot.lane.b32.xlu0 %v1337_v15, %s2670_s0  ;;  %v1371_v13 = vmul.f32 %v1370_v8, %v1337_v15  ;;  %v1395_v0 = vmul.f32 %v1394_v25, %v1337_v15  ;;  %v1419_v34 = vmul.f32 %v1418_v44, %v1337_v15  ;;  %v1443_v63 = vmul.f32 %v1442_v61, %v1337_v15  ;;  %v1349_v29 = vld [vmem:[#allocation3 + $0x4b] sm:$0xff]  ;;  %s4195_s14 = sld [smem:[#allocation11 + $0x28d]] }
 0x300   : > { %v1467_v5 = vmul.f32 %v1466_v24, %v1337_v15  ;;  %v1491_v39 = vmul.f32 %v1490_v45, %v1337_v15  ;;  %v1515_v50 = vmul.f32 %v1514_v12, %v1337_v15  ;;  %v1539_v48 = vmul.f32 %v1538_v57, %v1337_v15  ;;  %v1340_v35 = vld [vmem:[#allocation3 + $0x50] sm:$0xff]  ;;  %s4197_s17 = sld [smem:[#allocation11 + $0x30d]] }
 0x301   : > { %v1373_v60 = vadd.f32 %v1371_v13, %v3928_v14  ;;  %v1397_v9 = vadd.f32 %v1395_v0, %v3931_v58  ;;  %v1421_v41 = vadd.f32 %v1419_v34, %v3934_v31  ;;  %v1445_v40 = vadd.f32 %v1443_v63, %v3937_v56  ;;  %v1342_v27 = vld [vmem:[#allocation3 + $0x51] sm:$0xff]  ;;  %v1336_v58 = vld [vmem:[#allocation3 + $0x3c] sm:$0xff]  ;;  %s4199_s8 = sld [smem:[#allocation11 + $0x38d]] }
 0x302   : > { %v1469_v47 = vadd.f32 %v1467_v5, %v3942_v10  ;;  %v1493_v7 = vadd.f32 %v1491_v39, %v3945_v62  ;;  %v1517_v14 = vadd.f32 %v1515_v50, %v3948_v53  ;;  %v1541_v23 = vadd.f32 %v1539_v48, %v3951_v11  ;;  %v1350_v63 = vld [vmem:[#allocation3 + $0x53] sm:$0xff] }
 0x303   : > { %v1338_v38 = vmax.f32 %v1334_v1, %v1336_v58  ;;  %v1376_v31 = vstv %s3969_s2  ;;  %v1351_v56 = vmax.f32 %v1347_v28, %v1349_v29  ;;  %v1344_v22 = vmax.f32 %v1340_v35, %v1342_v27  ;;  %v1354_v39 = vld [vmem:[#allocation3 + $0x54] sm:$0xff]  ;;  %s4191_s2 = sld [smem:[#allocation11 + $0x18d]] }
 0x304   : > { %v1544_v15 = vstv %s4020_s15  ;;  %s4210_s15 = sld [smem:[#allocation11 + $0x10e]] }
 0x305   : > { %1573 = vrot.lane.b32.xlu1 %v1338_v38, %s2670_s0  ;;  %v1372_v3 = vmul.f32 %v1370_v8, %v1338_v38  ;;  %v1396_v37 = vmul.f32 %v1394_v25, %v1338_v38  ;;  %v1420_v10 = vmul.f32 %v1418_v44, %v1338_v38  ;;  %v1444_v62 = vmul.f32 %v1442_v61, %v1338_v38  ;;  %v1353_v25 = vld [vmem:[#allocation3 + $0x4c] sm:$0xff]  ;;  %4758 = sst [smem:[#allocation36_spill]] %s4195_s14 }
 0x306   : > { %v1468_v53 = vmul.f32 %v1466_v24, %v1338_v38  ;;  %v1492_v11 = vmul.f32 %v1490_v45, %v1338_v38  ;;  %v1516_v46 = vmul.f32 %v1514_v12, %v1338_v38  ;;  %v1540_v26 = vmul.f32 %v1538_v57, %v1338_v38  ;;  %4759 = sst [smem:[#allocation37_spill]] %s4197_s17 }
 0x307   : > { %v1374_v54 = vadd.f32 %v1372_v3, %v3972_v4  ;;  %v1398_v20 = vadd.f32 %v1396_v37, %v3975_v49  ;;  %v1422_v59 = vadd.f32 %v1420_v10, %v3978_v43  ;;  %v1446_v32 = vadd.f32 %v1444_v62, %v3981_v52  ;;  %v1346_v4 = vld [vmem:[#allocation3 + $0x52] sm:$0xff]  ;;  %4760 = sst [smem:[#allocation38_spill]] %s4199_s8 }
 0x308   : > { %v1470_v8 = vadd.f32 %v1468_v53, %v3986_v30  ;;  %v1494_v55 = vadd.f32 %v1492_v11, %v3989_v18  ;;  %v1518_v42 = vadd.f32 %v1516_v46, %v3992_v2  ;;  %v1542_v36 = vadd.f32 %v1540_v26, %v3995_v21 }
 0x309   : > { %v1355_v44 = vmax.f32 %v1351_v56, %v1353_v25  ;;  %v1496_v61 = vstv %s4012_s29  ;;  %v1520_v24 = vstv %s4014_s3  ;;  %v1348_v45 = vmax.f32 %v1344_v22, %v1346_v4  ;;  %4757 = sst [smem:[#allocation35_spill]] %s4191_s2 }
 0x30a   : > { %s4202_s29 = sld [smem:[#allocation11 + $0xe]] }
 0x30b   : > { %1581 = vrot.lane.b32.xlu0 %v1355_v44, %s2670_s0  ;;  %v1377_v49 = vmul.f32 %v1376_v31, %v1355_v44  ;;  %v1401_v43 = vmul.f32 %v1400_v33, %v1355_v44  ;;  %v1425_v52 = vmul.f32 %v1424_v19, %v1355_v44  ;;  %v1449_v12 = vmul.f32 %v1448_v17, %v1355_v44  ;;  %s4208_s3 = sld [smem:[#allocation11 + $0x8e]] }
 0x30c   : > { %v1473_v30 = vmul.f32 %v1472_v16, %v1355_v44  ;;  %v1497_v57 = vmul.f32 %v1496_v61, %v1355_v44  ;;  %v1521_v18 = vmul.f32 %v1520_v24, %v1355_v44  ;;  %v1545_v51 = vmul.f32 %v1544_v15, %v1355_v44 }
 0x30d   : > { %v4044_v2 = vadd.f32 %v1377_v49, %v1373_v60  ;;  %v4046_v21 = vadd.f32 %v1401_v43, %v1397_v9  ;;  %v4048_v6 = vadd.f32 %v1425_v52, %v1421_v41  ;;  %v4050_v1 = vadd.f32 %v1449_v12, %v1445_v40 }
 0x30e   : > { %v4052_v28 = vadd.f32 %v1473_v30, %v1469_v47  ;;  %v4054_v13 = vadd.f32 %v1497_v57, %v1493_v7  ;;  %v4056_v0 = vadd.f32 %v1521_v18, %v1517_v14  ;;  %v4058_v34 = vadd.f32 %v1545_v51, %v1541_v23 }
 0x30f   : > { %v1352_v5 = vmax.f32 %v1348_v45, %v1350_v63 }
 0x310   : > { %4761 = sst [smem:[#allocation39_spill]] %s4202_s29 }
 0x311   : > { %v1356_v50 = vmax.f32 %v1352_v5, %v1354_v39  ;;  %4762 = sst [smem:[#allocation40_spill]] %s4208_s3 }
 0x313   : > { %1583 = vrot.lane.b32.xlu1 %v1356_v50, %s2670_s0  ;;  %v1378_v48 = vmul.f32 %v1376_v31, %v1356_v50  ;;  %v1402_v60 = vmul.f32 %v1400_v33, %v1356_v50  ;;  %v1426_v9 = vmul.f32 %v1424_v19, %v1356_v50  ;;  %v1450_v41 = vmul.f32 %v1448_v17, %v1356_v50  ;;  %s4165_s0 = sld [smem:[#allocation11 + $0xc]] }
 0x314   : > { %v1474_v40 = vmul.f32 %v1472_v16, %v1356_v50  ;;  %v1498_v29 = vmul.f32 %v1496_v61, %v1356_v50  ;;  %v1522_v35 = vmul.f32 %v1520_v24, %v1356_v50  ;;  %v1546_v27 = vmul.f32 %v1544_v15, %v1356_v50 }
 0x315   : > { %v4061_v47 = vadd.f32 %v1378_v48, %v1374_v54  ;;  %v4063_v7 = vadd.f32 %v1402_v60, %v1398_v20  ;;  %v4065_v14 = vadd.f32 %v1426_v9, %v1422_v59  ;;  %v4067_v23 = vadd.f32 %v1450_v41, %v1446_v32 }
 0x316   : > { %v4069_v58 = vadd.f32 %v1474_v40, %v1470_v8  ;;  %v4071_v38 = vadd.f32 %v1498_v29, %v1494_v55  ;;  %v4073_v31 = vadd.f32 %v1522_v35, %v1518_v42  ;;  %v4075_v33 = vadd.f32 %v1546_v27, %v1542_v36 }
 0x319   : > { %v1814_v35 = vstv %s4165_s0 }
 0x34e   : > { %v1552_v19 = vpop.permute.xlu0 %1551 }
 0x34f   : > { %1557 = vst.msk [vmem:[#allocation2] sm:$0xff] %vm638_vm1, %v1552_v19 }
 0x356   : > { %v1554_v56 = vpop.permute.xlu1 %1553  ;;  %v4078_v17 = vld [vmem:[#allocation2] sm:$0xff] }
 0x357   : > { %1558 = vst.msk [vmem:[#allocation2 + $0x8] sm:$0xff] %vm638_vm1, %v1554_v56  ;;  %1593 = vrot.lane.b32.xlu0 %v4078_v17, %s4750_s9 }
 0x35b   : > { %1601 = vrot.lane.b32.xlu0 %v4078_v17, %s4751_s7 }
 0x35e   : > { %v4085_v16 = vld [vmem:[#allocation2 + $0x8] sm:$0xff] }
 0x35f   : > { %1595 = vrot.lane.b32.xlu1 %v4085_v16, %s4750_s9 }
 0x361   : > { %v1562_v22 = vpop.permute.xlu0 %1561 }
 0x362   : > { %1567 = vst.msk [vmem:[#allocation2 + $0x10] sm:$0xff] %vm638_vm1, %v1562_v22  ;;  %v1910_v22 = vstv %s4175_s10 }
 0x363   : > { %1603 = vrot.lane.b32.xlu1 %v4085_v16, %s4751_s7 }
 0x369   : > { %v1564_v3 = vpop.permute.xlu1 %1563  ;;  %v4092_v37 = vld [vmem:[#allocation2 + $0x10] sm:$0xff] }
 0x36a   : > { %1568 = vst.msk [vmem:[#allocation2 + $0x18] sm:$0xff] %vm638_vm1, %v1564_v3  ;;  %1631 = vrot.lane.b32.xlu0 %v4092_v37, %s4750_s9 }
 0x36e   : > { %1609 = vrot.lane.b32.xlu0 %v4078_v17, %s4752_s24 }
 0x371   : > { %v1572_v10 = vpop.permute.xlu0 %1571  ;;  %v4099_v62 = vld [vmem:[#allocation2 + $0x18] sm:$0xff] }
 0x372   : > { %1577 = vst.msk [vmem:[#allocation2 + $0x20] sm:$0xff] %vm638_vm1, %v1572_v10  ;;  %1633 = vrot.lane.b32.xlu1 %v4099_v62, %s4750_s9  ;;  %1639 = vrot.lane.b32.xlu0 %v4092_v37, %s4751_s7 }
 0x376   : > { %1611 = vrot.lane.b32.xlu1 %v4085_v16, %s4752_s24 }
 0x377   : > { %v1574_v53 = vpop.permute.xlu1 %1573 }
 0x378   : > { %1578 = vst.msk [vmem:[#allocation2 + $0x28] sm:$0xff] %vm638_vm1, %v1574_v53  ;;  %v1820_v53 = vstv %s4183_s13  ;;  %s4279_s13 = sld [smem:[#allocation13 + $0x5]] }
 0x379   : > { %v4109_v11 = vld [vmem:[#allocation2 + $0x20] sm:$0xff] }
 0x37a   : > { %1641 = vrot.lane.b32.xlu1 %v4099_v62, %s4751_s7  ;;  %1669 = vrot.lane.b32.xlu0 %v4109_v11, %s4750_s9 }
 0x37d   : > { %v1582_v46 = vpop.permute.xlu0 %1581 }
 0x37e   : > { %1587 = vst.msk [vmem:[#allocation2 + $0x30] sm:$0xff] %vm638_vm1, %v1582_v46  ;;  %1617 = vrot.lane.b32.xlu0 %v4078_v17, %s4753_s12 }
 0x37f   : > { %v4118_v26 = vld [vmem:[#allocation2 + $0x28] sm:$0xff] }
 0x380   : > { %1671 = vrot.lane.b32.xlu1 %v4118_v26, %s4750_s9 }
 0x382   : > { %1647 = vrot.lane.b32.xlu0 %v4092_v37, %s4752_s24 }
 0x384   : > { %1619 = vrot.lane.b32.xlu1 %v4085_v16, %s4753_s12 }
 0x385   : > { %v1584_v54 = vpop.permute.xlu1 %1583  ;;  %v4131_v20 = vld [vmem:[#allocation2 + $0x30] sm:$0xff] }
 0x386   : > { %1588 = vst.msk [vmem:[#allocation2 + $0x38] sm:$0xff] %vm638_vm1, %v1584_v54  ;;  %1677 = vrot.lane.b32.xlu0 %v4109_v11, %s4751_s7  ;;  %v1982_v54 = vstv %s4181_s11 }
 0x388   : > { %1649 = vrot.lane.b32.xlu1 %v4099_v62, %s4752_s24 }
 0x38a   : > { %1707 = vrot.lane.b32.xlu0 %v4131_v20, %s4750_s9 }
 0x38c   : > { %1679 = vrot.lane.b32.xlu1 %v4118_v26, %s4751_s7 }
 0x38d   : > { %v4139_v59 = vld [vmem:[#allocation2 + $0x38] sm:$0xff] }
 0x38e   : > { %1655 = vrot.lane.b32.xlu0 %v4092_v37, %s4753_s12 }
 0x390   : > { %1709 = vrot.lane.b32.xlu1 %v4139_v59, %s4750_s9  ;;  %s4169_s9 = sld [smem:[#allocation11 + $0x8c]] }
 0x392   : > { %1685 = vrot.lane.b32.xlu0 %v4109_v11, %s4752_s24 }
 0x394   : > { %1657 = vrot.lane.b32.xlu1 %v4099_v62, %s4753_s12 }
 0x396   : > { %1715 = vrot.lane.b32.xlu0 %v4131_v20, %s4751_s7  ;;  %v1838_v27 = vstv %s4169_s9 }
 0x398   : > { %1687 = vrot.lane.b32.xlu1 %v4118_v26, %s4752_s24 }
 0x39a   : > { %1693 = vrot.lane.b32.xlu0 %v4109_v11, %s4753_s12 }
 0x39c   : > { %1717 = vrot.lane.b32.xlu1 %v4139_v59, %s4751_s7  ;;  %s4171_s7 = sld [smem:[#allocation11 + $0x10c]] }
 0x39e   : > { %1723 = vrot.lane.b32.xlu0 %v4131_v20, %s4752_s24 }
 0x3a0   : > { %1695 = vrot.lane.b32.xlu1 %v4118_v26, %s4753_s12 }
 0x3a2   : > { %1731 = vrot.lane.b32.xlu0 %v4131_v20, %s4753_s12  ;;  %4754 = sst [smem:[#allocation32_spill]] %s4171_s7  ;;  %v1862_v19 = vstv %s4171_s7 }
 0x3a3   : > { %s4268_s7 = sld [smem:[#allocation13 + $0x3]] }
 0x3a4   : > { %1725 = vrot.lane.b32.xlu1 %v4139_v59, %s4752_s24  ;;  %s4177_s24 = sld [smem:[#allocation11 + $0x28c]] }
 0x3a8   : > { %1733 = vrot.lane.b32.xlu1 %v4139_v59, %s4753_s12  ;;  %s4179_s12 = sld [smem:[#allocation11 + $0x30c]] }
 0x3aa   : > { %4755 = sst [smem:[#allocation33_spill]] %s4177_s24  ;;  %v1934_v3 = vstv %s4177_s24 }
 0x3ab   : > { %s4273_s24 = sld [smem:[#allocation13 + $0x4]] }
 0x3ae   : > { %v1958_v46 = vstv %s4179_s12 }
 0x3c9   : > { %v1594_v32 = vpop.permute.xlu0 %1593 }
 0x3ca   : > { %v1599_v15 = vmax.f32 %v4078_v17, %v1594_v32 }
 0x3cd   : > { %v1602_v8 = vpop.permute.xlu0 %1601 }
 0x3ce   : > { %v1607_v49 = vmax.f32 %v1599_v15, %v1602_v8  ;;  %v1844_v8 = vstv %s4187_s23  ;;  %v1940_v15 = vstv %s4195_s14  ;;  %s4771_s14 = sld [smem:[#allocation44_spill]] }
 0x3d1   : > { %v1596_v55 = vpop.permute.xlu1 %1595 }
 0x3d2   : > { %v1600_v12 = vmax.f32 %v4085_v16, %v1596_v55  ;;  %v1886_v16 = vstv %s4173_s16  ;;  %v1868_v55 = vstv %s4189_s1  ;;  %s2675_s1 = smov [#allocation15]  }
 0x3d5   : > { %v1604_v36 = vpop.permute.xlu1 %1603 }
 0x3d6   : > { %v1608_v18 = vmax.f32 %v1600_v12, %v1604_v36 }
 0x3dc   : > { %v4167_v42 = vpop.permute.xlu0 %1631 }
 0x3dd   : > { %v1637_v41 = vmax.f32 %v4092_v37, %v4167_v42  ;;  %v1892_v42 = vstv %s4191_s2  ;;  %s4284_s2 = sld [smem:[#allocation13 + $0x6]] }
 0x3e0   : > { %v1610_v25 = vpop.permute.xlu0 %1609 }
 0x3e1   : > { %v1615_v43 = vmax.f32 %v1607_v49, %v1610_v25  ;;  %v1964_v49 = vstv %s4197_s17  ;;  %s4769_s17 = sld [smem:[#allocation42_spill]] }
 0x3e3   : > { %4768 = sst [smem:[#allocation46_spill]] %s4284_s2  ;;  %s2584_s2 = sshll.u32 %s2675_s1, 4  ;;  %s2585_s2 = int_to_ptr.vmem [resolvable:$false] %s2584_s2 }
 0x3e4   : > { %v4185_v44 = vpop.permute.xlu1 %1633  ;;  %v1640_v61 = vpop.permute.xlu0 %1639 }
 0x3e5   : > { %v1645_v56 = vmax.f32 %v1637_v41, %v1640_v61 }
 0x3e8   : > { %v1612_v24 = vpop.permute.xlu1 %1611 }
 0x3e9   : > { %v1616_v63 = vmax.f32 %v1608_v18, %v1612_v24  ;;  %v1916_v24 = vstv %s4193_s26  ;;  %s2586_s26 = scalar_lea.vmem %s2585_s2, 4096 }
 0x3ec   : > { %v4204_v4 = vpop.permute.xlu1 %1641  ;;  %v4206_v45 = vpop.permute.xlu0 %1669 }
 0x3f0   : > { %v1618_v52 = vpop.permute.xlu0 %1617 }
 0x3f1   : > { %v1623_v30 = vmax.f32 %v1615_v43, %v1618_v52  ;;  %v1988_v43 = vstv %s4199_s8  ;;  %v1638_v52 = vmax.f32 %v4099_v62, %v4185_v44  ;;  %s4291_s8 = sld [smem:[#allocation13 + $0x7]] }
 0x3f2   : > { %v4221_v57 = vpop.permute.xlu1 %1671 }
 0x3f3   : > { %1625 = vst.msk [vmem:[#allocation3 + $0x2] sm:$0xff] %vm301_vm2, %v1623_v30  ;;  %v1646_v62 = vmax.f32 %v1638_v52, %v4204_v4 }
 0x3f4   : > { %v1648_v51 = vpop.permute.xlu0 %1647 }
 0x3f5   : > { %v1653_v32 = vmax.f32 %v1645_v56, %v1648_v51  ;;  %v1826_v51 = vstv %s4202_s29  ;;  %s4770_s29 = sld [smem:[#allocation43_spill]] }
 0x3f6   : > { %v1620_v5 = vpop.permute.xlu1 %1619 }
 0x3f7   : > { %v1624_v39 = vmax.f32 %v1616_v63, %v1620_v5 }
 0x3f8   : > { %v4236_v50 = vpop.permute.xlu0 %1677 }
 0x3f9   : > { %1626 = vst.msk [vmem:[#allocation3 + $0xa] sm:$0xff] %vm301_vm2, %v1624_v39 }
 0x3fa   : > { %v1741_v48 = vld [vmem:[#allocation3] sm:$0xff]  ;;  %v4243_v9 = vpop.permute.xlu1 %1649 }
 0x3fb   : > { %v1743_v60 = vld [vmem:[#allocation3 + $0x1] sm:$0xff] }
 0x3fc   : > { %v1745_v40 = vmax.f32 %v1741_v48, %v1743_v60  ;;  %v4251_v29 = vpop.permute.xlu0 %1707  ;;  %v1747_v17 = vld [vmem:[#allocation3 + $0x2] sm:$0xff]  ;;  %v1850_v48 = vstv %s4208_s3  ;;  %v1874_v60 = vstv %s4210_s15  ;;  %s4772_s3 = sld [smem:[#allocation45_spill]] }
 0x3fe   : > { %v4263_v37 = vpop.permute.xlu1 %1679  ;;  %v1749_v10 = vmax.f32 %v1745_v40, %v1747_v17  ;;  %v1922_v40 = vstv %s4214_s6 }
 0x400   : > { %v1742_v36 = vld [vmem:[#allocation3 + $0x8] sm:$0xff]  ;;  %v1656_v61 = vpop.permute.xlu0 %1655 }
 0x401   : > { %v1744_v25 = vld [vmem:[#allocation3 + $0x9] sm:$0xff]  ;;  %v1661_v30 = vmax.f32 %v1653_v32, %v1656_v61  ;;  %v1952_v61 = vstv %s4770_s29 }
 0x402   : > { %v1746_v12 = vmax.f32 %v1742_v36, %v1744_v25  ;;  %v1751_v18 = vld [vmem:[#allocation3 + $0x3] sm:$0xff]  ;;  %v4286_v5 = vpop.permute.xlu1 %1709  ;;  %v1752_v32 = vld [vmem:[#allocation3 + $0xb] sm:$0xff]  ;;  %v1928_v36 = vstv %s4234_s30  ;;  %s4822_s30 = sld [smem:[#allocation29_spill]] }
 0x403   : > { %v1748_v63 = vld [vmem:[#allocation3 + $0xa] sm:$0xff]  ;;  %v1753_v39 = vmax.f32 %v1749_v10, %v1751_v18  ;;  %1663 = vst.msk [vmem:[#allocation3 + $0x1a] sm:$0xff] %vm301_vm2, %v1661_v30  ;;  %v1654_v18 = vmax.f32 %v1646_v62, %v4243_v9  ;;  %v1675_v30 = vmax.f32 %v4109_v11, %v4206_v45 }
 0x404   : > { %v1750_v44 = vmax.f32 %v1746_v12, %v1748_v63  ;;  %v1686_v17 = vpop.permute.xlu0 %1685  ;;  %v1755_v4 = vld [vmem:[#allocation3 + $0x4] sm:$0xff]  ;;  %v1756_v12 = vld [vmem:[#allocation3 + $0xc] sm:$0xff] }
 0x405   : > { %v4306_v10 = vmax.f32 %v1753_v39, %v1755_v4 }
 0x406   : > { %v1754_v41 = vmax.f32 %v1750_v44, %v1752_v32  ;;  %v1658_v63 = vpop.permute.xlu1 %1657  ;;  %v1683_v32 = vmax.f32 %v1675_v30, %v4236_v50  ;;  %v1676_v50 = vmax.f32 %v4118_v26, %v4221_v57 }
 0x407   : > { %v1662_v25 = vmax.f32 %v1654_v18, %v1658_v63  ;;  %v1815_v45 = vmul.f32 %v1814_v35, %v4306_v10  ;;  %v1863_v26 = vmul.f32 %v1862_v19, %v4306_v10  ;;  %v1887_v57 = vmul.f32 %v1886_v16, %v4306_v10 }
 0x408   : > { %v1716_v52 = vpop.permute.xlu0 %1715  ;;  %v4318_v39 = vmax.f32 %v1754_v41, %v1756_v12  ;;  %v1691_v56 = vmax.f32 %v1683_v32, %v1686_v17  ;;  %v1839_v12 = vmul.f32 %v1838_v27, %v4306_v10  ;;  %v1684_v17 = vmax.f32 %v1676_v50, %v4263_v37  ;;  %p4824_p9 = scmp.ne.s32.totalorder %s4822_s30, 0 }
 0x409   : > { %1664 = vst.msk [vmem:[#allocation3 + $0x22] sm:$0xff] %vm301_vm2, %v1662_v25  ;;  %v1713_v32 = vmax.f32 %v4131_v20, %v4251_v29  ;;  %v1911_v25 = vmul.f32 %v1910_v22, %v4306_v10 }
 0x40a   : > { %v1759_v30 = vld [vmem:[#allocation3 + $0x18] sm:$0xff]  ;;  %v1688_v11 = vpop.permute.xlu1 %1687  ;;  %v1816_v18 = vmul.f32 %v1814_v35, %v4318_v39  ;;  %v1840_v62 = vmul.f32 %v1838_v27, %v4318_v39  ;;  %v1864_v37 = vmul.f32 %v1862_v19, %v4318_v39  ;;  %v1912_v29 = vmul.f32 %v1910_v22, %v4318_v39 }
 0x40b   : > { %v1761_v44 = vld [vmem:[#allocation3 + $0x19] sm:$0xff]  ;;  %v1817_v35 = vadd.f32 %v1815_v45, %v4044_v2  ;;  %v1841_v27 = vadd.f32 %v1839_v12, %v4046_v21  ;;  %v1865_v19 = vadd.f32 %v1863_v26, %v4048_v6  ;;  %v4372_v9 = vadd.f32 %v1911_v25, %v4052_v28 }
 0x40c   : > { %v1763_v41 = vmax.f32 %v1759_v30, %v1761_v44  ;;  %v1714_v44 = vmax.f32 %v4139_v59, %v4286_v5  ;;  %v1694_v30 = vpop.permute.xlu0 %1693  ;;  %v1765_v4 = vld [vmem:[#allocation3 + $0x1a] sm:$0xff]  ;;  %v1888_v59 = vmul.f32 %v1886_v16, %v4318_v39  ;;  %v1935_v5 = vmul.f32 %v1934_v3, %v4306_v10 }
 0x40d   : > { %v1699_v63 = vmax.f32 %v1691_v56, %v1694_v30  ;;  %v4369_v56 = vadd.f32 %v1887_v57, %v4050_v1  ;;  %v1692_v16 = vmax.f32 %v1684_v17, %v1688_v11  ;;  %v1721_v30 = vmax.f32 %v1713_v32, %v1716_v52 }
 0x40e   : > { %v1718_v50 = vpop.permute.xlu1 %1717  ;;  %v1767_v20 = vmax.f32 %v1763_v41, %v1765_v4  ;;  %v1818_v6 = vadd.f32 %v1816_v18, %v4061_v47  ;;  %v1842_v1 = vadd.f32 %v1840_v62, %v4063_v7  ;;  %v4380_v45 = vadd.f32 %v1864_v37, %v4065_v14 }
 0x40f   : > { %1701 = vst.msk [vmem:[#allocation3 + $0x32] sm:$0xff] %vm301_vm2, %v1699_v63  ;;  %v1936_v63 = vmul.f32 %v1934_v3, %v4318_v39  ;;  %v4383_v28 = vadd.f32 %v1888_v59, %v4067_v23  ;;  %v4386_v3 = vadd.f32 %v1912_v29, %v4069_v58  ;;  %v1959_v25 = vmul.f32 %v1958_v46, %v4306_v10 }
 0x410   : > { %v1760_v4 = vld [vmem:[#allocation3 + $0x20] sm:$0xff]  ;;  %v1724_v22 = vpop.permute.xlu0 %1723  ;;  %v1960_v14 = vmul.f32 %v1958_v46, %v4318_v39  ;;  %v1937_v17 = vadd.f32 %v1935_v5, %v4054_v13  ;;  %v1983_v58 = vmul.f32 %v1982_v54, %v4306_v10  ;;  %v1984_v32 = vmul.f32 %v1982_v54, %v4318_v39 }
 0x411   : > { %v1762_v41 = vld [vmem:[#allocation3 + $0x21] sm:$0xff]  ;;  %v1729_v18 = vmax.f32 %v1721_v30, %v1724_v22  ;;  %v1722_v37 = vmax.f32 %v1714_v44, %v1718_v50  ;;  %v1938_v59 = vadd.f32 %v1936_v63, %v4071_v38  ;;  %v1961_v39 = vadd.f32 %v1959_v25, %v4056_v0 }
 0x412   : > { %v1764_v2 = vmax.f32 %v1760_v4, %v1762_v41  ;;  %v1769_v21 = vld [vmem:[#allocation3 + $0x1b] sm:$0xff]  ;;  %v1696_v11 = vpop.permute.xlu1 %1695  ;;  %v1770_v57 = vld [vmem:[#allocation3 + $0x23] sm:$0xff]  ;;  %v1985_v63 = vadd.f32 %v1983_v58, %v4058_v34 }
 0x413   : > { %v1766_v52 = vld [vmem:[#allocation3 + $0x22] sm:$0xff]  ;;  %v1771_v12 = vmax.f32 %v1767_v20, %v1769_v21  ;;  %v1700_v47 = vmax.f32 %v1692_v16, %v1696_v11  ;;  %v1962_v16 = vadd.f32 %v1960_v14, %v4073_v31 }
 0x414   : > { %v1768_v7 = vmax.f32 %v1764_v2, %v1766_v52  ;;  %v1773_v62 = vld [vmem:[#allocation3 + $0x1c] sm:$0xff]  ;;  %v1732_v26 = vpop.permute.xlu0 %1731  ;;  %v1774_v4 = vld [vmem:[#allocation3 + $0x24] sm:$0xff]  ;;  %v1986_v2 = vadd.f32 %v1984_v32, %v4075_v33 }
 0x415   : > { %v1775_v23 = vmax.f32 %v1771_v12, %v1773_v62  ;;  %1702 = vst.msk [vmem:[#allocation3 + $0x3a] sm:$0xff] %vm301_vm2, %v1700_v47  ;;  %v1737_v20 = vmax.f32 %v1729_v18, %v1732_v26 }
 0x416   : > { %v1772_v46 = vmax.f32 %v1768_v7, %v1770_v57  ;;  %v1726_v29 = vpop.permute.xlu1 %1725  ;;  %v1777_v41 = vld [vmem:[#allocation3 + $0x30] sm:$0xff] }
 0x417   : > { %v1779_v13 = vld [vmem:[#allocation3 + $0x31] sm:$0xff]  ;;  %v1821_v5 = vmul.f32 %v1820_v53, %v1775_v23  ;;  %v1845_v10 = vmul.f32 %v1844_v8, %v1775_v23  ;;  %v1869_v54 = vmul.f32 %v1868_v55, %v1775_v23  ;;  %1739 = vst.msk [vmem:[#allocation3 + $0x4a] sm:$0xff] %vm301_vm2, %v1737_v20  ;;  %v1893_v38 = vmul.f32 %v1892_v42, %v1775_v23 }
 0x418   : > { %v1776_v44 = vmax.f32 %v1772_v46, %v1774_v4  ;;  %v1781_v50 = vmax.f32 %v1777_v41, %v1779_v13  ;;  %v1730_v30 = vmax.f32 %v1722_v37, %v1726_v29  ;;  %v1917_v22 = vmul.f32 %v1916_v24, %v1775_v23  ;;  %v1783_v0 = vld [vmem:[#allocation3 + $0x32] sm:$0xff] }
 0x419   : > { %v1823_v11 = vadd.f32 %v1821_v5, %v1817_v35  ;;  %v1847_v12 = vadd.f32 %v1845_v10, %v1841_v27  ;;  %v1871_v18 = vadd.f32 %v1869_v54, %v1865_v19  ;;  %v1895_v33 = vadd.f32 %v1893_v38, %v4369_v56 }
 0x41a   : > { %v1822_v21 = vmul.f32 %v1820_v53, %v1776_v44  ;;  %v1846_v52 = vmul.f32 %v1844_v8, %v1776_v44  ;;  %v1734_v25 = vpop.permute.xlu1 %1733  ;;  %v1785_v47 = vmax.f32 %v1781_v50, %v1783_v0  ;;  %v1870_v31 = vmul.f32 %v1868_v55, %v1776_v44 }
 0x41b   : > { %v1894_v7 = vmul.f32 %v1892_v42, %v1776_v44  ;;  %v1738_v34 = vmax.f32 %v1730_v30, %v1734_v25  ;;  %v1918_v53 = vmul.f32 %v1916_v24, %v1776_v44  ;;  %v1941_v35 = vmul.f32 %v1940_v15, %v1775_v23 }
 0x41c   : > { %v1778_v8 = vld [vmem:[#allocation3 + $0x38] sm:$0xff]  ;;  %v1824_v27 = vadd.f32 %v1822_v21, %v1818_v6  ;;  %v1848_v14 = vadd.f32 %v1846_v52, %v1842_v1  ;;  %v1919_v55 = vadd.f32 %v1917_v22, %v4372_v9  ;;  %v1942_v19 = vmul.f32 %v1940_v15, %v1776_v44 }
 0x41d   : > { %v1780_v62 = vld [vmem:[#allocation3 + $0x39] sm:$0xff]  ;;  %1740 = vst.msk [vmem:[#allocation3 + $0x52] sm:$0xff] %vm301_vm2, %v1738_v34  ;;  %v1965_v57 = vmul.f32 %v1964_v49, %v1775_v23  ;;  %v1966_v56 = vmul.f32 %v1964_v49, %v1776_v44  ;;  %v1989_v24 = vmul.f32 %v1988_v43, %v1775_v23  ;;  %v1872_v1 = vadd.f32 %v1870_v31, %v4380_v45 }
 0x41e   : > { %v1782_v42 = vmax.f32 %v1778_v8, %v1780_v62  ;;  %v1787_v26 = vld [vmem:[#allocation3 + $0x33] sm:$0xff]  ;;  %v1795_v37 = vld [vmem:[#allocation3 + $0x48] sm:$0xff]  ;;  %v1896_v9 = vadd.f32 %v1894_v7, %v4383_v28  ;;  %v1990_v15 = vmul.f32 %v1988_v43, %v1776_v44  ;;  %v1920_v49 = vadd.f32 %v1918_v53, %v4386_v3  ;;  %v1788_v4 = vld [vmem:[#allocation3 + $0x3b] sm:$0xff] }
 0x41f   : > { %v1784_v58 = vld [vmem:[#allocation3 + $0x3a] sm:$0xff]  ;;  %v1789_v32 = vmax.f32 %v1785_v47, %v1787_v26  ;;  %v1797_v6 = vld [vmem:[#allocation3 + $0x49] sm:$0xff]  ;;  %v1943_v23 = vadd.f32 %v1941_v35, %v1937_v17  ;;  %v1944_v28 = vadd.f32 %v1942_v19, %v1938_v59  ;;  %v1967_v13 = vadd.f32 %v1965_v57, %v1961_v39 }
 0x420   : > { %v1786_v20 = vmax.f32 %v1782_v42, %v1784_v58  ;;  %v1791_v46 = vld [vmem:[#allocation3 + $0x34] sm:$0xff]  ;;  %v1799_v29 = vmax.f32 %v1795_v37, %v1797_v6  ;;  %v1801_v45 = vld [vmem:[#allocation3 + $0x4a] sm:$0xff]  ;;  %v4448_v43 = vadd.f32 %v1966_v56, %v1962_v16  ;;  %v4450_v54 = vadd.f32 %v1989_v24, %v1985_v63  ;;  %v1792_v3 = vld [vmem:[#allocation3 + $0x3c] sm:$0xff] }
 0x421   : > { %v4446_v41 = vmax.f32 %v1789_v32, %v1791_v46  ;;  %v4452_v44 = vadd.f32 %v1990_v15, %v1986_v2  ;;  %v4782_v39 = vstv %s4212_s4  ;;  %v4783_v22 = vstv %s4216_s20  ;;  %s4792_s4 = sld [smem:[#allocation31_spill]] }
 0x422   : > { %v1790_v5 = vmax.f32 %v1786_v20, %v1788_v4  ;;  %v1803_v10 = vmax.f32 %v1799_v29, %v1801_v45  ;;  %v4784_v2 = vstv %s4219_s19  ;;  %v4785_v26 = vmov %v4782_v39  ;;  %s4797_s19 = sld [smem:[#allocation41_spill]] }
 0x423   : > { %v1827_v17 = vmul.f32 %v1826_v51, %v4446_v41  ;;  %v1851_v50 = vmul.f32 %v1850_v48, %v4446_v41  ;;  %v1875_v59 = vmul.f32 %v1874_v60, %v4446_v41  ;;  %v1899_v38 = vmul.f32 %v4782_v39, %v4446_v41 }
 0x424   : > { %v4466_v16 = vmax.f32 %v1790_v5, %v1792_v3  ;;  %v1923_v30 = vmul.f32 %v1922_v40, %v4446_v41  ;;  %v1947_v63 = vmul.f32 %v4783_v22, %v4446_v41  ;;  %v1971_v0 = vmul.f32 %v4784_v2, %v4446_v41  ;;  %v1796_v21 = vld [vmem:[#allocation3 + $0x50] sm:$0xff] }
 0x425   : > { %v1798_v52 = vld [vmem:[#allocation3 + $0x51] sm:$0xff]  ;;  %v1829_v25 = vadd.f32 %v1827_v17, %v1823_v11  ;;  %v1853_v47 = vadd.f32 %v1851_v50, %v1847_v12  ;;  %v1877_v31 = vadd.f32 %v1875_v59, %v1871_v18  ;;  %v1901_v7 = vadd.f32 %v1899_v38, %v1895_v33 }
 0x426   : > { %v1800_v34 = vmax.f32 %v1796_v21, %v1798_v52  ;;  %v1805_v53 = vld [vmem:[#allocation3 + $0x4b] sm:$0xff]  ;;  %v1828_v35 = vmul.f32 %v1826_v51, %v4466_v16  ;;  %v1852_v8 = vmul.f32 %v1850_v48, %v4466_v16  ;;  %v1876_v62 = vmul.f32 %v1874_v60, %v4466_v16  ;;  %v1806_v60 = vld [vmem:[#allocation3 + $0x53] sm:$0xff] }
 0x427   : > { %v1802_v19 = vld [vmem:[#allocation3 + $0x52] sm:$0xff]  ;;  %v1807_v42 = vmax.f32 %v1803_v10, %v1805_v53  ;;  %v1900_v11 = vmul.f32 %v4785_v26, %v4466_v16  ;;  %v1924_v12 = vmul.f32 %v1922_v40, %v4466_v16  ;;  %v1925_v18 = vadd.f32 %v1923_v30, %v1919_v55 }
 0x428   : > { %v1804_v33 = vmax.f32 %v1800_v34, %v1802_v19  ;;  %v1809_v51 = vld [vmem:[#allocation3 + $0x4c] sm:$0xff]  ;;  %v1830_v48 = vadd.f32 %v1828_v35, %v1824_v27  ;;  %v1854_v57 = vadd.f32 %v1852_v8, %v1848_v14  ;;  %v1878_v56 = vadd.f32 %v1876_v62, %v1872_v1  ;;  %v1810_v14 = vld [vmem:[#allocation3 + $0x54] sm:$0xff] }
 0x429   : > { %v1811_v24 = vmax.f32 %v1807_v42, %v1809_v51  ;;  %v1902_v58 = vadd.f32 %v1900_v11, %v1896_v9  ;;  %v1926_v32 = vadd.f32 %v1924_v12, %v1920_v49  ;;  %v4786_v37 = vmov %v4783_v22 }
 0x42a   : > { %v1948_v6 = vmul.f32 %v4786_v37, %v4466_v16  ;;  %v1808_v40 = vmax.f32 %v1804_v33, %v1806_v60  ;;  %v1949_v55 = vadd.f32 %v1947_v63, %v1943_v23  ;;  %v4787_v15 = vmov %v4784_v2 }
 0x42b   : > { %v1972_v20 = vmul.f32 %v4787_v15, %v4466_v16  ;;  %v1973_v27 = vadd.f32 %v1971_v0, %v1967_v13  ;;  %v4788_v1 = vstv %s4226_s21  ;;  %v4789_v29 = vstv %s4228_s25  ;;  %s4810_s21 = sld [smem:[#allocation46_spill]] }
 0x42c   : > { %v1833_v46 = vmul.f32 %v4788_v1, %v1811_v24  ;;  %v1857_v9 = vmul.f32 %v4789_v29, %v1811_v24  ;;  %v4790_v49 = vstv %s4230_s18  ;;  %v4791_v45 = vstv %s4769_s17  ;;  %s2223_s18 = sshll.u32 %s4792_s4, 7 }
 0x42d   : > { %v1881_v4 = vmul.f32 %v4790_v49, %v1811_v24  ;;  %v1905_v5 = vmul.f32 %v4791_v45, %v1811_v24  ;;  %v1812_v23 = vmax.f32 %v1808_v40, %v1810_v14  ;;  %v1929_v10 = vmul.f32 %v1928_v36, %v1811_v24  ;;  %s4552_s20 = scalar_lea.vmem [#allocation15], %s2223_s18 }
 0x42e   : > { %v1950_v3 = vadd.f32 %v1948_v6, %v1944_v28  ;;  %v1953_v17 = vmul.f32 %v1952_v61, %v1811_v24  ;;  %v1835_v13 = vadd.f32 %v1833_v46, %v1829_v25  ;;  %v1859_v50 = vadd.f32 %v1857_v9, %v1853_v47  ;;  %s2090_s25 = sshll.u32 %s4552_s20, 4  ;;  %s4603_s25 = int_to_ptr.vmem [resolvable:$true] %s2090_s25 }
 0x42f   : > { %v1883_v59 = vadd.f32 %v1881_v4, %v1877_v31  ;;  %v1907_v39 = vadd.f32 %v1905_v5, %v1901_v7  ;;  %v4793_v38 = vmov %v4788_v1  ;;  %v4794_v22 = vmov %v4789_v29  ;;  %s2580_s23 = scalar_lea.vmem %s4603_s25, 2048  ;;  %p2587_p1 = scmp.lt.s32.totalorder %s4603_s25, %s2585_s2 }
 0x430   : > { %v1834_v30 = vmul.f32 %v4793_v38, %v1812_v23  ;;  %v1858_v63 = vmul.f32 %v4794_v22, %v1812_v23  ;;  %v4795_v2 = vmov %v4790_v49  ;;  %v4796_v21 = vmov %v4791_v45  ;;  %p2581_p3 = scmp.ne.s32.totalorder %s4603_s25, %s2580_s23  ;;  %p2588_p4 = scmp.lt.s32.totalorder %s2586_s26, %s2580_s23 }
 0x431   : > { %v1882_v0 = vmul.f32 %v4795_v2, %v1812_v23  ;;  %v1906_v52 = vmul.f32 %v4796_v21, %v1812_v23  ;;  %v1930_v28 = vmul.f32 %v1928_v36, %v1812_v23  ;;  %v1931_v25 = vadd.f32 %v1929_v10, %v1925_v18 }
 0x432   : > { %v1954_v47 = vmul.f32 %v1952_v61, %v1812_v23  ;;  %v1955_v31 = vadd.f32 %v1953_v17, %v1949_v55  ;;  %v1836_v7 = vadd.f32 %v1834_v30, %v1830_v48  ;;  %v1860_v34 = vadd.f32 %v1858_v63, %v1854_v57  ;;  %p2582_p11 = pnand %p2581_p3, %p4824_p9  ;;  %p2589_p6 = por %p2588_p4, %p2587_p1 }
 0x433   : > { %v1884_v53 = vadd.f32 %v1882_v0, %v1878_v56  ;;  %v1908_v35 = vadd.f32 %v1906_v52, %v1902_v58  ;;  %v1932_v8 = vadd.f32 %v1930_v28, %v1926_v32  ;;  %v1974_v19 = vadd.f32 %v1972_v20, %v4448_v43 }
 0x434   : > { %v1956_v62 = vadd.f32 %v1954_v47, %v1950_v3  ;;  %v4798_v42 = vstv %s4771_s14  ;;  %v4800_v11 = vstv %s4797_s19  ;;  %v4802_v51 = vstv %s4772_s3  ;;  %p2583_p10 = pneg %p2582_p11 }
 0x435   : > { %v1977_v36 = vmul.f32 %v4798_v42, %v1811_v24  ;;  %v4799_v26 = vmov %v4798_v42  ;;  %v1995_v12 = vmul.f32 %v4800_v11, %v4446_v41  ;;  %v4801_v18 = vmov %v4800_v11 }
 0x436   : > { %v1978_v61 = vmul.f32 %v4799_v26, %v1812_v23  ;;  %v1996_v33 = vmul.f32 %v4801_v18, %v4466_v16  ;;  %v2001_v48 = vmul.f32 %v4802_v51, %v1811_v24  ;;  %v4803_v56 = vmov %v4802_v51  ;;  %p2590_p8 = pnand %p2589_p6, %p2583_p10 }
 0x437   : > { %v1979_v57 = vadd.f32 %v1977_v36, %v1973_v27  ;;  %v2002_v60 = vmul.f32 %v4803_v56, %v1812_v23  ;;  %v4804_v58 = vstv %s4249_s22  ;;  %v1997_v40 = vadd.f32 %v1995_v12, %v4450_v54  ;;  %s4811_s22 = sld [smem:[#allocation26_spill]] }
 0x438   : > { %v2007_v43 = vadd.f32 %v4804_v58, %v1835_v13  ;;  %v4805_v32 = vmov %v4804_v58  ;;  %v1980_v6 = vadd.f32 %v1978_v61, %v1974_v19  ;;  %v1998_v55 = vadd.f32 %v1996_v33, %v4452_v44 }
 0x439   : > { %v2008_v37 = vadd.f32 %v4805_v32, %v1836_v7  ;;  %v4806_v41 = vstv %s4256_s28  ;;  %v4808_v14 = vstv %s4261_s5  ;;  %v2003_v46 = vadd.f32 %v2001_v48, %v1997_v40 }
 0x43a   : > { %v2015_v15 = vadd.f32 %v4806_v41, %v1859_v50  ;;  %v2009_v16 = vmax.f32 %v2007_v43, 0.0  ;;  %v4807_v24 = vmov %v4806_v41  ;;  %v2024_v1 = vadd.f32 %v4808_v14, %v1883_v59 }
 0x43b   : > { %v2010_v20 = vmax.f32 %v2008_v37, 0.0  ;;  %v2016_v27 = vadd.f32 %v4807_v24, %v1860_v34  ;;  %v2004_v29 = vadd.f32 %v2002_v60, %v1998_v55  ;;  %v4809_v49 = vmov %v4808_v14 }
 0x43c   : > { %v2017_v9 = vmax.f32 %v2015_v15, 0.0  ;;  %v2025_v54 = vadd.f32 %v4809_v49, %v1884_v53  ;;  %2011 = vst.msk [vmem:[%s4552_s20] sm:$0xff] %vm301_vm2, %v2009_v16  ;;  %v2026_v4 = vmax.f32 %v2024_v1, 0.0  ;;  %v4812_v45 = vstv %s4268_s7  ;;  %s4823_s7 = sld [smem:[#allocation52_spill]] }
 0x43d   : > { %2012 = vst.msk [vmem:[%s4552_s20 + $0x8] sm:$0xff] %vm301_vm2, %v2010_v20  ;;  %v2018_v44 = vmax.f32 %v2016_v27, 0.0  ;;  %v2033_v5 = vadd.f32 %v4812_v45, %v1907_v39  ;;  %v4813_v23 = vmov %v4812_v45  ;;  %v4814_v17 = vstv %s4273_s24  ;;  %s2402_s5 = sshll.u32 %s4811_s22, 11 }
 0x43e   : > { %v2034_v10 = vadd.f32 %v4813_v23, %v1908_v35  ;;  %2376 = vst.msk [vmem:[%s4552_s20 + $0x10] sm:$0xff] %vm301_vm2, %v2017_v9  ;;  %v2027_v3 = vmax.f32 %v2025_v54, 0.0  ;;  %v2042_v13 = vadd.f32 %v4814_v17, %v1931_v25  ;;  %v4815_v50 = vmov %v4814_v17  ;;  %2379 = vst.msk [vmem:[%s4552_s20 + $0x20] sm:$0xff] %vm301_vm2, %v2026_v4 }
 0x43f   : > { %v2043_v59 = vadd.f32 %v4815_v50, %v1932_v8  ;;  %v4816_v38 = vstv %s4279_s13  ;;  %2377 = vst.msk [vmem:[%s4552_s20 + $0x18] sm:$0xff] %vm301_vm2, %v2018_v44  ;;  %v2035_v39 = vmax.f32 %v2033_v5, 0.0  ;;  %v4818_v0 = vstv %s4810_s21  ;;  %s2077_s13 = scalar_lea.sflag [#allocation6], %s4792_s4 }
 0x440   : > { %v2051_v30 = vadd.f32 %v4816_v38, %v1955_v31  ;;  %v2036_v22 = vmax.f32 %v2034_v10, 0.0  ;;  %v4817_v63 = vmov %v4816_v38  ;;  %v2060_v21 = vadd.f32 %v4818_v0, %v1979_v57  ;;  %2380 = vst.msk [vmem:[%s4552_s20 + $0x28] sm:$0xff] %vm301_vm2, %v2027_v3 }
 0x441   : > { %v2052_v2 = vadd.f32 %v4817_v63, %v1956_v62  ;;  %v2044_v52 = vmax.f32 %v2042_v13, 0.0  ;;  %v2045_v28 = vmax.f32 %v2043_v59, 0.0  ;;  %v4819_v47 = vmov %v4818_v0  ;;  %2382 = vst.msk [vmem:[%s4552_s20 + $0x30] sm:$0xff] %vm301_vm2, %v2035_v39 }
 0x442   : > { %v2053_v25 = vmax.f32 %v2051_v30, 0.0  ;;  %v2061_v31 = vadd.f32 %v4819_v47, %v1980_v6  ;;  %2383 = vst.msk [vmem:[%s4552_s20 + $0x38] sm:$0xff] %vm301_vm2, %v2036_v22  ;;  %v2062_v34 = vmax.f32 %v2060_v21, 0.0  ;;  %v4820_v53 = vstv %s4291_s8  ;;  %s4601_s24 = scalar_lea.hbm %s4823_s7, %s2402_s5 }
 0x443   : > { %v2054_v7 = vmax.f32 %v2052_v2, 0.0  ;;  %v2069_v35 = vadd.f32 %v4820_v53, %v2003_v46  ;;  %v4821_v8 = vmov %v4820_v53  ;;  %2385 = vst.msk [vmem:[%s4552_s20 + $0x40] sm:$0xff] %vm301_vm2, %v2044_v52  ;;  %2386 = vst.msk [vmem:[%s4552_s20 + $0x48] sm:$0xff] %vm301_vm2, %v2045_v28 }
 0x444   : > { %v2070_v62 = vadd.f32 %v4821_v8, %v2004_v29  ;;  %2388 = vst.msk [vmem:[%s4552_s20 + $0x50] sm:$0xff] %vm301_vm2, %v2053_v25  ;;  %v2063_v19 = vmax.f32 %v2061_v31, 0.0  ;;  %2391 = vst.msk [vmem:[%s4552_s20 + $0x60] sm:$0xff] %vm301_vm2, %v2062_v34 }
 0x445   : > { %2389 = vst.msk [vmem:[%s4552_s20 + $0x58] sm:$0xff] %vm301_vm2, %v2054_v7  ;;  %v2071_v42 = vmax.f32 %v2069_v35, 0.0 }
 0x446   : > { %v2072_v36 = vmax.f32 %v2070_v62, 0.0  ;;  %2392 = vst.msk [vmem:[%s4552_s20 + $0x68] sm:$0xff] %vm301_vm2, %v2063_v19 }
 0x447   : > { %2394 = vst.msk [vmem:[%s4552_s20 + $0x70] sm:$0xff] %vm301_vm2, %v2071_v42 }
 0x448   : > { %2395 = vst.msk [vmem:[%s4552_s20 + $0x78] sm:$0xff] %vm301_vm2, %v2072_v36 }
 0x449   : > { %2593 = shalt.err (!%p2590_p8)
}
 0x44a   : > { %s2594_s14 = scalar_lea.hbm %s4601_s24, 2048  ;;  %s2598_s29 = scalar_lea.hbm %s4823_s7, 4096 }
 0x44b   : > { %p2595_p5 = scmp.ne.s32.totalorder %s4601_s24, %s2594_s14  ;;  %p2599_p13 = scmp.lt.s32.totalorder %s4601_s24, %s4823_s7 }
 0x44c   : > { %p2600_p12 = scmp.lt.s32.totalorder %s2598_s29, %s2594_s14 }
 0x44d   : > { %p2596_p2 = pnand %p2595_p5, %p4824_p9 }
 0x44e   : > { %p2601_p0 = por %p2600_p12, %p2599_p13 }
 0x44f   : > { %p2597_p7 = pneg %p2596_p2 }
 0x451   : > { %p2602_p3 = pnand %p2601_p0, %p2597_p7 }
 0x453   : > { %2605 = shalt.err (!%p2602_p3)
}
 0x454   : > { %s2676_s27 = smov 128   ;;  %s2677_s0 = smov 8  }
 0x455   : > { %2421 = dma.vmem_to_hbm [thread:$0]  (%p4824_p9), %s4603_s25, 2048, %s4601_s24, %s2077_s13, %s2676_s27, %s2676_s27, %s2677_s0  }
 0x456 PF: > { %s4825_s9 = sld [smem:[#allocation22_spill]] }
 0x457   : > { %s4826_s16 = sld [smem:[#allocation27_spill]] }
 0x458   : > { %s4827_s10 = sld [smem:[#allocation25_spill]] }
 0x45c   : > { %s2105_s12 = sand.u32 1, %s4825_s9  }
 0x45d   : > { %p4828_p11 = scmp.ne.s32.totalorder %s4826_s16, 0  ;;  %s2106_s11 = scalar_lea.sflag [#allocation6], %s2105_s12 }
 0x45e   : > { %p4829_p10 = scmp.ge.s32.totalorder %s4827_s10, 2 }
 0x460   : > { %p2441_p1 = pnand %p4829_p10, %p4828_p11 }
 0x462   : > { %p2442_p4 = pneg %p2441_p1 }
 0x464   : > { %2643 = dma.done.wait (%p2442_p4), %s2106_s11, 2048  }
 0x465   : > { %2645 = vsyncadd (%p2442_p4), %s2106_s11, 4294965248  ;;  %s4830_s21 = sld [smem:[#allocation28_spill]] }
 0x466   : > { %s4831_s18 = sld [smem:[#allocation23_spill]] }
 0x467   : > { %s4832_s19 = sld [smem:[#allocation24_spill]] }
 0x468   : > { %s4833_s20 = sld [smem:[#allocation30_spill]] }
 0x46b   : > { %p22_p6 = scmp.ge.s32.totalorder %s4830_s21, 4  }
 0x46d   :  { %24 = sbr.rel (!%p22_p6) target bundleno = 16 (0x10), region = 119 }
 0x472   :  { %2111 = vsyncpa [#allocation5], 1 }
 0x473   :  { %2113 = vsyncpa [#allocation5 + $0x1], 1 }
 0x474   :  { %2114 = vsyncpa [#allocation6], 1 }
 0x475   :  { %2116 = vsyncpa [#allocation6 + $0x1], 1 }
 0x476   :  { %2117 = vsyncpa [#allocation7], 1 }
 0x477   :  { %2119 = vsyncpa [#allocation7 + $0x1], 1 }
 0x478   :  { %2120 = vsyncpa [#allocation12], 1 }
 0x479   :  { %2121 = vsyncpa [#allocation8], 1 }
 0x47a   :  { %2123 = vsyncpa [#allocation8 + $0x1], 1 }
 0x47b   :  { %2124 = vsyncpa [#allocation14], 1 }

</bundles_post_ra>
